<compile_context>
chip_gen: v5e
topology: v5e:2x2
jax: 0.10.0
libtpu: 0.0.40
codegen_flags: <defaults>
</compile_context>

<pallas_src>
import jax
import jax.numpy as jnp
from jax.experimental import pallas as pl
from jax.experimental.pallas import tpu as pltpu

NUM_GROUPS = 8
GN_EPS = 1e-5


# ----------------------------------------------------------------------------
# Plain-JAX glue: bilinear upsample (align_corners=True) via interp matrices.
# ----------------------------------------------------------------------------
def _interp_matrix(in_size, out_size):
    # 1-D linear interpolation weights matching nn.Upsample(align_corners=True).
    if in_size == 1 or out_size == 1:
        m = jnp.zeros((out_size, in_size), jnp.float32)
        return m.at[:, 0].set(1.0)
    src = jnp.arange(out_size, dtype=jnp.float32) * ((in_size - 1) / (out_size - 1))
    i0 = jnp.clip(jnp.floor(src).astype(jnp.int32), 0, in_size - 2)
    frac = src - i0.astype(jnp.float32)
    rows = jnp.arange(out_size)
    m = jnp.zeros((out_size, in_size), jnp.float32)
    m = m.at[rows, i0].add(1.0 - frac)
    m = m.at[rows, i0 + 1].add(frac)
    return m


def _bilinear_upsample_ac(x_nhwc, out_h, out_w):
    # TODO(synk): bilinear resize stays in plain-JAX glue (tiny dense interp
    # matrices); the DoubleConv hot path below is the Pallas kernel.
    _, H, W, _ = x_nhwc.shape
    mh = _interp_matrix(H, out_h)            # [out_h, H]
    mw = _interp_matrix(W, out_w)            # [out_w, W]
    y = jnp.einsum("oh,bhwc->bowc", mh, x_nhwc)
    y = jnp.einsum("pw,bowc->bopc", mw, y)
    return y


def _group_matrices(C, G):
    """Group one-hot indicator matrices, precomputed outside the kernel."""
    cpg = C // G
    ci = jnp.arange(C)[:, None]
    gi = jnp.arange(G)[None, :]
    gm = (ci // cpg == gi).astype(jnp.float32)        # [C, G]
    return gm, jnp.transpose(gm)                      # [C, G], [G, C]


# ----------------------------------------------------------------------------
# In-kernel GroupNorm + ReLU (2-D shapes only; tiny MXU dots for group sums).
# ----------------------------------------------------------------------------
def _group_norm_relu(h, gamma, beta, gm, gmt, eps=GN_EPS):
    # h: [R, C] f32, gamma/beta: [1, C], gm: [C, G], gmt: [G, C]
    R, C = h.shape
    G = gm.shape[1]
    cpg = C // G

    ch_sum = jnp.sum(h, axis=0, keepdims=True)          # [1, C] sublane reduce
    ch_sq = jnp.sum(h * h, axis=0, keepdims=True)       # [1, C]
    n = float(R * cpg)
    g_mean = jnp.dot(ch_sum, gm, preferred_element_type=jnp.float32) / n   # [1, G]
    g_msq = jnp.dot(ch_sq, gm, preferred_element_type=jnp.float32) / n     # [1, G]
    g_var = jnp.maximum(g_msq - g_mean * g_mean, 0.0)    # clamp: avoid NaN on rsqrt
    g_inv = jax.lax.rsqrt(g_var + eps)                   # EUP

    mean_c = jnp.dot(g_mean, gmt, preferred_element_type=jnp.float32)      # [1, C]
    inv_c = jnp.dot(g_inv, gmt, preferred_element_type=jnp.float32)        # [1, C]
    scale = inv_c * gamma                                # [1, C]
    shift = beta - mean_c * scale                        # [1, C]
    return jnp.maximum(h * scale + shift, 0.0)


# ----------------------------------------------------------------------------
# Pallas kernel: one grid step per batch image (GroupNorm needs global spatial
# statistics). Fused: conv1(on fused concat) -> GN -> ReLU -> conv2 -> GN -> ReLU.
# Convs are im2col-folded into one matmul each.
# ----------------------------------------------------------------------------
def up_doubleconv_kernel(xp_ref, w1_ref, g1_ref, b1_ref, gm1_ref, gmt1_ref,
                         w2_ref, g2_ref, b2_ref, gm2_ref, gmt2_ref,
                         out_ref, mid_ref):
    _, Hp, Wp, Cin = xp_ref.shape
    Cmid = w1_ref.shape[1]
    Cout = w2_ref.shape[1]
    Hh, Ww = Hp - 2, Wp - 2
    R = Hh * Ww
    mm_dtype = w1_ref.dtype          # matmul dtype (f32 or bf16); rest stays f32

    # ---- conv1: im2col patch [R, 9*Cin] and a single MXU matmul (K = 9*Cin).
    x = xp_ref[0]                    # [Hp, Wp, Cin], load once
    taps = []
    for dy in range(3):
        for dx in range(3):
            taps.append(x[dy:dy + Hh, dx:dx + Ww, :].reshape(R, Cin))
    patch1 = jnp.concatenate(taps, axis=-1)                         # [R, 9*Cin]
    acc1 = jnp.dot(patch1.astype(mm_dtype), w1_ref[...],
                   preferred_element_type=jnp.float32)              # [R, Cmid]

    h1 = _group_norm_relu(acc1, g1_ref[...], b1_ref[...],
                          gm1_ref[...], gmt1_ref[...])              # [R, Cmid] f32

    # ---- stage activation in a zero-padded VMEM scratch for conv2's halo.
    # Only the 1-pixel ring is zeroed (the interior is fully overwritten every
    # step); the ring is re-zeroed each step so megacore sharding stays correct.
    zero_row = jnp.zeros((1, Wp, Cmid), jnp.float32)
    zero_col = jnp.zeros((Hh, 1, Cmid), jnp.float32)
    mid_ref[0:1, :, :] = zero_row
    mid_ref[Hh + 1:Hp, :, :] = zero_row
    mid_ref[1:Hh + 1, 0:1, :] = zero_col
    mid_ref[1:Hh + 1, Ww + 1:Wp, :] = zero_col
    mid_ref[1:Hh + 1, 1:Ww + 1, :] = h1.reshape(Hh, Ww, Cmid)

    # ---- conv2: im2col patch [R, 9*Cmid] and a single MXU matmul (K = 9*Cmid).
    m = mid_ref[...]                 # [Hp, Wp, Cmid]
    taps2 = []
    for dy in range(3):
        for dx in range(3):
            taps2.append(m[dy:dy + Hh, dx:dx + Ww, :].reshape(R, Cmid))
    patch2 = jnp.concatenate(taps2, axis=-1)                        # [R, 9*Cmid]
    acc2 = jnp.dot(patch2.astype(mm_dtype), w2_ref[...],
                   preferred_element_type=jnp.float32)              # [R, Cout]

    h2 = _group_norm_relu(acc2, g2_ref[...], b2_ref[...],
                          gm2_ref[...], gmt2_ref[...])              # [R, Cout]

    # 2-D lane-contiguous store, no in-kernel 3-D reshape before the store.
    out_ref[0] = h2.astype(out_ref.dtype)


# ----------------------------------------------------------------------------
# VMEM budget derived from the actual shapes (double-buffered blocks + scratch
# + in-kernel temporaries), clamped to v7x's 64 MiB physical VMEM.
# ----------------------------------------------------------------------------
def _vmem_limit_bytes(Hp, Wp, Cin, Cmid, Cout):
    R = (Hp - 2) * (Wp - 2)
    blocks = (Hp * Wp * Cin                       # xp block
              + R * Cout                          # out block
              + 9 * Cin * Cmid + 9 * Cmid * Cout  # folded weights
              + 4 * (Cmid + Cout)                 # GN params + indicators (approx)
              )
    scratch = Hp * Wp * Cmid
    temps = R * (9 * Cin + 9 * Cmid + 2 * Cmid + 2 * Cout)   # patches / acc / h
    est = 4 * (2 * blocks + scratch + temps)                 # f32, 2x buffered blocks
    return int(min(64 * 1024 * 1024, max(2 * est, 32 * 1024 * 1024)))


# ----------------------------------------------------------------------------
# Wrapper: PyTorch NCHW in/out, NHWC + Pallas inside.
# ----------------------------------------------------------------------------
def up_forward(x1_nchw, x2_nchw, params, matmul_dtype=jnp.float32):
    """Up.forward(x1, x2). params = (w1[3,3,Cin,Cmid], g1, b1, w2[3,3,Cmid,Cout], g2, b2).

    matmul_dtype=jnp.bfloat16 casts the conv weights (wrapper) and LHS patches
    (in-kernel) for the MXU dots; GN / elementwise math stays f32.
    """
    w1, g1, b1, w2, g2, b2 = params
    x1 = jnp.transpose(x1_nchw, (0, 2, 3, 1))            # NHWC
    x2 = jnp.transpose(x2_nchw, (0, 2, 3, 1))
    B, H1, W1, C1 = x1.shape
    _, H2, W2, C2 = x2.shape
    Cin = C1 + C2
    Cmid = w1.shape[3]
    Cout = w2.shape[3]
    assert w1.shape[2] == Cin
    assert Cmid % NUM_GROUPS == 0 and Cout % NUM_GROUPS == 0

    # bilinear 2x upsample + F.pad to x2's spatial size (plain-JAX glue)
    x1u = _bilinear_upsample_ac(x1, 2 * H1, 2 * W1)
    dY, dX = H2 - 2 * H1, W2 - 2 * W1
    x1u = jnp.pad(x1u, ((0, 0), (dY // 2, dY - dY // 2),
                        (dX // 2, dX - dX // 2), (0, 0)))

    # Fused concat + halo pad: ONE padded NHWC tensor (cat order [x2, x1]).
    xp = jnp.pad(jnp.concatenate([x2, x1u], axis=-1),
                 ((0, 0), (1, 1), (1, 1), (0, 0)))       # [B, H2+2, W2+2, Cin]
    Hp, Wp = H2 + 2, W2 + 2
    R = H2 * W2

    # im2col-folded weights, (dy, dx, cin) row order matching the kernel's patch.
    w1f = w1.reshape(9 * Cin, Cmid).astype(matmul_dtype)
    w2f = w2.reshape(9 * Cmid, Cout).astype(matmul_dtype)
    g1r, b1r = g1.reshape(1, Cmid).astype(jnp.float32), b1.reshape(1, Cmid).astype(jnp.float32)
    g2r, b2r = g2.reshape(1, Cout).astype(jnp.float32), b2.reshape(1, Cout).astype(jnp.float32)
    gm1, gmt1 = _group_matrices(Cmid, NUM_GROUPS)
    gm2, gmt2 = _group_matrices(Cout, NUM_GROUPS)

    const = lambda shape: pl.BlockSpec(shape, lambda b: tuple(0 for _ in shape))

    out_2d = pl.pallas_call(
        up_doubleconv_kernel,
        out_shape=jax.ShapeDtypeStruct((B, R, Cout), jnp.float32),
        grid=(B,),
        in_specs=[
            pl.BlockSpec((1, Hp, Wp, Cin), lambda b: (b, 0, 0, 0)),
            const((9 * Cin, Cmid)),
            const((1, Cmid)), const((1, Cmid)),
            const((Cmid, NUM_GROUPS)), const((NUM_GROUPS, Cmid)),
            const((9 * Cmid, Cout)),
            const((1, Cout)), const((1, Cout)),
            const((Cout, NUM_GROUPS)), const((NUM_GROUPS, Cout)),
        ],
        out_specs=pl.BlockSpec((1, R, Cout), lambda b: (b, 0, 0)),
        scratch_shapes=[pltpu.VMEM((Hp, Wp, Cmid), jnp.float32)],
        compiler_params=pltpu.CompilerParams(
            dimension_semantics=("parallel",),
            vmem_limit_bytes=_vmem_limit_bytes(Hp, Wp, Cin, Cmid, Cout),
        ),
    )(xp, w1f, g1r, b1r, gm1, gmt1, w2f, g2r, b2r, gm2, gmt2)

    # back to PyTorch's NCHW output layout
    out_nhwc = out_2d.reshape(B, H2, W2, Cout)
    return jnp.transpose(out_nhwc, (0, 3, 1, 2))


# ----------------------------------------------------------------------------
# Pure-JAX reference (same math) for a correctness check.
# ----------------------------------------------------------------------------
def up_ref(x1_nchw, x2_nchw, params):
    w1, g1, b1, w2, g2, b2 = params
    x1 = jnp.transpose(x1_nchw, (0, 2, 3, 1))
    x2 = jnp.transpose(x2_nchw, (0, 2, 3, 1))
    _, H1, W1, _ = x1.shape
    _, H2, W2, _ = x2.shape

    x1u = _bilinear_upsample_ac(x1, 2 * H1, 2 * W1)
    dY, dX = H2 - 2 * H1, W2 - 2 * W1
    x1u = jnp.pad(x1u, ((0, 0), (dY // 2, dY - dY // 2),
                        (dX // 2, dX - dX // 2), (0, 0)))
    x = jnp.concatenate([x2, x1u], axis=-1)

    def conv(z, w):
        return jax.lax.conv_general_dilated(
            z, w, (1, 1), "SAME", dimension_numbers=("NHWC", "HWIO", "NHWC"))

    def gn_relu(z, gamma, beta, G=NUM_GROUPS, eps=GN_EPS):
        Bz, Hz, Wz, Cz = z.shape
        zg = z.reshape(Bz, Hz, Wz, G, Cz // G)
        mean = zg.mean(axis=(1, 2, 4), keepdims=True)
        var = zg.var(axis=(1, 2, 4), keepdims=True)
        zn = ((zg - mean) / jnp.sqrt(var + eps)).reshape(Bz, Hz, Wz, Cz)
        return jnp.maximum(zn * gamma + beta, 0.0)

    h = gn_relu(conv(x, w1), g1, b1)
    h = gn_relu(conv(h, w2), g2, b2)
    return jnp.transpose(h, (0, 3, 1, 2))


if __name__ == "__main__":
    B = 2                      # keep even so both v7x TensorCores get work
    C1, C2 = 16, 16            # x1 (upsampled) channels, x2 (skip) channels
    Cin = C1 + C2              # 32 -> DoubleConv(in=32, out=16, mid=16)
    Cmid = Cin // 2            # 16  (GroupNorm(8, 16))
    Cout = 16                  # GroupNorm(8, 16)
    H1 = W1 = 8                # x1 spatial (pre-upsample)
    H2 = W2 = 16               # x2 spatial

    key = jax.random.PRNGKey(0)
    ks = jax.random.split(key, 8)
    x1 = jax.random.normal(ks[0], (B, C1, H1, W1), jnp.float32)
    x2 = jax.random.normal(ks[1], (B, C2, H2, W2), jnp.float32)
    # conv weights in HWIO layout (= PyTorch [O,I,3,3] transposed to [3,3,I,O])
    w1 = jax.random.normal(ks[2], (3, 3, Cin, Cmid), jnp.float32) * 0.1
    g1 = 1.0 + 0.1 * jax.random.normal(ks[3], (Cmid,), jnp.float32)
    b1 = 0.1 * jax.random.normal(ks[4], (Cmid,), jnp.float32)
    w2 = jax.random.normal(ks[5], (3, 3, Cmid, Cout), jnp.float32) * 0.1
    g2 = 1.0 + 0.1 * jax.random.normal(ks[6], (Cout,), jnp.float32)
    b2 = 0.1 * jax.random.normal(ks[7], (Cout,), jnp.float32)
    params = (w1, g1, b1, w2, g2, b2)

    ref = up_ref(x1, x2, params)

    # f32 matmul path: tight correctness check against the pure-JAX reference.
    out = jax.block_until_ready(up_forward(x1, x2, params))
    assert out.shape == (B, Cout, H2, W2)
    err = float(jnp.max(jnp.abs(out - ref)))
    assert jnp.allclose(out, ref, atol=1e-3, rtol=1e-3), err

    # bf16 matmul path (recommended on v5e/v6e): sanity check only (loose tol).
    out_bf = jax.block_until_ready(
        up_forward(x1, x2, params, matmul_dtype=jnp.bfloat16))
    err_bf = float(jnp.max(jnp.abs(out_bf - ref)))
    assert err_bf < 0.3, err_bf

    print("KERNEL_OK")
</pallas_src>

<mosaic_0001>
module attributes {stable_mosaic.version = 11 : i64} {
  func.func @up_doubleconv_kernel(%arg0: i32, %arg1: memref<1x18x18x32xf32, #tpu.memory_space<vmem>>, %arg2: memref<288x16xf32, #tpu.memory_space<vmem>>, %arg3: memref<1x16xf32, #tpu.memory_space<vmem>>, %arg4: memref<1x16xf32, #tpu.memory_space<vmem>>, %arg5: memref<16x8xf32, #tpu.memory_space<vmem>>, %arg6: memref<8x16xf32, #tpu.memory_space<vmem>>, %arg7: memref<144x16xf32, #tpu.memory_space<vmem>>, %arg8: memref<1x16xf32, #tpu.memory_space<vmem>>, %arg9: memref<1x16xf32, #tpu.memory_space<vmem>>, %arg10: memref<16x8xf32, #tpu.memory_space<vmem>>, %arg11: memref<8x16xf32, #tpu.memory_space<vmem>>, %arg12: memref<1x256x16xf32, #tpu.memory_space<vmem>>, %arg13: memref<18x18x16xf32, #tpu.memory_space<vmem>>) attributes {dimension_semantics = [#tpu.dimension_semantics<parallel>], iteration_bounds = array<i64: 2>, scalar_prefetch = 0 : i64, scratch_operands = 1 : i64, tpu.core_type = #tpu.core_type<tc>, window_params = [{transform_indices = @transform_0, window_bounds = array<i64: 1, 18, 18, 32>}, {pipeline_mode = #tpu.pipeline_mode<synchronous>, transform_indices = @transform_1, window_bounds = array<i64: 288, 16>}, {pipeline_mode = #tpu.pipeline_mode<synchronous>, transform_indices = @transform_2, window_bounds = array<i64: 1, 16>}, {pipeline_mode = #tpu.pipeline_mode<synchronous>, transform_indices = @transform_3, window_bounds = array<i64: 1, 16>}, {pipeline_mode = #tpu.pipeline_mode<synchronous>, transform_indices = @transform_4, window_bounds = array<i64: 16, 8>}, {pipeline_mode = #tpu.pipeline_mode<synchronous>, transform_indices = @transform_5, window_bounds = array<i64: 8, 16>}, {pipeline_mode = #tpu.pipeline_mode<synchronous>, transform_indices = @transform_6, window_bounds = array<i64: 144, 16>}, {pipeline_mode = #tpu.pipeline_mode<synchronous>, transform_indices = @transform_7, window_bounds = array<i64: 1, 16>}, {pipeline_mode = #tpu.pipeline_mode<synchronous>, transform_indices = @transform_8, window_bounds = array<i64: 1, 16>}, {pipeline_mode = #tpu.pipeline_mode<synchronous>, transform_indices = @transform_9, window_bounds = array<i64: 16, 8>}, {pipeline_mode = #tpu.pipeline_mode<synchronous>, transform_indices = @transform_10, window_bounds = array<i64: 8, 16>}, {transform_indices = @transform_11, window_bounds = array<i64: 1, 256, 16>}]} {
    %c0 = arith.constant 0 : index
    %c0_0 = arith.constant 0 : index
    %c0_1 = arith.constant 0 : index
    %c0_2 = arith.constant 0 : index
    %0 = vector.load %arg1[%c0, %c0_0, %c0_1, %c0_2] : memref<1x18x18x32xf32, #tpu.memory_space<vmem>>, vector<1x18x18x32xf32>
    %1 = vector.shape_cast %0 : vector<1x18x18x32xf32> to vector<18x18x32xf32>
    %2 = vector.extract_strided_slice %1 {offsets = [0, 0, 0], sizes = [16, 16, 32], strides = [1, 1, 1]} : vector<18x18x32xf32> to vector<16x16x32xf32>
    %3 = vector.shape_cast %2 : vector<16x16x32xf32> to vector<256x32xf32>
    %4 = vector.extract_strided_slice %1 {offsets = [0, 1, 0], sizes = [16, 16, 32], strides = [1, 1, 1]} : vector<18x18x32xf32> to vector<16x16x32xf32>
    %5 = vector.shape_cast %4 : vector<16x16x32xf32> to vector<256x32xf32>
    %6 = vector.extract_strided_slice %1 {offsets = [0, 2, 0], sizes = [16, 16, 32], strides = [1, 1, 1]} : vector<18x18x32xf32> to vector<16x16x32xf32>
    %7 = vector.shape_cast %6 : vector<16x16x32xf32> to vector<256x32xf32>
    %8 = vector.extract_strided_slice %1 {offsets = [1, 0, 0], sizes = [16, 16, 32], strides = [1, 1, 1]} : vector<18x18x32xf32> to vector<16x16x32xf32>
    %9 = vector.shape_cast %8 : vector<16x16x32xf32> to vector<256x32xf32>
    %10 = vector.extract_strided_slice %1 {offsets = [1, 1, 0], sizes = [16, 16, 32], strides = [1, 1, 1]} : vector<18x18x32xf32> to vector<16x16x32xf32>
    %11 = vector.shape_cast %10 : vector<16x16x32xf32> to vector<256x32xf32>
    %12 = vector.extract_strided_slice %1 {offsets = [1, 2, 0], sizes = [16, 16, 32], strides = [1, 1, 1]} : vector<18x18x32xf32> to vector<16x16x32xf32>
    %13 = vector.shape_cast %12 : vector<16x16x32xf32> to vector<256x32xf32>
    %14 = vector.extract_strided_slice %1 {offsets = [2, 0, 0], sizes = [16, 16, 32], strides = [1, 1, 1]} : vector<18x18x32xf32> to vector<16x16x32xf32>
    %15 = vector.shape_cast %14 : vector<16x16x32xf32> to vector<256x32xf32>
    %16 = vector.extract_strided_slice %1 {offsets = [2, 1, 0], sizes = [16, 16, 32], strides = [1, 1, 1]} : vector<18x18x32xf32> to vector<16x16x32xf32>
    %17 = vector.shape_cast %16 : vector<16x16x32xf32> to vector<256x32xf32>
    %18 = vector.extract_strided_slice %1 {offsets = [2, 2, 0], sizes = [16, 16, 32], strides = [1, 1, 1]} : vector<18x18x32xf32> to vector<16x16x32xf32>
    %19 = vector.shape_cast %18 : vector<16x16x32xf32> to vector<256x32xf32>
    %20 = tpu.concatenate %3, %5, %7, %9, %11, %13, %15, %17, %19 in 1 : vector<256x32xf32>, vector<256x32xf32>, vector<256x32xf32>, vector<256x32xf32>, vector<256x32xf32>, vector<256x32xf32>, vector<256x32xf32>, vector<256x32xf32>, vector<256x32xf32> -> vector<256x288xf32>
    %c0_3 = arith.constant 0 : index
    %c0_4 = arith.constant 0 : index
    %21 = vector.load %arg2[%c0_3, %c0_4] : memref<288x16xf32, #tpu.memory_space<vmem>>, vector<288x16xf32>
    %cst = arith.constant dense<0.000000e+00> : vector<256x16xf32>
    %22 = tpu.matmul %20, %21, %cst {dimension_numbers = #tpu.dot_dimension_numbers<[1], [0], [0], [1], [0, 0, 1, 1], [], []>} : vector<256x288xf32>, vector<288x16xf32>, vector<256x16xf32> -> vector<256x16xf32>
    %c0_5 = arith.constant 0 : index
    %c0_6 = arith.constant 0 : index
    %23 = vector.load %arg3[%c0_5, %c0_6] : memref<1x16xf32, #tpu.memory_space<vmem>>, vector<1x16xf32>
    %c0_7 = arith.constant 0 : index
    %c0_8 = arith.constant 0 : index
    %24 = vector.load %arg4[%c0_7, %c0_8] : memref<1x16xf32, #tpu.memory_space<vmem>>, vector<1x16xf32>
    %c0_9 = arith.constant 0 : index
    %c0_10 = arith.constant 0 : index
    %25 = vector.load %arg5[%c0_9, %c0_10] : memref<16x8xf32, #tpu.memory_space<vmem>>, vector<16x8xf32>
    %c0_11 = arith.constant 0 : index
    %c0_12 = arith.constant 0 : index
    %26 = vector.load %arg6[%c0_11, %c0_12] : memref<8x16xf32, #tpu.memory_space<vmem>>, vector<8x16xf32>
    %cst_13 = arith.constant dense<0.000000e+00> : vector<16xf32>
    %27 = vector.multi_reduction <add>, %22, %cst_13 [0] : vector<256x16xf32> to vector<16xf32>
    %28 = vector.shape_cast %27 : vector<16xf32> to vector<1x16xf32>
    %29 = arith.mulf %22, %22 : vector<256x16xf32>
    %cst_14 = arith.constant dense<0.000000e+00> : vector<16xf32>
    %30 = vector.multi_reduction <add>, %29, %cst_14 [0] : vector<256x16xf32> to vector<16xf32>
    %31 = vector.shape_cast %30 : vector<16xf32> to vector<1x16xf32>
    %cst_15 = arith.constant dense<0.000000e+00> : vector<1x8xf32>
    %32 = tpu.matmul %28, %25, %cst_15 {dimension_numbers = #tpu.dot_dimension_numbers<[1], [0], [0], [1], [0, 0, 1, 1], [], []>} : vector<1x16xf32>, vector<16x8xf32>, vector<1x8xf32> -> vector<1x8xf32>
    %cst_16 = arith.constant 5.120000e+02 : f32
    %33 = vector.broadcast %cst_16 : f32 to vector<1x8xf32>
    %34 = arith.divf %32, %33 : vector<1x8xf32>
    %cst_17 = arith.constant dense<0.000000e+00> : vector<1x8xf32>
    %35 = tpu.matmul %31, %25, %cst_17 {dimension_numbers = #tpu.dot_dimension_numbers<[1], [0], [0], [1], [0, 0, 1, 1], [], []>} : vector<1x16xf32>, vector<16x8xf32>, vector<1x8xf32> -> vector<1x8xf32>
    %cst_18 = arith.constant 5.120000e+02 : f32
    %36 = vector.broadcast %cst_18 : f32 to vector<1x8xf32>
    %37 = arith.divf %35, %36 : vector<1x8xf32>
    %38 = arith.mulf %34, %34 : vector<1x8xf32>
    %39 = arith.subf %37, %38 : vector<1x8xf32>
    %cst_19 = arith.constant 0.000000e+00 : f32
    %40 = vector.broadcast %cst_19 : f32 to vector<1x8xf32>
    %41 = arith.maximumf %39, %40 : vector<1x8xf32>
    %cst_20 = arith.constant 9.99999974E-6 : f32
    %42 = vector.broadcast %cst_20 : f32 to vector<1x8xf32>
    %43 = arith.addf %41, %42 : vector<1x8xf32>
    %44 = math.rsqrt %43 : vector<1x8xf32>
    %cst_21 = arith.constant dense<0.000000e+00> : vector<1x16xf32>
    %45 = tpu.matmul %34, %26, %cst_21 {dimension_numbers = #tpu.dot_dimension_numbers<[1], [0], [0], [1], [0, 0, 1, 1], [], []>} : vector<1x8xf32>, vector<8x16xf32>, vector<1x16xf32> -> vector<1x16xf32>
    %cst_22 = arith.constant dense<0.000000e+00> : vector<1x16xf32>
    %46 = tpu.matmul %44, %26, %cst_22 {dimension_numbers = #tpu.dot_dimension_numbers<[1], [0], [0], [1], [0, 0, 1, 1], [], []>} : vector<1x8xf32>, vector<8x16xf32>, vector<1x16xf32> -> vector<1x16xf32>
    %47 = arith.mulf %46, %23 : vector<1x16xf32>
    %48 = arith.mulf %45, %47 : vector<1x16xf32>
    %49 = arith.subf %24, %48 : vector<1x16xf32>
    %50 = vector.broadcast %47 : vector<1x16xf32> to vector<256x16xf32>
    %51 = arith.mulf %22, %50 : vector<256x16xf32>
    %52 = vector.broadcast %49 : vector<1x16xf32> to vector<256x16xf32>
    %53 = arith.addf %51, %52 : vector<256x16xf32>
    %cst_23 = arith.constant 0.000000e+00 : f32
    %54 = vector.broadcast %cst_23 : f32 to vector<256x16xf32>
    %55 = arith.maximumf %53, %54 : vector<256x16xf32>
    %cst_24 = arith.constant 0.000000e+00 : f32
    %56 = vector.broadcast %cst_24 : f32 to vector<1x18x16xf32>
    %cst_25 = arith.constant 0.000000e+00 : f32
    %57 = vector.broadcast %cst_25 : f32 to vector<16x1x16xf32>
    %c0_26 = arith.constant 0 : index
    %c0_27 = arith.constant 0 : index
    %c0_28 = arith.constant 0 : index
    %58 = vector.load %arg13[%c0_26, %c0_27, %c0_28] : memref<18x18x16xf32, #tpu.memory_space<vmem>>, vector<1x18x16xf32>
    tpu.vector_store %arg13[%c0_26, %c0_27, %c0_28], %56 {strides = array<i32>} : memref<18x18x16xf32, #tpu.memory_space<vmem>>, vector<1x18x16xf32>,
    %c17 = arith.constant 17 : index
    %c0_29 = arith.constant 0 : index
    %c0_30 = arith.constant 0 : index
    %59 = vector.load %arg13[%c17, %c0_29, %c0_30] : memref<18x18x16xf32, #tpu.memory_space<vmem>>, vector<1x18x16xf32>
    tpu.vector_store %arg13[%c17, %c0_29, %c0_30], %56 {strides = array<i32>} : memref<18x18x16xf32, #tpu.memory_space<vmem>>, vector<1x18x16xf32>,
    %c1 = arith.constant 1 : index
    %c0_31 = arith.constant 0 : index
    %c0_32 = arith.constant 0 : index
    %60 = vector.load %arg13[%c1, %c0_31, %c0_32] : memref<18x18x16xf32, #tpu.memory_space<vmem>>, vector<16x1x16xf32>
    tpu.vector_store %arg13[%c1, %c0_31, %c0_32], %57 {strides = array<i32>} : memref<18x18x16xf32, #tpu.memory_space<vmem>>, vector<16x1x16xf32>,
    %c1_33 = arith.constant 1 : index
    %c17_34 = arith.constant 17 : index
    %c0_35 = arith.constant 0 : index
    %61 = vector.load %arg13[%c1_33, %c17_34, %c0_35] : memref<18x18x16xf32, #tpu.memory_space<vmem>>, vector<16x1x16xf32>
    tpu.vector_store %arg13[%c1_33, %c17_34, %c0_35], %57 {strides = array<i32>} : memref<18x18x16xf32, #tpu.memory_space<vmem>>, vector<16x1x16xf32>,
    %62 = vector.shape_cast %55 : vector<256x16xf32> to vector<16x16x16xf32>
    %c1_36 = arith.constant 1 : index
    %c1_37 = arith.constant 1 : index
    %c0_38 = arith.constant 0 : index
    %63 = vector.load %arg13[%c1_36, %c1_37, %c0_38] : memref<18x18x16xf32, #tpu.memory_space<vmem>>, vector<16x16x16xf32>
    tpu.vector_store %arg13[%c1_36, %c1_37, %c0_38], %62 {strides = array<i32>} : memref<18x18x16xf32, #tpu.memory_space<vmem>>, vector<16x16x16xf32>,
    %c0_39 = arith.constant 0 : index
    %c0_40 = arith.constant 0 : index
    %c0_41 = arith.constant 0 : index
    %64 = vector.load %arg13[%c0_39, %c0_40, %c0_41] : memref<18x18x16xf32, #tpu.memory_space<vmem>>, vector<18x18x16xf32>
    %65 = vector.extract_strided_slice %64 {offsets = [0, 0, 0], sizes = [16, 16, 16], strides = [1, 1, 1]} : vector<18x18x16xf32> to vector<16x16x16xf32>
    %66 = vector.shape_cast %65 : vector<16x16x16xf32> to vector<256x16xf32>
    %67 = vector.extract_strided_slice %64 {offsets = [0, 1, 0], sizes = [16, 16, 16], strides = [1, 1, 1]} : vector<18x18x16xf32> to vector<16x16x16xf32>
    %68 = vector.shape_cast %67 : vector<16x16x16xf32> to vector<256x16xf32>
    %69 = vector.extract_strided_slice %64 {offsets = [0, 2, 0], sizes = [16, 16, 16], strides = [1, 1, 1]} : vector<18x18x16xf32> to vector<16x16x16xf32>
    %70 = vector.shape_cast %69 : vector<16x16x16xf32> to vector<256x16xf32>
    %71 = vector.extract_strided_slice %64 {offsets = [1, 0, 0], sizes = [16, 16, 16], strides = [1, 1, 1]} : vector<18x18x16xf32> to vector<16x16x16xf32>
    %72 = vector.shape_cast %71 : vector<16x16x16xf32> to vector<256x16xf32>
    %73 = vector.extract_strided_slice %64 {offsets = [1, 1, 0], sizes = [16, 16, 16], strides = [1, 1, 1]} : vector<18x18x16xf32> to vector<16x16x16xf32>
    %74 = vector.shape_cast %73 : vector<16x16x16xf32> to vector<256x16xf32>
    %75 = vector.extract_strided_slice %64 {offsets = [1, 2, 0], sizes = [16, 16, 16], strides = [1, 1, 1]} : vector<18x18x16xf32> to vector<16x16x16xf32>
    %76 = vector.shape_cast %75 : vector<16x16x16xf32> to vector<256x16xf32>
    %77 = vector.extract_strided_slice %64 {offsets = [2, 0, 0], sizes = [16, 16, 16], strides = [1, 1, 1]} : vector<18x18x16xf32> to vector<16x16x16xf32>
    %78 = vector.shape_cast %77 : vector<16x16x16xf32> to vector<256x16xf32>
    %79 = vector.extract_strided_slice %64 {offsets = [2, 1, 0], sizes = [16, 16, 16], strides = [1, 1, 1]} : vector<18x18x16xf32> to vector<16x16x16xf32>
    %80 = vector.shape_cast %79 : vector<16x16x16xf32> to vector<256x16xf32>
    %81 = vector.extract_strided_slice %64 {offsets = [2, 2, 0], sizes = [16, 16, 16], strides = [1, 1, 1]} : vector<18x18x16xf32> to vector<16x16x16xf32>
    %82 = vector.shape_cast %81 : vector<16x16x16xf32> to vector<256x16xf32>
    %83 = tpu.concatenate %66, %68, %70, %72, %74, %76, %78, %80, %82 in 1 : vector<256x16xf32>, vector<256x16xf32>, vector<256x16xf32>, vector<256x16xf32>, vector<256x16xf32>, vector<256x16xf32>, vector<256x16xf32>, vector<256x16xf32>, vector<256x16xf32> -> vector<256x144xf32>
    %c0_42 = arith.constant 0 : index
    %c0_43 = arith.constant 0 : index
    %84 = vector.load %arg7[%c0_42, %c0_43] : memref<144x16xf32, #tpu.memory_space<vmem>>, vector<144x16xf32>
    %cst_44 = arith.constant dense<0.000000e+00> : vector<256x16xf32>
    %85 = tpu.matmul %83, %84, %cst_44 {dimension_numbers = #tpu.dot_dimension_numbers<[1], [0], [0], [1], [0, 0, 1, 1], [], []>} : vector<256x144xf32>, vector<144x16xf32>, vector<256x16xf32> -> vector<256x16xf32>
    %c0_45 = arith.constant 0 : index
    %c0_46 = arith.constant 0 : index
    %86 = vector.load %arg8[%c0_45, %c0_46] : memref<1x16xf32, #tpu.memory_space<vmem>>, vector<1x16xf32>
    %c0_47 = arith.constant 0 : index
    %c0_48 = arith.constant 0 : index
    %87 = vector.load %arg9[%c0_47, %c0_48] : memref<1x16xf32, #tpu.memory_space<vmem>>, vector<1x16xf32>
    %c0_49 = arith.constant 0 : index
    %c0_50 = arith.constant 0 : index
    %88 = vector.load %arg10[%c0_49, %c0_50] : memref<16x8xf32, #tpu.memory_space<vmem>>, vector<16x8xf32>
    %c0_51 = arith.constant 0 : index
    %c0_52 = arith.constant 0 : index
    %89 = vector.load %arg11[%c0_51, %c0_52] : memref<8x16xf32, #tpu.memory_space<vmem>>, vector<8x16xf32>
    %cst_53 = arith.constant dense<0.000000e+00> : vector<16xf32>
    %90 = vector.multi_reduction <add>, %85, %cst_53 [0] : vector<256x16xf32> to vector<16xf32>
    %91 = vector.shape_cast %90 : vector<16xf32> to vector<1x16xf32>
    %92 = arith.mulf %85, %85 : vector<256x16xf32>
    %cst_54 = arith.constant dense<0.000000e+00> : vector<16xf32>
    %93 = vector.multi_reduction <add>, %92, %cst_54 [0] : vector<256x16xf32> to vector<16xf32>
    %94 = vector.shape_cast %93 : vector<16xf32> to vector<1x16xf32>
    %cst_55 = arith.constant dense<0.000000e+00> : vector<1x8xf32>
    %95 = tpu.matmul %91, %88, %cst_55 {dimension_numbers = #tpu.dot_dimension_numbers<[1], [0], [0], [1], [0, 0, 1, 1], [], []>} : vector<1x16xf32>, vector<16x8xf32>, vector<1x8xf32> -> vector<1x8xf32>
    %cst_56 = arith.constant 5.120000e+02 : f32
    %96 = vector.broadcast %cst_56 : f32 to vector<1x8xf32>
    %97 = arith.divf %95, %96 : vector<1x8xf32>
    %cst_57 = arith.constant dense<0.000000e+00> : vector<1x8xf32>
    %98 = tpu.matmul %94, %88, %cst_57 {dimension_numbers = #tpu.dot_dimension_numbers<[1], [0], [0], [1], [0, 0, 1, 1], [], []>} : vector<1x16xf32>, vector<16x8xf32>, vector<1x8xf32> -> vector<1x8xf32>
    %cst_58 = arith.constant 5.120000e+02 : f32
    %99 = vector.broadcast %cst_58 : f32 to vector<1x8xf32>
    %100 = arith.divf %98, %99 : vector<1x8xf32>
    %101 = arith.mulf %97, %97 : vector<1x8xf32>
    %102 = arith.subf %100, %101 : vector<1x8xf32>
    %cst_59 = arith.constant 0.000000e+00 : f32
    %103 = vector.broadcast %cst_59 : f32 to vector<1x8xf32>
    %104 = arith.maximumf %102, %103 : vector<1x8xf32>
    %cst_60 = arith.constant 9.99999974E-6 : f32
    %105 = vector.broadcast %cst_60 : f32 to vector<1x8xf32>
    %106 = arith.addf %104, %105 : vector<1x8xf32>
    %107 = math.rsqrt %106 : vector<1x8xf32>
    %cst_61 = arith.constant dense<0.000000e+00> : vector<1x16xf32>
    %108 = tpu.matmul %97, %89, %cst_61 {dimension_numbers = #tpu.dot_dimension_numbers<[1], [0], [0], [1], [0, 0, 1, 1], [], []>} : vector<1x8xf32>, vector<8x16xf32>, vector<1x16xf32> -> vector<1x16xf32>
    %cst_62 = arith.constant dense<0.000000e+00> : vector<1x16xf32>
    %109 = tpu.matmul %107, %89, %cst_62 {dimension_numbers = #tpu.dot_dimension_numbers<[1], [0], [0], [1], [0, 0, 1, 1], [], []>} : vector<1x8xf32>, vector<8x16xf32>, vector<1x16xf32> -> vector<1x16xf32>
    %110 = arith.mulf %109, %86 : vector<1x16xf32>
    %111 = arith.mulf %108, %110 : vector<1x16xf32>
    %112 = arith.subf %87, %111 : vector<1x16xf32>
    %113 = vector.broadcast %110 : vector<1x16xf32> to vector<256x16xf32>
    %114 = arith.mulf %85, %113 : vector<256x16xf32>
    %115 = vector.broadcast %112 : vector<1x16xf32> to vector<256x16xf32>
    %116 = arith.addf %114, %115 : vector<256x16xf32>
    %cst_63 = arith.constant 0.000000e+00 : f32
    %117 = vector.broadcast %cst_63 : f32 to vector<256x16xf32>
    %118 = arith.maximumf %116, %117 : vector<256x16xf32>
    %c0_64 = arith.constant 0 : index
    %c0_65 = arith.constant 0 : index
    %c0_66 = arith.constant 0 : index
    %119 = vector.load %arg12[%c0_64, %c0_65, %c0_66] : memref<1x256x16xf32, #tpu.memory_space<vmem>>, vector<1x256x16xf32>
    %120 = vector.shape_cast %119 : vector<1x256x16xf32> to vector<256x16xf32>
    %121 = vector.shape_cast %118 : vector<256x16xf32> to vector<1x256x16xf32>
    tpu.vector_store %arg12[%c0_64, %c0_65, %c0_66], %121 {strides = array<i32>} : memref<1x256x16xf32, #tpu.memory_space<vmem>>, vector<1x256x16xf32>,
    return
  }
  func.func @transform_0(%arg0: i32) -> (i32, i32, i32, i32) {
    %c0_i32 = arith.constant 0 : i32
    %c0_i32_0 = arith.constant 0 : i32
    %c0_i32_1 = arith.constant 0 : i32
    %c0_i32_2 = arith.constant 0 : i32
    return %arg0, %c0_i32, %c0_i32_0, %c0_i32_1 : i32, i32, i32, i32
  }
  func.func @transform_1(%arg0: i32) -> (i32, i32) {
    %c0_i32 = arith.constant 0 : i32
    %c0_i32_0 = arith.constant 0 : i32
    %c0_i32_1 = arith.constant 0 : i32
    return %c0_i32, %c0_i32_0 : i32, i32
  }
  func.func @transform_2(%arg0: i32) -> (i32, i32) {
    %c0_i32 = arith.constant 0 : i32
    %c0_i32_0 = arith.constant 0 : i32
    %c0_i32_1 = arith.constant 0 : i32
    return %c0_i32, %c0_i32_0 : i32, i32
  }
  func.func @transform_3(%arg0: i32) -> (i32, i32) {
    %c0_i32 = arith.constant 0 : i32
    %c0_i32_0 = arith.constant 0 : i32
    %c0_i32_1 = arith.constant 0 : i32
    return %c0_i32, %c0_i32_0 : i32, i32
  }
  func.func @transform_4(%arg0: i32) -> (i32, i32) {
    %c0_i32 = arith.constant 0 : i32
    %c0_i32_0 = arith.constant 0 : i32
    %c0_i32_1 = arith.constant 0 : i32
    return %c0_i32, %c0_i32_0 : i32, i32
  }
  func.func @transform_5(%arg0: i32) -> (i32, i32) {
    %c0_i32 = arith.constant 0 : i32
    %c0_i32_0 = arith.constant 0 : i32
    %c0_i32_1 = arith.constant 0 : i32
    return %c0_i32, %c0_i32_0 : i32, i32
  }
  func.func @transform_6(%arg0: i32) -> (i32, i32) {
    %c0_i32 = arith.constant 0 : i32
    %c0_i32_0 = arith.constant 0 : i32
    %c0_i32_1 = arith.constant 0 : i32
    return %c0_i32, %c0_i32_0 : i32, i32
  }
  func.func @transform_7(%arg0: i32) -> (i32, i32) {
    %c0_i32 = arith.constant 0 : i32
    %c0_i32_0 = arith.constant 0 : i32
    %c0_i32_1 = arith.constant 0 : i32
    return %c0_i32, %c0_i32_0 : i32, i32
  }
  func.func @transform_8(%arg0: i32) -> (i32, i32) {
    %c0_i32 = arith.constant 0 : i32
    %c0_i32_0 = arith.constant 0 : i32
    %c0_i32_1 = arith.constant 0 : i32
    return %c0_i32, %c0_i32_0 : i32, i32
  }
  func.func @transform_9(%arg0: i32) -> (i32, i32) {
    %c0_i32 = arith.constant 0 : i32
    %c0_i32_0 = arith.constant 0 : i32
    %c0_i32_1 = arith.constant 0 : i32
    return %c0_i32, %c0_i32_0 : i32, i32
  }
  func.func @transform_10(%arg0: i32) -> (i32, i32) {
    %c0_i32 = arith.constant 0 : i32
    %c0_i32_0 = arith.constant 0 : i32
    %c0_i32_1 = arith.constant 0 : i32
    return %c0_i32, %c0_i32_0 : i32, i32
  }
  func.func @transform_11(%arg0: i32) -> (i32, i32, i32) {
    %c0_i32 = arith.constant 0 : i32
    %c0_i32_0 = arith.constant 0 : i32
    %c0_i32_1 = arith.constant 0 : i32
    return %arg0, %c0_i32, %c0_i32_0 : i32, i32, i32
  }
}

</mosaic_0001>

<bundles_post_ra>
// kernel: tpu_custom_call.1
= control target key start
LH: loop header
LB: loop body
LE: loop exit
PB: predicated region body
PF: predicated region fallthrough
CT: control target
= control target key end

     0   :  { %s5627_s17 = smov 0   ;;  %s9373_s0 = inlined_call_operand.vmem [shape: f32[2,18,18,32], index: 0, kind: input, shape index: {}]   ;;  %s9374_s1 = inlined_call_operand.vmem [shape: f32[288,16], index: 1, kind: input, shape index: {}]   ;;  %s9375_s2 = inlined_call_operand.vmem [shape: f32[1,16], index: 2, kind: input, shape index: {}]   ;;  %s9376_s3 = inlined_call_operand.vmem [shape: f32[1,16], index: 3, kind: input, shape index: {}]   ;;  %s9377_s4 = inlined_call_operand.vmem [shape: f32[16,8], index: 4, kind: input, shape index: {}]   ;;  %s9378_s5 = inlined_call_operand.vmem [shape: f32[8,16], index: 5, kind: input, shape index: {}]   ;;  %s9379_s6 = inlined_call_operand.vmem [shape: f32[144,16], index: 6, kind: input, shape index: {}]   ;;  %s9380_s7 = inlined_call_operand.vmem [shape: f32[1,16], index: 7, kind: input, shape index: {}]   ;;  %s9381_s8 = inlined_call_operand.vmem [shape: f32[1,16], index: 8, kind: input, shape index: {}]   ;;  %s9382_s9 = inlined_call_operand.vmem [shape: f32[16,8], index: 9, kind: input, shape index: {}]   ;;  %s9383_s10 = inlined_call_operand.vmem [shape: f32[8,16], index: 10, kind: input, shape index: {}]   ;;  %s9384_s11 = inlined_call_operand.vmem [shape: f32[2,256,16], index: 11, kind: output, shape index: {}]  }
   0x1 LB: > { %s4356_s18 = sadd.s32 4294967295, %s5556_s17   ;;  %p4360_p0 = scmp.ge.s32.totalorder %s5556_s17, 1  ;;  %s5556_s17 = sphi %s5627_s17, %s21_s17  }
   0x2   : > { %p337_p1 = scmp.lt.s32.totalorder %s5556_s17, 3 }
   0x4   : > { %p338_p2 = pnand %p4360_p0, %p337_p1 }
   0x6   : > { %341 = sbr.rel (%p338_p2) target bundleno = 1847 (0x737), region = 64 }
   0xb   : > { %p377_p3 = scmp.lt.s32.totalorder %s4356_s18, 1  ;;  %vm489_vm0 = vcmask 1046528   ;;  %s5558_s23 = smov 96   ;;  %vm570_vm1 = vcmask 1045504   ;;  %vm1285_vm2 = vcmask 261120   ;;  %vm1318_vm3 = vcmask 523264  }
   0xc   : > { %s5559_s24 = smov 32   ;;  %s5560_s25 = smov 64   ;;  %vm1351_vm4 = vcmask 785408   ;;  %vm1924_vm5 = vcmask 130048   ;;  %vm2164_vm7 = vcmask 64512   ;;  %vm2316_vm11 = vcmask 123904  }
   0xd   : > { %s9588_s18 = smov (!%p377_p3, %s4356_s18), 1  ;;  %s5563_s21 = smov 16   ;;  %vm2323_vm12 = vcmask 122880   ;;  %vm3412_vm13 = vcmask 392192   ;;  %vm3477_vm14 = vcmask 654336   ;;  %vm3542_vm15 = vcmask 916480  }
   0xe   : > { %s4475_s19 = smul.u32 432, %s9588_s18  ;;  %s5564_s14 = smov 48  }
   0xf   : > { %s5565_s15 = smov 80   ;;  %s5566_s16 = smov 112  }
  0x10   : > { %s5641_s22 = scalar_lea.vmem %s9373_s0, %s4475_s19  ;;  %s4438_s29 = sshll.u32 %s9588_s18, 8 }
  0x11   : > { %v5644_v0 = vld [vmem:[%s5641_s22] sm:$0xff]  ;;  %v5647_v1 = vld [vmem:[%s5641_s22 + $0x8] sm:$0xff]  ;;  %v389_v2 = vld [vmem:[%s5641_s22 + $0x10] sm:$0x3]  ;;  %s9227_s12 = scalar_lea.vmem %s9384_s11, %s4438_s29 }
  0x12   : > { %v490_v3 = vrot.slane %v5644_v0, 1  ;;  %v491_v4 = vrot.slane %v5647_v1, 1  ;;  %v493_v5 = vrot.slane %v389_v2, 1  ;;  %v574_v6 = vrot.slane %v389_v2, 2  ;;  %v5653_v7 = vld [vmem:[%s5641_s22 + $0x18] sm:$0xff]  ;;  %v5656_v8 = vld [vmem:[%s5641_s22 + $0x20] sm:$0xff] }
  0x13   : > { %v4503_v9 = vpack.i.bf16 %v5656_v8, %v5653_v7  ;;  %v571_v10 = vrot.slane %v5644_v0, 2  ;;  %v572_v11 = vrot.slane %v5647_v1, 2  ;;  %v392_v12 = vld [vmem:[%s5641_s22 + $0x28] sm:$0x3]  ;;  %v495_v13 = vrot.slane %v5653_v7, 1  ;;  %v5675_v21 = vld [vmem:[%s5641_s22 + $0x30] sm:$0xff] }
  0x14   : > { %v492_v14 = vsel %vm489_vm0, %v490_v3, %v491_v4  ;;  %v494_v15 = vsel %vm489_vm0, %v491_v4, %v493_v5  ;;  %v496_v16 = vrot.slane %v5656_v8, 1  ;;  %v498_v17 = vrot.slane %v392_v12, 1  ;;  %v5679_v22 = vld [vmem:[%s5641_s22 + $0x38] sm:$0xff]  ;;  %v419_v24 = vld [vmem:[%s5641_s22 + $0x100] sm:$0x3]  ;;  %v5709_v43 = vld [vmem:[%s5641_s22 + $0x108] sm:$0xff] }
  0x15   : > { %v4493_v18 = vpack.i.bf16 %v494_v15, %v492_v14  ;;  %4504 = vrot.lane.b32.xlu1 %v4503_v9, %s5558_s23  ;;  %v5682_v23 = vld [vmem:[%s5641_s22 + $0xf8] sm:$0xff]  ;;  %v573_v25 = vsel %vm570_vm1, %v571_v10, %v572_v11  ;;  %v575_v26 = vsel %vm570_vm1, %v572_v11, %v574_v6  ;;  %v581_v28 = vrot.slane %v5675_v21, 2  ;;  %v395_v42 = vld [vmem:[%s5641_s22 + $0x40] sm:$0x3]  ;;  %v5712_v44 = vld [vmem:[%s5641_s22 + $0x110] sm:$0xff] }
  0x16   : > { %v5669_v19 = vsel %vm489_vm0, %v495_v13, %v496_v16  ;;  %v5672_v20 = vsel %vm489_vm0, %v496_v16, %v498_v17  ;;  %v582_v29 = vrot.slane %v5679_v22, 2  ;;  %v9386_v30 = vrot.slane %v5682_v23, 2  ;;  %v5748_v60 = vld [vmem:[%s5641_s22 + $0x48] sm:$0xff]  ;;  %v5751_v61 = vld [vmem:[%s5641_s22 + $0x50] sm:$0xff]  ;;  %v422_v62 = vld [vmem:[%s5641_s22 + $0x118] sm:$0x3] }
  0x17   : > { %9454 = vst [vmem:[#allocation3_spill] sm:$0xff] %v5669_v19  ;;  %4494 = vrot.lane.b32.xlu0 %v4493_v18, %s5559_s24  ;;  %v4508_v27 = vpack.i.bf16 %v5672_v20, %v5669_v19  ;;  %v624_v31 = vrot.slane %v419_v24, 2  ;;  %v4498_v32 = vpack.i.bf16 %v575_v26, %v573_v25  ;;  %v500_v33 = vrot.slane %v5675_v21, 1  ;;  %v398_v16 = vld [vmem:[%s5641_s22 + $0x58] sm:$0x3]  ;;  %v5781_v17 = vld [vmem:[%s5641_s22 + $0x120] sm:$0xff] }
  0x18   : > { %9455 = vst [vmem:[#allocation4_spill] sm:$0xff] %v5672_v20  ;;  %v501_v34 = vrot.slane %v5679_v22, 1  ;;  %v9385_v35 = vrot.slane %v5682_v23, 1  ;;  %v543_v36 = vrot.slane %v419_v24, 1  ;;  %v577_v37 = vrot.slane %v5656_v8, 2  ;;  %v5784_v18 = vld [vmem:[%s5641_s22 + $0x128] sm:$0xff] }
  0x19   : > { %v579_v38 = vrot.slane %v392_v12, 2  ;;  %v5698_v39 = vsel %vm570_vm1, %v581_v28, %v582_v29  ;;  %v5703_v40 = vsel %vm570_vm1, %v9386_v30, %v624_v31  ;;  %v576_v41 = vrot.slane %v5653_v7, 2  ;;  %9462 = vst [vmem:[#allocation11_spill] sm:$0xff] %v5751_v61  ;;  %v5912_v30 = vld [vmem:[%s5641_s22 + $0x158] sm:$0xff]  ;;  %v6133_v20 = vld [vmem:[%s5641_s22 + $0xe0] sm:$0xff] }
  0x1a   : > { %9456 = vst [vmem:[#allocation5_spill] sm:$0xff] %v5698_v39  ;;  %v5718_v46 = vsel %vm489_vm0, %v500_v33, %v501_v34  ;;  %v5723_v47 = vsel %vm489_vm0, %v9385_v35, %v543_v36  ;;  %v4528_v49 = vpack.i.bf16 %v5698_v39, %v5703_v40  ;;  %v584_v51 = vrot.slane %v395_v42, 2  ;;  %v5909_v35 = vld [vmem:[%s5641_s22 + $0x150] sm:$0xff] }
  0x1b   : > { %9457 = vst [vmem:[#allocation6_spill] sm:$0xff] %v5703_v40  ;;  %v5715_v45 = vsel %vm570_vm1, %v577_v37, %v579_v38  ;;  %v5726_v48 = vsel %vm570_vm1, %v576_v41, %v577_v37  ;;  %v626_v52 = vrot.slane %v5709_v43, 2  ;;  %v627_v53 = vrot.slane %v5712_v44, 2  ;;  %v5812_v41 = vld [vmem:[%s5641_s22 + $0x60] sm:$0xff]  ;;  %v1511_v40 = vld [vmem:[%s9374_s1 + $0xf8] sm:$0xff] }
  0x1c   : > { %9458 = vst [vmem:[#allocation7_spill] sm:$0xff] %v5718_v46  ;;  %v4513_v50 = vpack.i.bf16 %v5715_v45, %v5726_v48  ;;  %v4523_v54 = vpack.i.bf16 %v5718_v46, %v5723_v47  ;;  %v503_v55 = vrot.slane %v395_v42, 1  ;;  %v545_v56 = vrot.slane %v5709_v43, 1  ;;  %v5815_v42 = vld [vmem:[%s5641_s22 + $0x68] sm:$0xff] }
  0x1d   : > { %4509 = vrot.lane.b32.xlu1 %v4508_v27, %s5559_s24  ;;  %9459 = vst [vmem:[#allocation8_spill] sm:$0xff] %v5723_v47  ;;  %v546_v57 = vrot.slane %v5712_v44, 1  ;;  %v5741_v58 = vsel %vm570_vm1, %v582_v29, %v584_v51  ;;  %v5744_v59 = vsel %vm570_vm1, %v626_v52, %v627_v53  ;;  %v4518_v63 = vpack.i.bf16 %v5679_v22, %v5675_v21 }
  0x1e   : > { %4514 = vrot.lane.b32.xlu2 %v4513_v50, %s5560_s25  ;;  %9460 = vst [vmem:[#allocation9_spill] sm:$0xff] %v5741_v58  ;;  %v5757_v2 = vsel %vm489_vm0, %v501_v34, %v503_v55  ;;  %v4543_v4 = vpack.i.bf16 %v5741_v58, %v5744_v59  ;;  %v586_v5 = vrot.slane %v5748_v60, 2  ;;  %v587_v6 = vrot.slane %v5751_v61, 2 }
  0x1f   : > { %4499 = vrot.lane.b32.xlu0 %v4498_v32, %s5560_s25  ;;  %9461 = vst [vmem:[#allocation10_spill] sm:$0xff] %v5744_v59  ;;  %v5760_v3 = vsel %vm489_vm0, %v545_v56, %v546_v57  ;;  %v629_v9 = vrot.slane %v422_v62, 2  ;;  %v505_v11 = vrot.slane %v5748_v60, 1  ;;  %v506_v12 = vrot.slane %v5751_v61, 1 }
  0x20   : > { %9463 = vst [vmem:[#allocation12_spill] sm:$0xff] %v5757_v2  ;;  %v4538_v10 = vpack.i.bf16 %v5757_v2, %v5760_v3  ;;  %v548_v13 = vrot.slane %v422_v62, 1  ;;  %v5773_v14 = vsel %vm570_vm1, %v586_v5, %v587_v6  ;;  %v4533_v24 = vpack.i.bf16 %v5748_v60, %v5712_v44 }
  0x21   : > { %9464 = vst [vmem:[#allocation13_spill] sm:$0xff] %v5760_v3  ;;  %v5776_v15 = vsel %vm570_vm1, %v627_v53, %v629_v9  ;;  %v5789_v25 = vsel %vm489_vm0, %v505_v11, %v506_v12  ;;  %v589_v28 = vrot.slane %v398_v16, 2  ;;  %v631_v29 = vrot.slane %v5781_v17, 2  ;;  %v401_v9 = vld [vmem:[%s5641_s22 + $0x70] sm:$0x3]  ;;  %v5848_v11 = vld [vmem:[%s5641_s22 + $0x140] sm:$0xff] }
  0x22   : > { %9465 = vst [vmem:[#allocation14_spill] sm:$0xff] %v5773_v14  ;;  %v5792_v26 = vsel %vm489_vm0, %v546_v57, %v548_v13  ;;  %v4558_v27 = vpack.i.bf16 %v5773_v14, %v5776_v15  ;;  %v632_v31 = vrot.slane %v5784_v18, 2  ;;  %v508_v33 = vrot.slane %v398_v16, 1 }
  0x23   : > { %9466 = vst [vmem:[#allocation15_spill] sm:$0xff] %v5776_v15  ;;  %v4553_v32 = vpack.i.bf16 %v5789_v25, %v5792_v26  ;;  %v550_v34 = vrot.slane %v5781_v17, 1  ;;  %v551_v36 = vrot.slane %v5784_v18, 1  ;;  %v5805_v37 = vsel %vm570_vm1, %v587_v6, %v589_v28 }
  0x24   : > { %9467 = vst [vmem:[#allocation16_spill] sm:$0xff] %v5789_v25  ;;  %v5808_v38 = vsel %vm570_vm1, %v631_v29, %v632_v31  ;;  %v4548_v50 = vpack.i.bf16 %v5751_v61, %v5781_v17  ;;  %v5821_v51 = vsel %vm489_vm0, %v506_v12, %v508_v33  ;;  %v592_v55 = vrot.slane %v5815_v42, 2 }
  0x25   : > { %4529 = vrot.lane.b32.xlu1 %v4528_v49, %s5560_s25  ;;  %9468 = vst [vmem:[#allocation17_spill] sm:$0xff] %v5792_v26  ;;  %v425_v49 = vld [vmem:[%s5641_s22 + $0x130] sm:$0x3]  ;;  %v5824_v52 = vsel %vm489_vm0, %v550_v34, %v551_v36  ;;  %v4573_v53 = vpack.i.bf16 %v5805_v37, %v5808_v38  ;;  %v510_v62 = vrot.slane %v5812_v41, 1  ;;  %v4563_v12 = vpack.i.bf16 %v5812_v41, %v5784_v18 }
  0x26   : > { %4519 = vrot.lane.b32.xlu2 %v4518_v63, %s5558_s23  ;;  %9469 = vst [vmem:[#allocation18_spill] sm:$0xff] %v5805_v37  ;;  %v634_v56 = vrot.slane %v425_v49, 2  ;;  %v4568_v57 = vpack.i.bf16 %v5821_v51, %v5824_v52  ;;  %v511_v63 = vrot.slane %v5815_v42, 1  ;;  %v637_v29 = vrot.slane %v5848_v11, 2 }
  0x27   : > { %4524 = vrot.lane.b32.xlu0 %v4523_v54, %s5559_s24  ;;  %9470 = vst [vmem:[#allocation19_spill] sm:$0xff] %v5808_v38  ;;  %v591_v54 = vrot.slane %v5812_v41, 2  ;;  %v556_v34 = vrot.slane %v5848_v11, 1  ;;  %v1482_v38 = vld [vmem:[%s9374_s1 + $0x10] sm:$0xff] }
  0x28   : > { %9471 = vst [vmem:[#allocation20_spill] sm:$0xff] %v5812_v41  ;;  %v5840_v6 = vsel %vm570_vm1, %v632_v31, %v634_v56  ;;  %v5853_v13 = vsel %vm489_vm0, %v510_v62, %v511_v63 }
  0x29   : > { %9472 = vst [vmem:[#allocation21_spill] sm:$0xff] %v5815_v42  ;;  %v5837_v5 = vsel %vm570_vm1, %v591_v54, %v592_v55  ;;  %v428_v54 = vld [vmem:[%s5641_s22 + $0x148] sm:$0x3] }
  0x2a   : > { %9473 = vst [vmem:[#allocation22_spill] sm:$0xff] %v5821_v51 }
  0x2b   : > { %9474 = vst [vmem:[#allocation23_spill] sm:$0xff] %v5824_v52  ;;  %v6010_v52 = vld [vmem:[%s5641_s22 + $0x168] sm:$0xff] }
  0x2c   : > { %9475 = vst [vmem:[#allocation24_spill] sm:$0xff] %v5837_v5 }
  0x2d   : > { %4544 = vrot.lane.b32.xlu1 %v4543_v4, %s5560_s25  ;;  %v553_v4 = vrot.slane %v425_v49, 1  ;;  %9476 = vst [vmem:[#allocation25_spill] sm:$0xff] %v5840_v6 }
  0x2e   : > { %4534 = vrot.lane.b32.xlu2 %v4533_v24, %s5558_s23  ;;  %9478 = vst [vmem:[#allocation27_spill] sm:$0xff] %v5848_v11  ;;  %v4588_v24 = vpack.i.bf16 %v5837_v5, %v5840_v6 }
  0x2f   : > { %4539 = vrot.lane.b32.xlu0 %v4538_v10, %s5559_s24  ;;  %v5845_v10 = vld [vmem:[%s5641_s22 + $0x138] sm:$0xff]  ;;  %9479 = vst [vmem:[#allocation28_spill] sm:$0xff] %v5853_v13  ;;  %v5856_v16 = vsel %vm489_vm0, %v551_v36, %v553_v4 }
  0x30   : > { %9477 = vst [vmem:[#allocation26_spill] sm:$0xff] %v5845_v10  ;;  %v636_v28 = vrot.slane %v5845_v10, 2  ;;  %v4583_v31 = vpack.i.bf16 %v5853_v13, %v5856_v16  ;;  %v555_v33 = vrot.slane %v5845_v10, 1  ;;  %v4578_v56 = vpack.i.bf16 %v5815_v42, %v5845_v10 }
  0x31   : > { %9480 = vst [vmem:[#allocation29_spill] sm:$0xff] %v5856_v16 }
  0x32   : > { %v5872_v49 = vsel %vm570_vm1, %v636_v28, %v637_v29  ;;  %v558_v28 = vrot.slane %v428_v54, 1  ;;  %9486 = vst [vmem:[#allocation35_spill] sm:$0xff] %v5909_v35 }
  0x33   : > { %9482 = vst [vmem:[#allocation31_spill] sm:$0xff] %v5872_v49 }
  0x34   : > { %9487 = vst [vmem:[#allocation36_spill] sm:$0xff] %v5912_v30 }
  0x35   : > { %4559 = vrot.lane.b32.xlu1 %v4558_v27, %s5560_s25  ;;  %v594_v27 = vrot.slane %v401_v9, 2  ;;  %9491 = vst [vmem:[#allocation40_spill] sm:$0xff] %v6010_v52 }
  0x36   : > { %4549 = vrot.lane.b32.xlu2 %v4548_v50, %s5558_s23  ;;  %v5876_v50 = vld [vmem:[%s5641_s22 + $0x78] sm:$0xff] }
  0x37   : > { %4554 = vrot.lane.b32.xlu0 %v4553_v32, %s5559_s24  ;;  %v513_v32 = vrot.slane %v401_v9, 1  ;;  %v5869_v36 = vsel %vm570_vm1, %v592_v55, %v594_v27  ;;  %9483 = vst [vmem:[#allocation32_spill] sm:$0xff] %v5876_v50  ;;  %v5888_v55 = vsel %vm489_vm0, %v555_v33, %v556_v34  ;;  %v596_v4 = vrot.slane %v5876_v50, 2  ;;  %v404_v33 = vld [vmem:[%s5641_s22 + $0x88] sm:$0x3] }
  0x38   : > { %9481 = vst [vmem:[#allocation30_spill] sm:$0xff] %v5869_v36  ;;  %v4603_v62 = vpack.i.bf16 %v5869_v36, %v5872_v49  ;;  %v5936_v49 = vld [vmem:[%s5641_s22 + $0x90] sm:$0xff] }
  0x39   : > { %9484 = vst [vmem:[#allocation33_spill] sm:$0xff] %v5888_v55 }
  0x3d   : > { %4574 = vrot.lane.b32.xlu1 %v4573_v53, %s5560_s25  ;;  %v5879_v53 = vld [vmem:[%s5641_s22 + $0x80] sm:$0xff] }
  0x3e   : > { %4564 = vrot.lane.b32.xlu2 %v4563_v12, %s5558_s23  ;;  %v597_v9 = vrot.slane %v5879_v53, 2  ;;  %v639_v12 = vrot.slane %v428_v54, 2  ;;  %v516_v27 = vrot.slane %v5879_v53, 1  ;;  %v1495_v54 = vld [vmem:[%s9374_s1 + $0x78] sm:$0xff] }
  0x3f   : > { %4569 = vrot.lane.b32.xlu0 %v4568_v57, %s5559_s24  ;;  %v5885_v57 = vsel %vm489_vm0, %v511_v63, %v513_v32  ;;  %v515_v63 = vrot.slane %v5876_v50, 1  ;;  %1580 = vmatpush.msra.mxu0 %v1495_v54 }
  0x40   : > { %v5904_v32 = vsel %vm570_vm1, %v637_v29, %v639_v12  ;;  %v5923_v29 = vsel %vm489_vm0, %v556_v34, %v558_v28  ;;  %4439 = vmatpush.msra.mxu1 %v1495_v54  ;;  %4440 = vmatpush.msra.mxu3 %v1495_v54  ;;  %v599_v12 = vrot.slane %v404_v33, 2  ;;  %v560_v34 = vrot.slane %v5909_v35, 1 }
  0x41   : > { %9485 = vst [vmem:[#allocation34_spill] sm:$0xff] %v5904_v32  ;;  %v9398_v28 = vrot.slane %v5912_v30, 1 }
  0x42   : > { %9488 = vst [vmem:[#allocation37_spill] sm:$0xff] %v5923_v29  ;;  %v5939_v54 = vsel %vm570_vm1, %v597_v9, %v599_v12 }
  0x43   : > { %v5964_v12 = vsel %vm489_vm0, %v560_v34, %v9398_v28  ;;  %v1491_v34 = vld [vmem:[%s9374_s1 + $0x58] sm:$0xff]  ;;  %v520_v28 = vrot.slane %v5936_v49, 1 }
  0x44   : > { %9490 = vst [vmem:[#allocation39_spill] sm:$0xff] %v5964_v12 }
  0x45   : > { %4589 = vrot.lane.b32.xlu1 %v4588_v24, %s5560_s25  ;;  %v4598_v24 = vpack.i.bf16 %v5885_v57, %v5888_v55  ;;  %v9397_v55 = vrot.slane %v5912_v30, 2 }
  0x46   : > { %4579 = vrot.lane.b32.xlu2 %v4578_v56, %s5558_s23  ;;  %v4593_v56 = vpack.i.bf16 %v5876_v50, %v5848_v11 }
  0x47   : > { %4584 = vrot.lane.b32.xlu0 %v4583_v31, %s5559_s24  ;;  %v5901_v31 = vsel %vm570_vm1, %v596_v4, %v597_v9  ;;  %v1493_v9 = vld [vmem:[%s9374_s1 + $0x68] sm:$0xff] }
  0x48   : > { %v4618_v4 = vpack.i.bf16 %v5901_v31, %v5904_v32 }
  0x4d   : > { %4604 = vrot.lane.b32.xlu1 %v4603_v62, %s5560_s25  ;;  %v5920_v62 = vsel %vm489_vm0, %v515_v63, %v516_v27  ;;  %v518_v63 = vrot.slane %v404_v33, 1  ;;  %v4608_v33 = vpack.i.bf16 %v5879_v53, %v5909_v35 }
  0x4e   : > { %v4613_v16 = vpack.i.bf16 %v5920_v62, %v5923_v29  ;;  %4594 = vrot.lane.b32.xlu2 %v4593_v56, %s5558_s23  ;;  %v5947_v29 = vld [vmem:[%s5641_s22 + $0x98] sm:$0xff]  ;;  %v1494_v56 = vld [vmem:[%s9374_s1 + $0x70] sm:$0xff] }
  0x4f   : > { %4599 = vrot.lane.b32.xlu0 %v4598_v24, %s5559_s24  ;;  %v641_v24 = vrot.slane %v5909_v35, 2  ;;  %1581 = vmatpush.msra.mxu0 %v1494_v56 }
  0x50   : > { %4441 = vmatpush.msra.mxu1 %v1494_v56  ;;  %4442 = vmatpush.msra.mxu3 %v1494_v56  ;;  %v521_v56 = vrot.slane %v5947_v29, 1 }
  0x51   : > { %v5944_v32 = vsel %vm570_vm1, %v641_v24, %v9397_v55  ;;  %v1492_v24 = vld [vmem:[%s9374_s1 + $0x60] sm:$0xff]  ;;  %v601_v55 = vrot.slane %v5936_v49, 2  ;;  %1582 = vmatpush.msra.mxu0 %v1493_v9 }
  0x52   : > { %9489 = vst [vmem:[#allocation38_spill] sm:$0xff] %v5944_v32  ;;  %4443 = vmatpush.msra.mxu1 %v1493_v9  ;;  %4444 = vmatpush.msra.mxu3 %v1493_v9  ;;  %v4623_v9 = vpack.i.bf16 %v5936_v49, %v5912_v30 }
  0x53   : > { %1583 = vmatpush.msra.mxu0 %v1492_v24 }
  0x54   : > { %4445 = vmatpush.msra.mxu1 %v1492_v24  ;;  %4446 = vmatpush.msra.mxu3 %v1492_v24 }
  0x55   : > { %4619 = vrot.lane.b32.xlu1 %v4618_v4, %s5560_s25  ;;  %v5959_v4 = vsel %vm489_vm0, %v516_v27, %v518_v63  ;;  %v602_v27 = vrot.slane %v5947_v29, 2  ;;  %1584 = vmatpush.msra.mxu0 %v1491_v34 }
  0x56   : > { %v4628_v63 = vpack.i.bf16 %v5959_v4, %v5964_v12  ;;  %4609 = vrot.lane.b32.xlu2 %v4608_v33, %s5558_s23  ;;  %4447 = vmatpush.msra.mxu1 %v1491_v34  ;;  %v407_v33 = vld [vmem:[%s5641_s22 + $0xa0] sm:$0x3]  ;;  %v1490_v12 = vld [vmem:[%s9374_s1 + $0x50] sm:$0xff] }
  0x57   : > { %4614 = vrot.lane.b32.xlu0 %v4613_v16, %s5559_s24  ;;  %v4633_v16 = vpack.i.bf16 %v5939_v54, %v5944_v32  ;;  %v5983_v32 = vsel %vm570_vm1, %v601_v55, %v602_v27  ;;  %4448 = vmatpush.msra.mxu3 %v1491_v34  ;;  %v5996_v55 = vsel %vm489_vm0, %v520_v28, %v521_v56  ;;  %v604_v30 = vrot.slane %v407_v33, 2  ;;  %v1487_v28 = vld [vmem:[%s9374_s1 + $0x38] sm:$0xff] }
  0x58   : > { %1585 = vmatpush.msra.mxu0 %v1490_v12  ;;  %4449 = vmatpush.msra.mxu1 %v1490_v12  ;;  %v4648_v24 = vpack.i.bf16 %v5983_v32, %v5675_v21  ;;  %v4643_v34 = vpack.i.bf16 %v5996_v55, %v5726_v48  ;;  %v523_v6 = vrot.slane %v407_v33, 1  ;;  %v6018_v48 = vld [vmem:[%s5641_s22 + $0xa8] sm:$0xff]  ;;  %v4638_v33 = vpack.i.bf16 %v5947_v29, %v6010_v52  ;;  %v1483_v52 = vld [vmem:[%s9374_s1 + $0x18] sm:$0xff] }
  0x59   : > { %4450 = vmatpush.msra.mxu3 %v1490_v12  ;;  %v6014_v12 = vsel %vm570_vm1, %v602_v27, %v604_v30  ;;  %v606_v27 = vrot.slane %v6018_v48, 2 }
  0x5a   : > { %v4663_v30 = vpack.i.bf16 %v6014_v12, %v5679_v22 }
  0x5d   : > { %4634 = vrot.lane.b32.xlu1 %v4633_v16, %s5560_s25  ;;  %v1489_v16 = vld [vmem:[%s9374_s1 + $0x48] sm:$0xff] }
  0x5e   : > { %1586 = vmatpush.msra.mxu0 %v1489_v16  ;;  %4451 = vmatpush.msra.mxu1 %v1489_v16 }
  0x5f   : > { %4629 = vrot.lane.b32.xlu0 %v4628_v63, %s5559_s24  ;;  %v1488_v63 = vld [vmem:[%s9374_s1 + $0x40] sm:$0xff]  ;;  %4624 = vrot.lane.b32.xlu2 %v4623_v9, %s5558_s23  ;;  %v6021_v9 = vld [vmem:[%s5641_s22 + $0xb0] sm:$0xff] }
  0x60   : > { %4452 = vmatpush.msra.mxu3 %v1489_v16  ;;  %1587 = vmatpush.msra.mxu0 %v1488_v63  ;;  %v1486_v16 = vld [vmem:[%s9374_s1 + $0x30] sm:$0xff] }
  0x61   : > { %4453 = vmatpush.msra.mxu1 %v1488_v63 }
  0x62   : > { %4454 = vmatpush.msra.mxu3 %v1488_v63  ;;  %1588 = vmatpush.msra.mxu0 %v1487_v28  ;;  %v607_v63 = vrot.slane %v6021_v9, 2 }
  0x63   : > { %4455 = vmatpush.msra.mxu1 %v1487_v28 }
  0x64   : > { %4456 = vmatpush.msra.mxu3 %v1487_v28  ;;  %1589 = vmatpush.msra.mxu0 %v1486_v16  ;;  %v525_v28 = vrot.slane %v6018_v48, 1  ;;  %v6051_v26 = vsel %vm570_vm1, %v606_v27, %v607_v63 }
  0x65   : > { %4649 = vrot.lane.b32.xlu1 %v4648_v24, %s5560_s25  ;;  %v6029_v24 = vsel %vm489_vm0, %v521_v56, %v523_v6  ;;  %4457 = vmatpush.msra.mxu1 %v1486_v16  ;;  %v1484_v6 = vld [vmem:[%s9374_s1 + $0x20] sm:$0xff] }
  0x66   : > { %4458 = vmatpush.msra.mxu3 %v1486_v16  ;;  %v4658_v56 = vpack.i.bf16 %v6029_v24, %v5715_v45  ;;  %v526_v16 = vrot.slane %v6021_v9, 1  ;;  %v410_v45 = vld [vmem:[%s5641_s22 + $0xb8] sm:$0x3] }
  0x67   : > { %4644 = vrot.lane.b32.xlu0 %v4643_v34, %s5559_s24  ;;  %v1485_v34 = vld [vmem:[%s9374_s1 + $0x28] sm:$0xff]  ;;  %4639 = vrot.lane.b32.xlu2 %v4638_v33, %s5558_s23  ;;  %v4653_v33 = vpack.i.bf16 %v6018_v48, %v5718_v46  ;;  %v609_v27 = vrot.slane %v410_v45, 2  ;;  %v1515_v46 = vld [vmem:[%s9374_s1 + $0x118] sm:$0xff] }
  0x68   : > { %1590 = vmatpush.msra.mxu0 %v1485_v34  ;;  %4459 = vmatpush.msra.mxu1 %v1485_v34 }
  0x69   : > { %4460 = vmatpush.msra.mxu3 %v1485_v34  ;;  %v6061_v34 = vsel %vm489_vm0, %v525_v28, %v526_v16  ;;  %v528_v28 = vrot.slane %v410_v45, 1  ;;  %v6076_v15 = vsel %vm570_vm1, %v607_v63, %v609_v27  ;;  %v4668_v45 = vpack.i.bf16 %v6021_v9, %v5757_v2  ;;  %4471 = vmatpush.msra.mxu2 %v1515_v46 }
  0x6a   : > { %1591 = vmatpush.msra.mxu0 %v1484_v6  ;;  %4461 = vmatpush.msra.mxu1 %v1484_v6 }
  0x6b   : > { %4462 = vmatpush.msra.mxu3 %v1484_v6  ;;  %v1481_v6 = vld [vmem:[%s9374_s1 + $0x8] sm:$0xff]  ;;  %v6091_v63 = vsel %vm489_vm0, %v526_v16, %v528_v28  ;;  %v413_v28 = vld [vmem:[%s5641_s22 + $0xd0] sm:$0x3] }
  0x6c   : > { %1592 = vmatpush.msra.mxu0 %v1483_v52  ;;  %4463 = vmatpush.msra.mxu1 %v1483_v52 }
  0x6d   : > { %4664 = vrot.lane.b32.xlu1 %v4663_v30, %s5560_s25  ;;  %4464 = vmatpush.msra.mxu3 %v1483_v52  ;;  %v4678_v30 = vpack.i.bf16 %v6051_v26, %v5748_v60  ;;  %v4673_v52 = vpack.i.bf16 %v6061_v34, %v5698_v39 }
  0x6e   : > { %1593 = vmatpush.msra.mxu0 %v1482_v38  ;;  %4465 = vmatpush.msra.mxu1 %v1482_v38 }
  0x6f   : > { %4659 = vrot.lane.b32.xlu0 %v4658_v56, %s5559_s24  ;;  %v1480_v56 = vld [vmem:[%s9374_s1] sm:$0xff]  ;;  %4466 = vmatpush.msra.mxu3 %v1482_v38 }
  0x70   : > { %4654 = vrot.lane.b32.xlu2 %v4653_v33, %s5558_s23  ;;  %1594 = vmatpush.msra.mxu0 %v1481_v6  ;;  %v6083_v38 = vld [vmem:[%s5641_s22 + $0xc0] sm:$0xff]  ;;  %v6086_v33 = vld [vmem:[%s5641_s22 + $0xc8] sm:$0xff] }
  0x71   : > { %4467 = vmatpush.msra.mxu1 %v1481_v6  ;;  %4468 = vmatpush.msra.mxu3 %v1481_v6  ;;  %v611_v27 = vrot.slane %v6083_v38, 2  ;;  %v612_v6 = vrot.slane %v6086_v33, 2  ;;  %v531_v39 = vrot.slane %v6086_v33, 1 }
  0x72   : > { %1595 = vmatpush.msra.mxu0 %v1480_v56 }
  0x73   : > { %4469 = vmatpush.msra.mxu1 %v1480_v56  ;;  %4470 = vmatpush.msra.mxu3 %v1480_v56  ;;  %v4688_v56 = vpack.i.bf16 %v6091_v63, %v5741_v58  ;;  %v4683_v58 = vpack.i.bf16 %v6083_v38, %v5789_v25  ;;  %v6130_v25 = vld [vmem:[%s5641_s22 + $0xd8] sm:$0xff] }
  0x74   : > { %1818 = vmatpush.msrb.mxu0 %v1515_v46  ;;  %v6106_v46 = vsel %vm570_vm1, %v611_v27, %v612_v6  ;;  %v533_v27 = vrot.slane %v413_v28, 1  ;;  %v535_v59 = vrot.slane %v6130_v25, 1 }
  0x75   : > { %4679 = vrot.lane.b32.xlu1 %v4678_v30, %s5560_s25  ;;  %v4693_v30 = vpack.i.bf16 %v6076_v15, %v5751_v61  ;;  %v4708_v2 = vpack.i.bf16 %v6106_v46, %v5812_v41  ;;  %1693 = vmatpush.msrb.mxu1 %v1511_v40 }
  0x77   : > { %4674 = vrot.lane.b32.xlu0 %v4673_v52, %s5559_s24  ;;  %v530_v52 = vrot.slane %v6083_v38, 1 }
  0x78   : > { %4669 = vrot.lane.b32.xlu2 %v4668_v45, %s5558_s23  ;;  %v6103_v16 = vpop.permute.xlu2 %4514 }
  0x79   : > { %v6113_v45 = vsel %vm489_vm0, %v530_v52, %v531_v39 }
  0x7a   : > { %v4703_v3 = vpack.i.bf16 %v6113_v45, %v5773_v14  ;;  %v4698_v14 = vpack.i.bf16 %v6086_v33, %v5821_v51  ;;  %v536_v51 = vrot.slane %v6133_v20, 1 }
  0x7d   : > { %4694 = vrot.lane.b32.xlu1 %v4693_v30, %s5560_s25  ;;  %v614_v30 = vrot.slane %v413_v28, 2  ;;  %v616_v28 = vrot.slane %v6130_v25, 2 }
  0x7f   : > { %4689 = vrot.lane.b32.xlu0 %v4688_v56, %s5559_s24  ;;  %v6124_v47 = vsel %vm570_vm1, %v612_v6, %v614_v30 }
  0x80   : > { %4684 = vrot.lane.b32.xlu2 %v4683_v58, %s5558_s23  ;;  %v6121_v56 = vpop.permute.xlu2 %4519  ;;  %9492 = vst [vmem:[#allocation41_spill] sm:$0xff] %v6124_v47  ;;  %v6138_v58 = vsel %vm489_vm0, %v531_v39, %v533_v27  ;;  %v4723_v6 = vpack.i.bf16 %v6124_v47, %v5815_v42  ;;  %v4713_v42 = vpack.i.bf16 %v6130_v25, %v5853_v13 }
  0x81   : > { %9493 = vst [vmem:[#allocation42_spill] sm:$0xff] %v6138_v58  ;;  %v4718_v30 = vpack.i.bf16 %v6138_v58, %v5805_v37  ;;  %v1510_v58 = vld [vmem:[%s9374_s1 + $0xf0] sm:$0xff] }
  0x82   : > { %1694 = vmatpush.msrb.mxu1 %v1510_v58 }
  0x85   : > { %4709 = vrot.lane.b32.xlu1 %v4708_v2, %s5560_s25 }
  0x87   : > { %4704 = vrot.lane.b32.xlu0 %v4703_v3, %s5559_s24  ;;  %v6127_v52 = vpop.permute.xlu1 %4504  ;;  %v617_v3 = vrot.slane %v6133_v20, 2 }
  0x88   : > { %4699 = vrot.lane.b32.xlu2 %v4698_v14, %s5558_s23  ;;  %v6150_v39 = vpop.permute.xlu2 %4534  ;;  %v416_v14 = vld [vmem:[%s5641_s22 + $0xe8] sm:$0x3] }
  0x89   : > { %v4495_v2 = vpop.permute.xlu0 %4494  ;;  %v6153_v27 = vsel %vm570_vm1, %v616_v28, %v617_v3  ;;  %v4506_v28 = vunpack.i.l.bf16 %v6127_v52 }
  0x8a   : > { %9494 = vst [vmem:[#allocation43_spill] sm:$0xff] %v6153_v27  ;;  %v4496_v19 = vunpack.i.l.bf16 %v4495_v2  ;;  %v4738_v41 = vpack.i.bf16 %v6153_v27, %v5876_v50  ;;  %v538_v50 = vrot.slane %v416_v14, 1  ;;  %v4497_v61 = vunpack.i.h.bf16 %v4495_v2 }
  0x8c   : > { %v1286_v40 = vsel %vm1285_vm2, %v5644_v0, %v4496_v19  ;;  %v1509_v19 = vld [vmem:[%s9374_s1 + $0xe8] sm:$0xff]  ;;  %v1287_v2 = vsel %vm1285_vm2, %v5647_v1, %v4497_v61 }
  0x8d   : > { %4724 = vrot.lane.b32.xlu1 %v4723_v6, %s5560_s25  ;;  %v6165_v6 = vsel %vm489_vm0, %v535_v59, %v536_v51  ;;  %1695 = vmatpush.msrb.mxu1 %v1509_v19 }
  0x8e   : > { %v4733_v59 = vpack.i.bf16 %v6165_v6, %v5837_v5 }
  0x8f   : > { %4719 = vrot.lane.b32.xlu0 %v4718_v30, %s5559_s24  ;;  %v6159_v37 = vpop.permute.xlu1 %4509  ;;  %v619_v30 = vrot.slane %v416_v14, 2 }
  0x90   : > { %4714 = vrot.lane.b32.xlu2 %v4713_v42, %s5558_s23  ;;  %v6181_v27 = vpop.permute.xlu2 %4549 }
  0x91   : > { %v4500_v35 = vpop.permute.xlu0 %4499  ;;  %v6184_v0 = vsel %vm570_vm1, %v617_v3, %v619_v30 }
  0x92   : > { %v4501_v11 = vunpack.i.l.bf16 %v4500_v35  ;;  %v4502_v47 = vunpack.i.h.bf16 %v4500_v35  ;;  %v6198_v35 = vsel %vm489_vm0, %v536_v51, %v538_v50  ;;  %v4753_v3 = vpack.i.bf16 %v6184_v0, %v5879_v53  ;;  %v1508_v50 = vld [vmem:[%s9374_s1 + $0xe0] sm:$0xff] }
  0x93   : > { %v4748_v1 = vpack.i.bf16 %v6198_v35, %v5869_v36  ;;  %1696 = vmatpush.msrb.mxu1 %v1508_v50 }
  0x94   : > { %v1319_v13 = vsel %vm1318_vm3, %v1286_v40, %v4501_v11  ;;  %v6193_v11 = vld [vmem:[%s5641_s22 + $0xf0] sm:$0xff]  ;;  %v1320_v30 = vsel %vm1318_vm3, %v1287_v2, %v4502_v47  ;;  %v4516_v2 = vunpack.i.l.bf16 %v6103_v16 }
  0x95   : > { %v1352_v10 = vsel %vm1351_vm4, %v1319_v13, %v4506_v28  ;;  %4739 = vrot.lane.b32.xlu1 %v4738_v41, %s5560_s25  ;;  %v4728_v41 = vpack.i.bf16 %v6133_v20, %v5885_v57  ;;  %v4536_v28 = vunpack.i.l.bf16 %v6150_v39  ;;  %v621_v51 = vrot.slane %v6193_v11, 2 }
  0x96   : > { %1596 = vmatmul.f32.vlgmr.msra.gmra.mxu0 %v1352_v10  ;;  %v4507_v10 = vunpack.i.h.bf16 %v6127_v52  ;;  %v4511_v52 = vunpack.i.l.bf16 %v6159_v37  ;;  %v540_v40 = vrot.slane %v6193_v11, 1 }
  0x97   : > { %4734 = vrot.lane.b32.xlu0 %v4733_v59, %s5559_s24  ;;  %v6190_v42 = vpop.permute.xlu1 %4529 }
  0x98   : > { %v4531_v58 = vunpack.i.l.bf16 %v6190_v42  ;;  %4729 = vrot.lane.b32.xlu2 %v4728_v41, %s5558_s23  ;;  %v1353_v47 = vsel %vm1351_vm4, %v1320_v30, %v4507_v10  ;;  %v6225_v19 = vpop.permute.xlu2 %4564  ;;  %v9495_v41 = vrot.slane %v5682_v23, 2  ;;  %v1507_v10 = vld [vmem:[%s9374_s1 + $0xd8] sm:$0xff]  ;;  %v9497_v30 = vrot.slane %v5682_v23, 1 }
  0x99   : > { %v6201_v13 = vpop.permute.xlu0 %4524  ;;  %1697 = vmatpush.msrb.mxu1 %v1507_v10 }
  0x9a   : > { %v4526_v14 = vunpack.i.l.bf16 %v6201_v13  ;;  %v6232_v50 = vsel %vm570_vm1, %v621_v51, %v9495_v41  ;;  %v6250_v51 = vsel %vm489_vm0, %v540_v40, %v9497_v30  ;;  %v1506_v40 = vld [vmem:[%s9374_s1 + $0xd0] sm:$0xff]  ;;  %v4512_v41 = vunpack.i.h.bf16 %v6159_v37 }
  0x9b   : > { %9496 = vst [vmem:[#allocation44_spill] sm:$0xff] %v6232_v50  ;;  %v4763_v10 = vpack.i.bf16 %v6250_v51, %v5901_v31  ;;  %1698 = vmatpush.msrb.mxu1 %v1506_v40  ;;  %v4566_v40 = vunpack.i.l.bf16 %v6225_v19 }
  0x9c   : > { %v1307_v61 = vsel %vm1285_vm2, %v5682_v23, %v4526_v14  ;;  %v4743_v14 = vpack.i.bf16 %v6193_v11, %v5920_v62 }
  0x9d   : > { %v1340_v59 = vsel %vm1318_vm3, %v1307_v61, %v4531_v58  ;;  %4754 = vrot.lane.b32.xlu1 %v4753_v3, %s5560_s25  ;;  %v1288_v3 = vsel %vm1285_vm2, %v5653_v7, %v4511_v52  ;;  %v4768_v52 = vpack.i.bf16 %v6232_v50, %v5936_v49 }
  0x9e   : > { %1599 = vmatmul.f32.gmra.mxu0 %v1353_v47  ;;  %v1373_v36 = vsel %vm1351_vm4, %v1340_v59, %v4536_v28  ;;  %v1514_v28 = vld [vmem:[%s9374_s1 + $0x110] sm:$0xff]  ;;  %v4551_v47 = vunpack.i.l.bf16 %v6181_v27  ;;  %v1321_v59 = vsel %vm1318_vm3, %v1288_v3, %v4516_v2  ;;  %v4517_v3 = vunpack.i.h.bf16 %v6103_v16 }
  0x9f   : > { %4749 = vrot.lane.b32.xlu0 %v4748_v1, %s5559_s24  ;;  %1659 = vmatmul.f32.vlgmr.msra.gmra.mxu1 %v1373_v36  ;;  %v6238_v58 = vpop.permute.xlu1 %4544  ;;  %v4521_v36 = vunpack.i.l.bf16 %v6121_v56  ;;  %v4522_v16 = vunpack.i.h.bf16 %v6121_v56  ;;  %v4778_v56 = vpack.i.bf16 %v5983_v32, %v5939_v54 }
  0xa0   : > { %1819 = vmatpush.msrb.mxu0 %v1514_v28  ;;  %v4546_v7 = vunpack.i.l.bf16 %v6238_v58  ;;  %4472 = vmatpush.msra.mxu2 %v1514_v28  ;;  %v6273_v2 = vpop.permute.xlu2 %4579 }
  0xa1   : > { %v6253_v1 = vpop.permute.xlu0 %4539  ;;  %4744 = vrot.lane.b32.xlu2 %v4743_v14, %s5558_s23  ;;  %v1354_v30 = vsel %vm1351_vm4, %v1321_v59, %v4521_v36  ;;  %v1505_v14 = vld [vmem:[%s9374_s1 + $0xc8] sm:$0xff]  ;;  %v1289_v36 = vsel %vm1285_vm2, %v5656_v8, %v4512_v41  ;;  %v1504_v8 = vld [vmem:[%s9374_s1 + $0xc0] sm:$0xff] }
  0xa2   : > { %v4541_v61 = vunpack.i.l.bf16 %v6253_v1  ;;  %1699 = vmatpush.msrb.mxu1 %v1505_v14  ;;  %v1503_v14 = vld [vmem:[%s9374_s1 + $0xb8] sm:$0xff] }
  0xa4   : > { %v1308_v28 = vsel %vm1285_vm2, %v5709_v43, %v4541_v61  ;;  %1700 = vmatpush.msrb.mxu1 %v1504_v8  ;;  %v4793_v8 = vpack.i.bf16 %v6051_v26, %v6014_v12 }
  0xa5   : > { %v1341_v5 = vsel %vm1318_vm3, %v1308_v28, %v4546_v7  ;;  %4769 = vrot.lane.b32.xlu1 %v4768_v52, %s5560_s25  ;;  %v4758_v7 = vpack.i.bf16 %v5682_v23, %v5959_v4  ;;  %v4527_v23 = vunpack.i.h.bf16 %v6201_v13 }
  0xa6   : > { %1602 = vmatmul.f32.gmra.mxu0 %v1354_v30  ;;  %v1374_v37 = vsel %vm1351_vm4, %v1341_v5, %v4551_v47  ;;  %v4783_v47 = vpack.i.bf16 %v6018_v48, %v5947_v29  ;;  %1701 = vmatpush.msrb.mxu1 %v1503_v14  ;;  %v4788_v14 = vpack.i.bf16 %v6061_v34, %v6029_v24 }
  0xa7   : > { %4764 = vrot.lane.b32.xlu0 %v4763_v10, %s5559_s24  ;;  %1662 = vmatmul.f32.gmra.mxu1 %v1374_v37  ;;  %v6281_v61 = vpop.permute.xlu1 %4559  ;;  %v1322_v10 = vsel %vm1318_vm3, %v1289_v36, %v4517_v3  ;;  %v4532_v37 = vunpack.i.h.bf16 %v6190_v42  ;;  %v1290_v36 = vsel %vm1285_vm2, %v5675_v21, %v4527_v23  ;;  %v4537_v42 = vunpack.i.h.bf16 %v6150_v39  ;;  %v1501_v39 = vld [vmem:[%s9374_s1 + $0xa8] sm:$0xff] }
  0xa8   : > { %v4561_v5 = vunpack.i.l.bf16 %v6281_v61  ;;  %v1355_v28 = vsel %vm1351_vm4, %v1322_v10, %v4522_v16  ;;  %v6308_v3 = vpop.permute.xlu2 %4594  ;;  %v4581_v21 = vunpack.i.l.bf16 %v6273_v2  ;;  %v4542_v10 = vunpack.i.h.bf16 %v6253_v1  ;;  %v1500_v1 = vld [vmem:[%s9374_s1 + $0xa0] sm:$0xff] }
  0xa9   : > { %v6288_v52 = vpop.permute.xlu0 %4554  ;;  %4759 = vrot.lane.b32.xlu2 %v4758_v7, %s5558_s23  ;;  %v4773_v7 = vpack.i.bf16 %v5709_v43, %v5996_v55  ;;  %v1323_v43 = vsel %vm1318_vm3, %v1290_v36, %v4532_v37  ;;  %v1499_v36 = vld [vmem:[%s9374_s1 + $0x98] sm:$0xff] }
  0xaa   : > { %v4556_v59 = vunpack.i.l.bf16 %v6288_v52 }
  0xac   : > { %v1309_v41 = vsel %vm1285_vm2, %v5712_v44, %v4556_v59  ;;  %v1502_v59 = vld [vmem:[%s9374_s1 + $0xb0] sm:$0xff] }
  0xad   : > { %v1342_v30 = vsel %vm1318_vm3, %v1309_v41, %v4561_v5  ;;  %4784 = vrot.lane.b32.xlu1 %v4783_v47, %s5560_s25  ;;  %v4798_v47 = vpack.i.bf16 %v6083_v38, %v6021_v9  ;;  %1702 = vmatpush.msrb.mxu1 %v1502_v59  ;;  %v4596_v59 = vunpack.i.l.bf16 %v6308_v3 }
  0xae   : > { %1605 = vmatmul.f32.gmra.mxu0 %v1355_v28  ;;  %v1375_v13 = vsel %vm1351_vm4, %v1342_v30, %v4566_v40  ;;  %v4547_v30 = vunpack.i.h.bf16 %v6238_v58  ;;  %v4552_v58 = vunpack.i.h.bf16 %v6181_v27  ;;  %v1497_v27 = vld [vmem:[%s9374_s1 + $0x88] sm:$0xff] }
  0xaf   : > { %4779 = vrot.lane.b32.xlu0 %v4778_v56, %s5559_s24  ;;  %1665 = vmatmul.f32.gmra.mxu1 %v1375_v13  ;;  %v6316_v44 = vpop.permute.xlu1 %4574  ;;  %v1356_v56 = vsel %vm1351_vm4, %v1323_v43, %v4537_v42  ;;  %v1291_v13 = vsel %vm1285_vm2, %v5679_v22, %v4542_v10  ;;  %v1498_v22 = vld [vmem:[%s9374_s1 + $0x90] sm:$0xff]  ;;  %v4808_v43 = vpack.i.bf16 %v6106_v46, %v6076_v15 }
  0xb0   : > { %v4576_v5 = vunpack.i.l.bf16 %v6316_v44  ;;  %1703 = vmatpush.msrb.mxu1 %v1501_v39  ;;  %v6346_v28 = vpop.permute.xlu2 %4609 }
  0xb1   : > { %v6323_v16 = vpop.permute.xlu0 %4569  ;;  %4774 = vrot.lane.b32.xlu2 %v4773_v7, %s5558_s23 }
  0xb2   : > { %v4571_v40 = vunpack.i.l.bf16 %v6323_v16  ;;  %1704 = vmatpush.msrb.mxu1 %v1500_v1 }
  0xb4   : > { %v1310_v23 = vsel %vm1285_vm2, %v5781_v17, %v4571_v40  ;;  %1705 = vmatpush.msrb.mxu1 %v1499_v36  ;;  %v1324_v40 = vsel %vm1318_vm3, %v1291_v13, %v4547_v30  ;;  %v4803_v30 = vpack.i.bf16 %v6113_v45, %v6091_v63 }
  0xb5   : > { %v1343_v41 = vsel %vm1318_vm3, %v1310_v23, %v4576_v5  ;;  %4799 = vrot.lane.b32.xlu1 %v4798_v47, %s5560_s25  ;;  %v4813_v5 = vpack.i.bf16 %v6130_v25, %v6086_v33  ;;  %v1357_v10 = vsel %vm1351_vm4, %v1324_v40, %v4552_v58  ;;  %v4611_v58 = vunpack.i.l.bf16 %v6346_v28 }
  0xb6   : > { %1608 = vmatmul.f32.gmra.mxu0 %v1356_v56  ;;  %v1376_v37 = vsel %vm1351_vm4, %v1343_v41, %v4581_v21  ;;  %1706 = vmatpush.msrb.mxu1 %v1498_v22  ;;  %v4557_v21 = vunpack.i.h.bf16 %v6288_v52  ;;  %v1496_v52 = vld [vmem:[%s9374_s1 + $0x80] sm:$0xff]  ;;  %v4562_v56 = vunpack.i.h.bf16 %v6281_v61  ;;  %v9499_v22 = vld [vmem:[#allocation43_spill] sm:$0xff] }
  0xb7   : > { %1668 = vmatmul.f32.gmra.mxu1 %v1376_v37  ;;  %v6353_v17 = vpop.permute.xlu1 %4589  ;;  %4794 = vrot.lane.b32.xlu0 %v4793_v8, %s5559_s24  ;;  %v4567_v37 = vunpack.i.h.bf16 %v6225_v19 }
  0xb8   : > { %v4591_v42 = vunpack.i.l.bf16 %v6353_v17  ;;  %1707 = vmatpush.msrb.mxu1 %v1497_v27  ;;  %v1292_v1 = vsel %vm1285_vm2, %v5748_v60, %v4557_v21 }
  0xb9   : > { %v6364_v7 = vpop.permute.xlu0 %4584  ;;  %4789 = vrot.lane.b32.xlu2 %v4788_v14, %s5558_s23  ;;  %v6386_v23 = vpop.permute.xlu2 %4624  ;;  %v4828_v14 = vpack.i.bf16 %v6193_v11, %v6133_v20  ;;  %v1325_v60 = vsel %vm1318_vm3, %v1292_v1, %v4562_v56 }
  0xba   : > { %v4586_v47 = vunpack.i.l.bf16 %v6364_v7  ;;  %1708 = vmatpush.msrb.mxu1 %v1496_v52  ;;  %v1358_v40 = vsel %vm1351_vm4, %v1325_v60, %v4567_v37  ;;  %v9502_v52 = vld [vmem:[#allocation42_spill] sm:$0xff]  ;;  %v4626_v37 = vunpack.i.l.bf16 %v6386_v23 }
  0xbb   : > { %v4818_v56 = vpack.i.bf16 %v6165_v6, %v9502_v52 }
  0xbc   : > { %v1311_v39 = vsel %vm1285_vm2, %v5784_v18, %v4586_v47  ;;  %v9500_v47 = vld [vmem:[#allocation26_spill] sm:$0xff] }
  0xbd   : > { %v1344_v8 = vsel %vm1318_vm3, %v1311_v39, %v4591_v42  ;;  %4814 = vrot.lane.b32.xlu1 %v4813_v5, %s5560_s25  ;;  %v4572_v42 = vunpack.i.h.bf16 %v6323_v16  ;;  %v9498_v5 = vld [vmem:[#allocation41_spill] sm:$0xff] }
  0xbe   : > { %1611 = vmatmul.f32.gmra.mxu0 %v1357_v10  ;;  %v1377_v41 = vsel %vm1351_vm4, %v1344_v8, %v4596_v59  ;;  %v4823_v19 = vpack.i.bf16 %v9499_v22, %v9498_v5  ;;  %v9501_v10 = vld [vmem:[#allocation11_spill] sm:$0xff] }
  0xbf   : > { %1671 = vmatmul.f32.gmra.mxu1 %v1377_v41  ;;  %v6394_v18 = vpop.permute.xlu1 %4604  ;;  %4809 = vrot.lane.b32.xlu0 %v4808_v43, %s5559_s24  ;;  %v4577_v43 = vunpack.i.h.bf16 %v6316_v44  ;;  %v1293_v8 = vsel %vm1285_vm2, %v9501_v10, %v4572_v42  ;;  %v4582_v41 = vunpack.i.h.bf16 %v6273_v2  ;;  %v9503_v2 = vld [vmem:[#allocation27_spill] sm:$0xff]  ;;  %v5515_v10 = vld [vmem:[%s5641_s22 + $0x108] sm:$0xff] }
  0xc0   : > { %v4606_v61 = vunpack.i.l.bf16 %v6394_v18 }
  0xc1   : > { %v6402_v13 = vpop.permute.xlu0 %4599  ;;  %4804 = vrot.lane.b32.xlu2 %v4803_v30, %s5558_s23  ;;  %v6418_v21 = vpop.permute.xlu2 %4639 }
  0xc2   : > { %v4601_v36 = vunpack.i.l.bf16 %v6402_v13 }
  0xc4   : > { %v1312_v59 = vsel %vm1285_vm2, %v9500_v47, %v4601_v36  ;;  %v4587_v36 = vunpack.i.h.bf16 %v6364_v7  ;;  %v4838_v47 = vpack.i.bf16 %v6232_v50, %v6184_v0  ;;  %v4592_v7 = vunpack.i.h.bf16 %v6353_v17 }
  0xc5   : > { %v1345_v27 = vsel %vm1318_vm3, %v1312_v59, %v4606_v61  ;;  %4829 = vrot.lane.b32.xlu1 %v4828_v14, %s5560_s25  ;;  %v1326_v61 = vsel %vm1318_vm3, %v1293_v8, %v4577_v43  ;;  %v1513_v14 = vld [vmem:[%s9374_s1 + $0x108] sm:$0xff] }
  0xc6   : > { %1614 = vmatmul.f32.gmra.mxu0 %v1358_v40  ;;  %v1378_v16 = vsel %vm1351_vm4, %v1345_v27, %v4611_v58  ;;  %4473 = vmatpush.msra.mxu2 %v1513_v14  ;;  %v1359_v60 = vsel %vm1351_vm4, %v1326_v61, %v4582_v41  ;;  %v9504_v27 = vld [vmem:[#allocation20_spill] sm:$0xff]  ;;  %v4602_v61 = vunpack.i.h.bf16 %v6402_v13 }
  0xc7   : > { %1674 = vmatmul.f32.gmra.mxu1 %v1378_v16  ;;  %v6423_v39 = vpop.permute.xlu1 %4619  ;;  %4824 = vrot.lane.b32.xlu0 %v4823_v19, %s5559_s24  ;;  %v1294_v43 = vsel %vm1285_vm2, %v9504_v27, %v4587_v36  ;;  %v5514_v16 = vld [vmem:[%s5641_s22 + $0xf8] sm:$0xff]  ;;  %v4612_v27 = vunpack.i.h.bf16 %v6346_v28 }
  0xc8   : > { %v4621_v44 = vunpack.i.l.bf16 %v6423_v39  ;;  %1820 = vmatpush.msrb.mxu0 %v1513_v14  ;;  %v4843_v8 = vpack.i.bf16 %v5515_v10, %v5514_v16  ;;  %v9505_v14 = vld [vmem:[#allocation35_spill] sm:$0xff] }
  0xc9   : > { %v6431_v1 = vpop.permute.xlu0 %4614  ;;  %4819 = vrot.lane.b32.xlu2 %v4818_v56, %s5558_s23  ;;  %v4597_v56 = vunpack.i.h.bf16 %v6308_v3 }
  0xca   : > { %v4616_v30 = vunpack.i.l.bf16 %v6431_v1  ;;  %v6446_v19 = vpop.permute.xlu2 %4654 }
  0xcb   : > { %v4656_v10 = vunpack.i.l.bf16 %v6446_v19 }
  0xcc   : > { %v1313_v58 = vsel %vm1285_vm2, %v9503_v2, %v4616_v30  ;;  %v4641_v30 = vunpack.i.l.bf16 %v6418_v21 }
  0xcd   : > { %v1346_v42 = vsel %vm1318_vm3, %v1313_v58, %v4621_v44  ;;  %4844 = vrot.lane.b32.xlu1 %v4843_v8, %s5560_s25 }
  0xce   : > { %1617 = vmatmul.f32.gmra.mxu0 %v1359_v60  ;;  %v1379_v59 = vsel %vm1351_vm4, %v1346_v42, %v4626_v37  ;;  %v1327_v37 = vsel %vm1318_vm3, %v1294_v43, %v4592_v7  ;;  %v4607_v60 = vunpack.i.h.bf16 %v6394_v18  ;;  %v9506_v7 = vld [vmem:[#allocation21_spill] sm:$0xff] }
  0xcf   : > { %1677 = vmatmul.f32.gmra.mxu1 %v1379_v59  ;;  %v6452_v40 = vpop.permute.xlu1 %4634  ;;  %4839 = vrot.lane.b32.xlu0 %v4838_v47, %s5559_s24  ;;  %v1360_v2 = vsel %vm1351_vm4, %v1327_v37, %v4597_v56  ;;  %v1295_v13 = vsel %vm1285_vm2, %v9506_v7, %v4602_v61  ;;  %v4833_v59 = vpack.i.bf16 %v6250_v51, %v6198_v35  ;;  %v4617_v56 = vunpack.i.h.bf16 %v6431_v1  ;;  %v9508_v61 = vld [vmem:[#allocation6_spill] sm:$0xff]  ;;  %v9510_v1 = vld [vmem:[#allocation32_spill] sm:$0xff]  ;;  %v5516_v7 = vld [vmem:[%s5641_s22 + $0x110] sm:$0xff] }
  0xd0   : > { %v4636_v44 = vunpack.i.l.bf16 %v6452_v40  ;;  %v1328_v8 = vsel %vm1318_vm3, %v1295_v13, %v4607_v60  ;;  %v5517_v13 = vld [vmem:[%s5641_s22 + $0x120] sm:$0xff] }
  0xd1   : > { %v4630_v41 = vpop.permute.xlu0 %4629  ;;  %4834 = vrot.lane.b32.xlu2 %v4833_v59, %s5558_s23  ;;  %v4858_v59 = vpack.i.bf16 %v5517_v13, %v5516_v7  ;;  %v4642_v13 = vunpack.i.h.bf16 %v6418_v21 }
  0xd2   : > { %v4631_v17 = vunpack.i.l.bf16 %v4630_v41  ;;  %v6469_v3 = vpop.permute.xlu2 %4669 }
  0xd4   : > { %v1314_v36 = vsel %vm1285_vm2, %v9505_v14, %v4631_v17  ;;  %v9509_v14 = vld [vmem:[#allocation10_spill] sm:$0xff] }
  0xd5   : > { %v1347_v58 = vsel %vm1318_vm3, %v1314_v36, %v4636_v44  ;;  %v9507_v44 = vld [vmem:[#allocation3_spill] sm:$0xff]  ;;  %v4853_v36 = vpack.i.bf16 %v9509_v14, %v9508_v61  ;;  %4859 = vrot.lane.b32.xlu1 %v4858_v59, %s5560_s25 }
  0xd6   : > { %1620 = vmatmul.f32.gmra.mxu0 %v1360_v2  ;;  %v1380_v42 = vsel %vm1351_vm4, %v1347_v58, %v4641_v30  ;;  %v1361_v30 = vsel %vm1351_vm4, %v1328_v8, %v4612_v27  ;;  %v4622_v2 = vunpack.i.h.bf16 %v6423_v39  ;;  %v4627_v27 = vunpack.i.h.bf16 %v6386_v23 }
  0xd7   : > { %1680 = vmatmul.f32.gmra.mxu1 %v1380_v42  ;;  %v6473_v47 = vpop.permute.xlu1 %4649  ;;  %v1296_v42 = vsel %vm1285_vm2, %v9510_v1, %v4617_v56  ;;  %4854 = vrot.lane.b32.xlu0 %v4853_v36, %s5559_s24  ;;  %v4632_v56 = vunpack.i.h.bf16 %v4630_v41  ;;  %v4637_v36 = vunpack.i.h.bf16 %v6452_v40 }
  0xd8   : > { %v4651_v16 = vunpack.i.l.bf16 %v6473_v47  ;;  %v1329_v8 = vsel %vm1318_vm3, %v1296_v42, %v4622_v2  ;;  %v9512_v2 = vld [vmem:[#allocation8_spill] sm:$0xff]  ;;  %v9513_v42 = vld [vmem:[#allocation13_spill] sm:$0xff] }
  0xd9   : > { %v4645_v43 = vpop.permute.xlu0 %4644  ;;  %v1297_v41 = vsel %vm1285_vm2, %v5879_v53, %v4632_v56  ;;  %v4848_v7 = vpack.i.bf16 %v9513_v42, %v9512_v2 }
  0xda   : > { %v4646_v18 = vunpack.i.l.bf16 %v4645_v43  ;;  %v6489_v37 = vpop.permute.xlu2 %4684  ;;  %v4647_v53 = vunpack.i.h.bf16 %v4645_v43 }
  0xdb   : > { %4849 = vrot.lane.b32.xlu2 %v4848_v7, %s5558_s23 }
  0xdc   : > { %v1384_v17 = vsel %vm1285_vm2, %v9507_v44, %v4646_v18  ;;  %v9511_v44 = vld [vmem:[#allocation4_spill] sm:$0xff]  ;;  %v1298_v43 = vsel %vm1285_vm2, %v5936_v49, %v4647_v53  ;;  %v1512_v53 = vld [vmem:[%s9374_s1 + $0x100] sm:$0xff] }
  0xdd   : > { %v1416_v28 = vsel %vm1318_vm3, %v1384_v17, %v4651_v16  ;;  %1821 = vmatpush.msrb.mxu0 %v1512_v53  ;;  %4474 = vmatpush.msra.mxu2 %v1512_v53 }
  0xde   : > { %1623 = vmatmul.f32.gmra.mxu0 %v1361_v30  ;;  %v1448_v58 = vsel %vm1351_vm4, %v1416_v28, %v4656_v10  ;;  %v4671_v10 = vunpack.i.l.bf16 %v6469_v3  ;;  %v1362_v30 = vsel %vm1351_vm4, %v1329_v8, %v4627_v27 }
  0xdf   : > { %1709 = vmatmul.f32.vlgmr.msrb.gmra.mxu1 %v1448_v58  ;;  %v6495_v60 = vpop.permute.xlu1 %4664 }
  0xe0   : > { %v4666_v39 = vunpack.i.l.bf16 %v6495_v60 }
  0xe1   : > { %v6503_v16 = vpop.permute.xlu0 %4659 }
  0xe2   : > { %v4661_v18 = vunpack.i.l.bf16 %v6503_v16  ;;  %v6514_v28 = vpop.permute.xlu2 %4699  ;;  %v4662_v49 = vunpack.i.h.bf16 %v6503_v16 }
  0xe4   : > { %v1385_v17 = vsel %vm1285_vm2, %v9511_v44, %v4661_v18  ;;  %v1330_v18 = vsel %vm1318_vm3, %v1297_v41, %v4637_v36  ;;  %v5518_v41 = vld [vmem:[%s5641_s22 + $0x128] sm:$0xff] }
  0xe5   : > { %v1417_v23 = vsel %vm1318_vm3, %v1385_v17, %v4666_v39  ;;  %v4686_v39 = vunpack.i.l.bf16 %v6489_v37  ;;  %v1363_v21 = vsel %vm1351_vm4, %v1330_v18, %v4642_v13  ;;  %v9515_v17 = vld [vmem:[#allocation15_spill] sm:$0xff]  ;;  %v5519_v13 = vld [vmem:[%s5641_s22 + $0x138] sm:$0xff] }
  0xe6   : > { %1626 = vmatmul.f32.gmra.mxu0 %v1362_v30  ;;  %v1449_v58 = vsel %vm1351_vm4, %v1417_v23, %v4671_v10  ;;  %v9514_v10 = vld [vmem:[#allocation7_spill] sm:$0xff]  ;;  %4383 = vmatmul.msk.f32.vlgmr.msra.gmra.mxu2 %vm1285_vm2, %v9515_v17 }
  0xe7   : > { %1712 = vmatmul.f32.gmra.mxu1 %v1449_v58  ;;  %v6518_v1 = vpop.permute.xlu1 %4679  ;;  %v9516_v30 = vld [vmem:[#allocation19_spill] sm:$0xff]  ;;  %v4652_v58 = vunpack.i.h.bf16 %v6473_v47 }
  0xe8   : > { %v4681_v27 = vunpack.i.l.bf16 %v6518_v1  ;;  %v4868_v23 = vpack.i.bf16 %v9516_v30, %v9515_v17 }
  0xe9   : > { %v6525_v59 = vpop.permute.xlu0 %4674 }
  0xea   : > { %v4676_v40 = vunpack.i.l.bf16 %v6525_v59  ;;  %v6536_v44 = vpop.permute.xlu2 %4714  ;;  %4869 = vrot.lane.b32.xlu0 %v4868_v23, %s5559_s24 }
  0xec   : > { %v1386_v8 = vsel %vm1285_vm2, %v9514_v10, %v4676_v40  ;;  %v4657_v40 = vunpack.i.h.bf16 %v6446_v19  ;;  %v4701_v10 = vunpack.i.l.bf16 %v6514_v28 }
  0xed   : > { %v1418_v56 = vsel %vm1318_vm3, %v1386_v8, %v4681_v27  ;;  %v4873_v27 = vpack.i.bf16 %v5519_v13, %v5518_v41  ;;  %v1331_v8 = vsel %vm1318_vm3, %v1298_v43, %v4652_v58  ;;  %v4667_v58 = vunpack.i.h.bf16 %v6495_v60  ;;  %v9518_v13 = vld [vmem:[#allocation17_spill] sm:$0xff] }
  0xee   : > { %1629 = vmatmul.f32.gmra.mxu0 %v1363_v21  ;;  %v1450_v7 = vsel %vm1351_vm4, %v1418_v56, %v4686_v39  ;;  %v9517_v21 = vld [vmem:[#allocation12_spill] sm:$0xff]  ;;  %v1364_v56 = vsel %vm1351_vm4, %v1331_v8, %v4657_v40  ;;  %v1299_v43 = vsel %vm1285_vm2, %v5947_v29, %v4662_v49  ;;  %v4677_v8 = vunpack.i.h.bf16 %v6525_v59  ;;  %4384 = vmatmul.msk.f32.gmra.mxu2 %vm1285_vm2, %v9516_v30 }
  0xef   : > { %1715 = vmatmul.f32.gmra.mxu1 %v1450_v7  ;;  %v6542_v36 = vpop.permute.xlu1 %4694  ;;  %4874 = vrot.lane.b32.xlu1 %v4873_v27, %s5560_s25  ;;  %v9519_v27 = vld [vmem:[#allocation23_spill] sm:$0xff]  ;;  %v1332_v29 = vsel %vm1318_vm3, %v1299_v43, %v4667_v58  ;;  %v9520_v49 = vld [vmem:[#allocation16_spill] sm:$0xff] }
  0xf0   : > { %v4696_v47 = vunpack.i.l.bf16 %v6542_v36  ;;  %v4863_v40 = vpack.i.bf16 %v9519_v27, %v9518_v13  ;;  %v1300_v43 = vsel %vm1285_vm2, %v6018_v48, %v4677_v8  ;;  %v9523_v8 = vld [vmem:[#allocation22_spill] sm:$0xff] }
  0xf1   : > { %v6550_v18 = vpop.permute.xlu0 %4689 }
  0xf2   : > { %v4691_v39 = vunpack.i.l.bf16 %v6550_v18  ;;  %v6573_v41 = vpop.permute.xlu2 %4729  ;;  %4864 = vrot.lane.b32.xlu2 %v4863_v40, %s5558_s23  ;;  %v5520_v40 = vld [vmem:[%s5641_s22 + $0x140] sm:$0xff]  ;;  %v4692_v48 = vunpack.i.h.bf16 %v6550_v18 }
  0xf4   : > { %v1387_v19 = vsel %vm1285_vm2, %v9517_v21, %v4691_v39  ;;  %v1301_v18 = vsel %vm1285_vm2, %v6021_v9, %v4692_v48 }
  0xf5   : > { %v1419_v23 = vsel %vm1318_vm3, %v1387_v19, %v4696_v47  ;;  %v4672_v47 = vunpack.i.h.bf16 %v6469_v3  ;;  %v9521_v19 = vld [vmem:[#allocation25_spill] sm:$0xff] }
  0xf6   : > { %1632 = vmatmul.f32.gmra.mxu0 %v1364_v56  ;;  %v1451_v16 = vsel %vm1351_vm4, %v1419_v23, %v4701_v10  ;;  %v4716_v10 = vunpack.i.l.bf16 %v6536_v44  ;;  %v9522_v56 = vld [vmem:[#allocation31_spill] sm:$0xff]  ;;  %4385 = vmatmul.msk.f32.gmra.mxu2 %vm1285_vm2, %v9521_v19 }
  0xf7   : > { %1718 = vmatmul.f32.gmra.mxu1 %v1451_v16  ;;  %v6569_v7 = vpop.permute.xlu1 %4709  ;;  %v1365_v3 = vsel %vm1351_vm4, %v1332_v29, %v4672_v47  ;;  %v4883_v23 = vpack.i.bf16 %v9522_v56, %v9521_v19  ;;  %v4682_v16 = vunpack.i.h.bf16 %v6518_v1  ;;  %v5521_v47 = vld [vmem:[%s5641_s22 + $0x150] sm:$0xff] }
  0xf8   : > { %v4711_v60 = vunpack.i.l.bf16 %v6569_v7 }
  0xf9   : > { %v6578_v39 = vpop.permute.xlu0 %4704  ;;  %4884 = vrot.lane.b32.xlu0 %v4883_v23, %s5559_s24  ;;  %v4697_v23 = vunpack.i.h.bf16 %v6542_v36 }
  0xfa   : > { %v4706_v17 = vunpack.i.l.bf16 %v6578_v39  ;;  %v4707_v9 = vunpack.i.h.bf16 %v6578_v39 }
  0xfb   : > { %v6605_v1 = vpop.permute.xlu2 %4744 }
  0xfc   : > { %v1388_v53 = vsel %vm1285_vm2, %v9520_v49, %v4706_v17  ;;  %v4687_v17 = vunpack.i.h.bf16 %v6489_v37  ;;  %v4731_v49 = vunpack.i.l.bf16 %v6573_v41 }
  0xfd   : > { %v1420_v21 = vsel %vm1318_vm3, %v1388_v53, %v4711_v60  ;;  %v4888_v60 = vpack.i.bf16 %v5521_v47, %v5520_v40  ;;  %v1333_v53 = vsel %vm1318_vm3, %v1300_v43, %v4682_v16  ;;  %v9524_v16 = vld [vmem:[#allocation29_spill] sm:$0xff] }
  0xfe   : > { %1635 = vmatmul.f32.gmra.mxu0 %v1365_v3  ;;  %v1452_v58 = vsel %vm1351_vm4, %v1420_v21, %v4716_v10  ;;  %v1366_v21 = vsel %vm1351_vm4, %v1333_v53, %v4687_v17  ;;  %v9525_v43 = vld [vmem:[#allocation33_spill] sm:$0xff]  ;;  %v9526_v53 = vld [vmem:[#allocation28_spill] sm:$0xff]  ;;  %4386 = vmatmul.msk.f32.gmra.mxu2 %vm1285_vm2, %v9522_v56  ;;  %v4717_v56 = vunpack.i.h.bf16 %v6536_v44 }
  0xff   : > { %1721 = vmatmul.f32.gmra.mxu1 %v1452_v58  ;;  %v6596_v59 = vpop.permute.xlu1 %4724  ;;  %4889 = vrot.lane.b32.xlu1 %v4888_v60, %s5560_s25  ;;  %v4878_v47 = vpack.i.bf16 %v9525_v43, %v9524_v16  ;;  %v4702_v60 = vunpack.i.h.bf16 %v6514_v28 }
 0x100   : > { %v4726_v30 = vunpack.i.l.bf16 %v6596_v59  ;;  %v4727_v44 = vunpack.i.h.bf16 %v6596_v59 }
 0x101   : > { %v4720_v29 = vpop.permute.xlu0 %4719  ;;  %4879 = vrot.lane.b32.xlu2 %v4878_v47, %s5558_s23  ;;  %v6652_v47 = vld [vmem:[%s5641_s22 + $0x158] sm:$0xff] }
 0x102   : > { %v4721_v10 = vunpack.i.l.bf16 %v4720_v29 }
 0x104   : > { %v1389_v3 = vsel %vm1285_vm2, %v9523_v8, %v4721_v10  ;;  %v1334_v10 = vsel %vm1318_vm3, %v1301_v18, %v4697_v23  ;;  %v1302_v18 = vsel %vm1285_vm2, %v6083_v38, %v4707_v9 }
 0x105   : > { %v1421_v37 = vsel %vm1318_vm3, %v1389_v3, %v4726_v30  ;;  %v4746_v30 = vunpack.i.l.bf16 %v6605_v1  ;;  %v1367_v48 = vsel %vm1351_vm4, %v1334_v10, %v4702_v60  ;;  %v9527_v3 = vld [vmem:[#allocation34_spill] sm:$0xff]  ;;  %v9529_v60 = vld [vmem:[#allocation40_spill] sm:$0xff] }
 0x106   : > { %1638 = vmatmul.f32.gmra.mxu0 %v1366_v21  ;;  %v1453_v58 = vsel %vm1351_vm4, %v1421_v37, %v4731_v49  ;;  %v6634_v49 = vpop.permute.xlu2 %4759  ;;  %v9528_v21 = vld [vmem:[#allocation38_spill] sm:$0xff]  ;;  %4387 = vmatmul.msk.f32.gmra.mxu2 %vm1285_vm2, %v9527_v3 }
 0x107   : > { %1724 = vmatmul.f32.gmra.mxu1 %v1453_v58  ;;  %v6619_v40 = vpop.permute.xlu1 %4739  ;;  %v4898_v37 = vpack.i.bf16 %v9528_v21, %v9527_v3  ;;  %v4712_v58 = vunpack.i.h.bf16 %v6569_v7  ;;  %v4761_v38 = vunpack.i.l.bf16 %v6634_v49 }
 0x108   : > { %v4741_v19 = vunpack.i.l.bf16 %v6619_v40 }
 0x109   : > { %v6626_v17 = vpop.permute.xlu0 %4734  ;;  %4899 = vrot.lane.b32.xlu0 %v4898_v37, %s5559_s24  ;;  %v1335_v9 = vsel %vm1318_vm3, %v1302_v18, %v4712_v58  ;;  %v9531_v58 = vld [vmem:[#allocation37_spill] sm:$0xff] }
 0x10a   : > { %v4736_v36 = vunpack.i.l.bf16 %v6626_v17 }
 0x10c   : > { %v1390_v28 = vsel %vm1285_vm2, %v9526_v53, %v4736_v36 }
 0x10d   : > { %v1422_v8 = vsel %vm1318_vm3, %v1390_v28, %v4741_v19  ;;  %v4903_v19 = vpack.i.bf16 %v9529_v60, %v6652_v47  ;;  %v4732_v60 = vunpack.i.h.bf16 %v6573_v41 }
 0x10e   : > { %1641 = vmatmul.f32.gmra.mxu0 %v1367_v48  ;;  %v1454_v39 = vsel %vm1351_vm4, %v1422_v8, %v4746_v30  ;;  %v4722_v30 = vunpack.i.h.bf16 %v4720_v29  ;;  %v1368_v48 = vsel %vm1351_vm4, %v1335_v9, %v4717_v56  ;;  %v6671_v29 = vpop.permute.xlu2 %4774  ;;  %v6695_v9 = vld [vmem:[%s5641_s22 + $0x168] sm:$0xff]  ;;  %4388 = vmatmul.msk.f32.gmra.mxu2 %vm1285_vm2, %v9528_v21 }
 0x10f   : > { %1727 = vmatmul.f32.gmra.mxu1 %v1454_v39  ;;  %v6646_v23 = vpop.permute.xlu1 %4754  ;;  %4904 = vrot.lane.b32.xlu1 %v4903_v19, %s5560_s25  ;;  %v9532_v39 = vld [vmem:[#allocation39_spill] sm:$0xff]  ;;  %v646_v41 = vrot.slane %v6695_v9, 2 }
 0x110   : > { %v4756_v7 = vunpack.i.l.bf16 %v6646_v23  ;;  %v4893_v18 = vpack.i.bf16 %v9532_v39, %v9531_v58 }
 0x111   : > { %v6657_v36 = vpop.permute.xlu0 %4749 }
 0x112   : > { %v4751_v10 = vunpack.i.l.bf16 %v6657_v36  ;;  %4894 = vrot.lane.b32.xlu2 %v4893_v18, %s5558_s23 }
 0x113   : > { %v6664_v53 = vpop.f32.mrf.mxu0 }
 0x114   : > { %9530 = vst [vmem:[#allocation41_spill] sm:$0xff] %v6664_v53  ;;  %v1391_v28 = vsel %vm1285_vm2, %v5885_v57, %v4751_v10  ;;  %v1303_v57 = vsel %vm1285_vm2, %v6086_v33, %v4722_v30  ;;  %v6690_v10 = vld [vmem:[%s5641_s22 + $0x170] sm:$0xff]  ;;  %v4776_v30 = vunpack.i.l.bf16 %v6671_v29 }
 0x115   : > { %v1423_v8 = vsel %vm1318_vm3, %v1391_v28, %v4756_v7  ;;  %v1336_v3 = vsel %vm1318_vm3, %v1303_v57, %v4727_v44  ;;  %v431_v7 = vld [vmem:[%s5641_s22 + $0x160] sm:$0x3]  ;;  %v4737_v28 = vunpack.i.h.bf16 %v6626_v17  ;;  %v9450_v44 = vrot.slane %v6690_v10, 2  ;;  %v9535_v57 = vld [vmem:[#allocation36_spill] sm:$0xff] }
 0x116   : > { %1644 = vmatmul.f32.gmra.mxu0 %v1368_v48  ;;  %v1455_v37 = vsel %vm1351_vm4, %v1423_v8, %v4761_v38  ;;  %v644_v38 = vrot.slane %v431_v7, 2  ;;  %v9536_v18 = vrot.slane %v9535_v57, 2  ;;  %v1369_v14 = vsel %vm1351_vm4, %v1336_v3, %v4732_v60  ;;  %v4790_v60 = vpop.permute.xlu2 %4789 }
 0x117   : > { %1730 = vmatmul.f32.gmra.mxu1 %v1455_v37  ;;  %v6678_v59 = vpop.permute.xlu1 %4769  ;;  %v6716_v17 = vsel %vm570_vm1, %v646_v41, %v9450_v44  ;;  %v563_v44 = vrot.slane %v431_v7, 1  ;;  %v566_v50 = vrot.slane %v6690_v10, 1 }
 0x118   : > { %v4771_v56 = vunpack.i.l.bf16 %v6678_v59  ;;  %v6709_v53 = vsel %vm570_vm1, %v9536_v18, %v644_v38 }
 0x119   : > { %v6683_v19 = vpop.permute.xlu0 %4764  ;;  %v4913_v3 = vpack.i.bf16 %v6716_v17, %v6709_v53  ;;  %4389 = vmatmul.msk.f32.gmra.mxu2 %vm1285_vm2, %v6709_v53 }
 0x11a   : > { %v4766_v33 = vunpack.i.l.bf16 %v6683_v19 }
 0x11b   : > { %v6699_v48 = vpop.f32.mrf.mxu0  ;;  %4914 = vrot.lane.b32.xlu0 %v4913_v3, %s5559_s24 }
 0x11c   : > { %9533 = vst [vmem:[#allocation43_spill] sm:$0xff] %v6699_v48  ;;  %v6702_v8 = vpop.f32.mrf.mxu1  ;;  %v1392_v37 = vsel %vm1285_vm2, %v5920_v62, %v4766_v33  ;;  %v6719_v48 = vld [vmem:[%s5641_s22 + $0x180] sm:$0xff]  ;;  %v4742_v62 = vunpack.i.h.bf16 %v6619_v40  ;;  %v4791_v40 = vunpack.i.l.bf16 %v4790_v60 }
 0x11d   : > { %9534 = vst [vmem:[#allocation26_spill] sm:$0xff] %v6702_v8  ;;  %v1424_v61 = vsel %vm1318_vm3, %v1392_v37, %v4771_v56  ;;  %v1304_v56 = vsel %vm1285_vm2, %v6130_v25, %v4737_v28  ;;  %v4918_v41 = vpack.i.bf16 %v6719_v48, %v6690_v10  ;;  %v4747_v37 = vunpack.i.h.bf16 %v6605_v1 }
 0x11e   : > { %1647 = vmatmul.f32.gmra.mxu0 %v1369_v14  ;;  %v1456_v33 = vsel %vm1351_vm4, %v1424_v61, %v4776_v30  ;;  %v1337_v30 = vsel %vm1318_vm3, %v1304_v56, %v4742_v62  ;;  %v4752_v25 = vunpack.i.h.bf16 %v6657_v36  ;;  %v565_v8 = vrot.slane %v6695_v9, 1 }
 0x11f   : > { %1733 = vmatmul.f32.gmra.mxu1 %v1456_v33  ;;  %v4785_v38 = vpop.permute.xlu1 %4784  ;;  %4919 = vrot.lane.b32.xlu1 %v4918_v41, %s5560_s25  ;;  %v1370_v41 = vsel %vm1351_vm4, %v1337_v30, %v4747_v37  ;;  %v4757_v36 = vunpack.i.h.bf16 %v6646_v23  ;;  %v4792_v23 = vunpack.i.h.bf16 %v4790_v60 }
 0x120   : > { %v4786_v18 = vunpack.i.l.bf16 %v4785_v38  ;;  %v4787_v3 = vunpack.i.h.bf16 %v4785_v38  ;;  %v1305_v7 = vsel %vm1285_vm2, %v6133_v20, %v4752_v25  ;;  %v9538_v38 = vrot.slane %v9535_v57, 1  ;;  %v434_v25 = vld [vmem:[%s5641_s22 + $0x178] sm:$0x3] }
 0x121   : > { %v4780_v21 = vpop.permute.xlu0 %4779  ;;  %v6760_v37 = vsel %vm489_vm0, %v565_v8, %v566_v50  ;;  %v1338_v20 = vsel %vm1318_vm3, %v1305_v7, %v4757_v36  ;;  %4390 = vmatmul.msk.f32.gmra.mxu2 %vm1285_vm2, %v6716_v17  ;;  %v6787_v7 = vld [vmem:[%s5641_s22 + $0x188] sm:$0xff] }
 0x122   : > { %v4782_v61 = vunpack.i.h.bf16 %v4780_v21  ;;  %v4781_v14 = vunpack.i.l.bf16 %v4780_v21  ;;  %v6757_v56 = vsel %vm489_vm0, %v9538_v38, %v563_v44  ;;  %v4767_v44 = vunpack.i.h.bf16 %v6683_v19 }
 0x123   : > { %v6736_v28 = vpop.f32.mrf.mxu0 }
 0x124   : > { %v6738_v33 = vpop.f32.mrf.mxu1  ;;  %v1393_v1 = vsel %vm1285_vm2, %v5959_v4, %v4781_v14  ;;  %v1394_v4 = vsel %vm1285_vm2, %v5996_v55, %v4782_v61  ;;  %v4762_v14 = vunpack.i.h.bf16 %v6634_v49  ;;  %v1306_v36 = vsel %vm1285_vm2, %v6193_v11, %v4767_v44 }
 0x125   : > { %9537 = vst [vmem:[#allocation11_spill] sm:$0xff] %v6738_v33  ;;  %v1425_v21 = vsel %vm1318_vm3, %v1393_v1, %v4786_v18  ;;  %v4908_v18 = vpack.i.bf16 %v6760_v37, %v6757_v56  ;;  %v1426_v55 = vsel %vm1318_vm3, %v1394_v4, %v4787_v3  ;;  %v4805_v3 = vpop.permute.xlu2 %4804 }
 0x126   : > { %1650 = vmatmul.f32.gmra.mxu0 %v1370_v41  ;;  %v1457_v62 = vsel %vm1351_vm4, %v1425_v21, %v4791_v40  ;;  %v1458_v30 = vsel %vm1351_vm4, %v1426_v55, %v4792_v23  ;;  %v1371_v49 = vsel %vm1351_vm4, %v1338_v20, %v4762_v14  ;;  %v649_v41 = vrot.slane %v434_v25, 2 }
 0x127   : > { %1736 = vmatmul.f32.gmra.mxu1 %v1457_v62  ;;  %v4800_v57 = vpop.permute.xlu1 %4799  ;;  %4909 = vrot.lane.b32.xlu2 %v4908_v18, %s5558_s23  ;;  %v4772_v21 = vunpack.i.h.bf16 %v6678_v59  ;;  %v9540_v62 = vrot.slane %v6690_v10, 2  ;;  %v4806_v38 = vunpack.i.l.bf16 %v4805_v3  ;;  %v4933_v59 = vpack.i.bf16 %v6787_v7, %v6709_v53 }
 0x128   : > { %v4801_v1 = vunpack.i.l.bf16 %v4800_v57  ;;  %v4777_v18 = vunpack.i.h.bf16 %v6671_v29  ;;  %v4802_v44 = vunpack.i.h.bf16 %v4800_v57  ;;  %v568_v29 = vrot.slane %v434_v25, 1  ;;  %v6814_v25 = vld [vmem:[%s5641_s22 + $0x198] sm:$0xff] }
 0x129   : > { %v4795_v61 = vpop.permute.xlu0 %4794  ;;  %v650_v4 = vsel %vm570_vm1, %v9540_v62, %v649_v41  ;;  %v1339_v55 = vsel %vm1318_vm3, %v1306_v36, %v4772_v21  ;;  %4934 = vrot.lane.b32.xlu1 %v4933_v59, %s5560_s25  ;;  %v692_v57 = vrot.slane %v6787_v7, 2 }
 0x12a   : > { %v4796_v40 = vunpack.i.l.bf16 %v4795_v61  ;;  %v4928_v23 = vpack.i.bf16 %v650_v4, %v6757_v56  ;;  %v4797_v14 = vunpack.i.h.bf16 %v4795_v61  ;;  %v1372_v53 = vsel %vm1351_vm4, %v1339_v55, %v4777_v18  ;;  %4391 = vmatmul.msk.f32.gmra.mxu2 %vm1285_vm2, %v650_v4  ;;  %v437_v55 = vld [vmem:[%s5641_s22 + $0x190] sm:$0x3] }
 0x12b   : > { %v6769_v8 = vpop.f32.mrf.mxu0  ;;  %v6810_v21 = vsel %vm489_vm0, %v566_v50, %v568_v29  ;;  %v4948_v50 = vpack.i.bf16 %v6814_v25, %v6716_v17  ;;  %v694_v17 = vrot.slane %v437_v55, 2 }
 0x12c   : > { %v6771_v60 = vpop.f32.mrf.mxu1  ;;  %v1395_v19 = vsel %vm1285_vm2, %v6029_v24, %v4796_v40  ;;  %4929 = vrot.lane.b32.xlu0 %v4928_v23, %s5559_s24  ;;  %v1396_v61 = vsel %vm1285_vm2, %v6061_v34, %v4797_v14 }
 0x12d   : > { %9539 = vst [vmem:[#allocation42_spill] sm:$0xff] %v6771_v60  ;;  %v1427_v24 = vsel %vm1318_vm3, %v1395_v19, %v4801_v1  ;;  %v691_v1 = vrot.slane %v6719_v48, 2  ;;  %v4807_v19 = vunpack.i.h.bf16 %v4805_v3  ;;  %v1428_v34 = vsel %vm1318_vm3, %v1396_v61, %v4802_v44  ;;  %v4820_v44 = vpop.permute.xlu2 %4819 }
 0x12e   : > { %1653 = vmatmul.f32.gmra.mxu0 %v1371_v49  ;;  %v1459_v40 = vsel %vm1351_vm4, %v1427_v24, %v4806_v38  ;;  %v655_v49 = vrot.slane %v6787_v7, 1  ;;  %v4821_v61 = vunpack.i.l.bf16 %v4820_v44 }
 0x12f   : > { %1739 = vmatmul.f32.gmra.mxu1 %v1458_v30  ;;  %v654_v30 = vrot.slane %v6719_v48, 1  ;;  %v693_v38 = vsel %vm570_vm1, %v691_v1, %v692_v57  ;;  %v4815_v59 = vpop.permute.xlu1 %4814  ;;  %v1460_v14 = vsel %vm1351_vm4, %v1428_v34, %v4807_v19 }
 0x130   : > { %v4943_v18 = vpack.i.bf16 %v693_v38, %v6760_v37 }
 0x131   : > { %v4810_v41 = vpop.permute.xlu0 %4809  ;;  %v6817_v36 = vsel %vm489_vm0, %v654_v30, %v655_v49  ;;  %4949 = vrot.lane.b32.xlu1 %v4948_v50, %s5560_s25  ;;  %v695_v30 = vsel %vm570_vm1, %v692_v57, %v694_v17  ;;  %v9545_v57 = vld [vmem:[#allocation9_spill] sm:$0xff]  ;;  %v6860_v17 = vld [vmem:[%s5641_s22 + $0x1a8] sm:$0x3] }
 0x132   : > { %v4923_v62 = vpack.i.bf16 %v6817_v36, %v6810_v21  ;;  %v4811_v23 = vunpack.i.l.bf16 %v4810_v41  ;;  %4392 = vmatmul.msk.f32.gmra.mxu2 %vm1285_vm2, %v693_v38  ;;  %v4958_v1 = vpack.i.bf16 %v695_v30, %v6810_v21  ;;  %v4812_v34 = vunpack.i.h.bf16 %v4810_v41 }
 0x133   : > { %v6797_v11 = vpop.f32.mrf.mxu0 }
 0x134   : > { %v6799_v20 = vpop.f32.mrf.mxu1  ;;  %4924 = vrot.lane.b32.xlu2 %v4923_v62, %s5558_s23  ;;  %4944 = vrot.lane.b32.xlu0 %v4943_v18, %s5559_s24  ;;  %v1397_v29 = vsel %vm1285_vm2, %v6091_v63, %v4811_v23  ;;  %v4817_v63 = vunpack.i.h.bf16 %v4815_v59  ;;  %v1398_v41 = vsel %vm1285_vm2, %v6113_v45, %v4812_v34  ;;  %v6856_v18 = vld [vmem:[%s5641_s22 + $0x1a0] sm:$0xff] }
 0x135   : > { %9541 = vst [vmem:[#allocation27_spill] sm:$0xff] %v6799_v20  ;;  %v4835_v34 = vpop.permute.xlu2 %4834 }
 0x136   : > { %1656 = vmatmul.f32.gmra.mxu0 %v1372_v53  ;;  %v9543_v53 = vld [vmem:[#allocation5_spill] sm:$0xff] }
 0x137   : > { %1742 = vmatmul.f32.gmra.mxu1 %v1459_v40  ;;  %v4816_v40 = vunpack.i.l.bf16 %v4815_v59  ;;  %v1430_v59 = vsel %vm1318_vm3, %v1398_v41, %v4817_v63  ;;  %v9547_v63 = vld [vmem:[#allocation14_spill] sm:$0xff]  ;;  %v4836_v41 = vunpack.i.l.bf16 %v4835_v34 }
 0x139   : > { %v1429_v19 = vsel %vm1318_vm3, %v1397_v29, %v4816_v40  ;;  %867 = vrot.lane.b32.xlu1 %v650_v4, %s5560_s25  ;;  %v4825_v23 = vpop.permute.xlu0 %4824  ;;  %v657_v4 = vrot.slane %v437_v55, 1  ;;  %v700_v40 = vrot.slane %v6856_v18, 1  ;;  %v702_v29 = vrot.slane %v6860_v17, 1 }
 0x13a   : > { %v1461_v50 = vsel %vm1351_vm4, %v1429_v19, %v4821_v61  ;;  %4393 = vmatmul.msk.f32.gmra.mxu2 %vm1285_vm2, %v695_v30  ;;  %v4826_v30 = vunpack.i.l.bf16 %v4825_v23  ;;  %v4830_v61 = vpop.permute.xlu1 %4829 }
 0x13b   : > { %v6826_v24 = vpop.f32.mrf.mxu0  ;;  %v703_v55 = vsel %vm489_vm0, %v700_v40, %v702_v29 }
 0x13c   : > { %v6830_v3 = vpop.f32.mrf.mxu1  ;;  %4959 = vrot.lane.b32.xlu0 %v4958_v1, %s5559_s24 }
 0x13d   : > { %9542 = vst [vmem:[#allocation20_spill] sm:$0xff] %v6830_v3 }
 0x13e   : > { %4364 = vmatmul.msk.f32.vlgmr.msrb.gmra.mxu0 %vm1285_vm2, %v9543_v53  ;;  %v6864_v53 = vsel %vm489_vm0, %v655_v49, %v657_v4  ;;  %v4831_v49 = vunpack.i.l.bf16 %v4830_v61 }
 0x13f   : > { %1745 = vmatmul.f32.gmra.mxu1 %v1460_v14  ;;  %v4822_v14 = vunpack.i.h.bf16 %v4820_v44  ;;  %v4938_v45 = vpack.i.bf16 %v6864_v53, %v6690_v10 }
 0x141   : > { %v1462_v19 = vsel %vm1351_vm4, %v1430_v59, %v4822_v14  ;;  %4939 = vrot.lane.b32.xlu2 %v4938_v45, %s5558_s23  ;;  %1251 = vrot.lane.b32.xlu1 %v703_v55, %s5558_s23  ;;  %v4827_v59 = vunpack.i.h.bf16 %v4825_v23  ;;  %v4837_v23 = vunpack.i.h.bf16 %v4835_v34 }
 0x143   : > { %v6843_v62 = vpop.f32.mrf.mxu0 }
 0x144   : > { %v6846_v38 = vpop.f32.mrf.mxu1  ;;  %1155 = vrot.lane.b32.xlu0 %v6856_v18, %s5560_s25 }
 0x145   : > { %9544 = vst [vmem:[#allocation35_spill] sm:$0xff] %v6846_v38  ;;  %v9549_v38 = vld [vmem:[#allocation18_spill] sm:$0xff] }
 0x146   : > { %4365 = vmatmul.msk.f32.gmra.mxu0 %vm1285_vm2, %v9545_v57  ;;  %v1399_v57 = vsel %vm1285_vm2, %v9502_v52, %v4826_v30  ;;  %v1400_v52 = vsel %vm1285_vm2, %v6165_v6, %v4827_v59 }
 0x147   : > { %1748 = vmatmul.f32.gmra.mxu1 %v1461_v50  ;;  %v699_v50 = vrot.slane %v6814_v25, 1  ;;  %v1431_v4 = vsel %vm1318_vm3, %v1399_v57, %v4831_v49 }
 0x148   : > { %v1463_v55 = vsel %vm1351_vm4, %v1431_v4, %v4836_v41  ;;  %v9550_v41 = vld [vmem:[#allocation24_spill] sm:$0xff] }
 0x149   : > { %v701_v14 = vsel %vm489_vm0, %v699_v50, %v700_v40  ;;  %v4840_v40 = vpop.permute.xlu0 %4839 }
 0x14a   : > { %v4953_v29 = vpack.i.bf16 %v701_v14, %v6719_v48  ;;  %v4841_v30 = vunpack.i.l.bf16 %v4840_v40  ;;  %v4842_v14 = vunpack.i.h.bf16 %v4840_v40 }
 0x14b   : > { %v6869_v1 = vpop.f32.mrf.mxu0 }
 0x14c   : > { %v6872_v44 = vpop.f32.mrf.mxu1  ;;  %4954 = vrot.lane.b32.xlu2 %v4953_v29, %s5558_s23  ;;  %v1401_v6 = vsel %vm1285_vm2, %v6198_v35, %v4841_v30 }
 0x14d   : > { %9546 = vst [vmem:[#allocation21_spill] sm:$0xff] %v6872_v44 }
 0x14e   : > { %4366 = vmatmul.msk.f32.gmra.mxu0 %vm1285_vm2, %v9547_v63  ;;  %v4832_v63 = vunpack.i.h.bf16 %v4830_v61  ;;  %v4850_v61 = vpop.permute.xlu2 %4849 }
 0x14f   : > { %1751 = vmatmul.f32.gmra.mxu1 %v1462_v19  ;;  %v4845_v19 = vpop.permute.xlu1 %4844  ;;  %v4851_v34 = vunpack.i.l.bf16 %v4850_v61 }
 0x150   : > { %v1432_v48 = vsel %vm1318_vm3, %v1400_v52, %v4832_v63  ;;  %v9551_v63 = vld [vmem:[#allocation30_spill] sm:$0xff]  ;;  %v1402_v52 = vsel %vm1285_vm2, %v6250_v51, %v4842_v14 }
 0x151   : > { %v1464_v57 = vsel %vm1351_vm4, %v1432_v48, %v4837_v23  ;;  %v4855_v35 = vpop.permute.xlu0 %4854  ;;  %v4852_v23 = vunpack.i.h.bf16 %v4850_v61 }
 0x152   : > { %v4856_v30 = vunpack.i.l.bf16 %v4855_v35 }
 0x153   : > { %v6887_v45 = vpop.f32.mrf.mxu0 }
 0x154   : > { %v6889_v44 = vpop.f32.mrf.mxu1  ;;  %963 = vrot.lane.b32.xlu2 %v6787_v7, %s5558_s23  ;;  %v4847_v7 = vunpack.i.h.bf16 %v4845_v19  ;;  %v1403_v51 = vsel %vm1285_vm2, %v9512_v2, %v4856_v30 }
 0x155   : > { %9548 = vst [vmem:[#allocation3_spill] sm:$0xff] %v6889_v44 }
 0x156   : > { %4367 = vmatmul.msk.f32.gmra.mxu0 %vm1285_vm2, %v9549_v38  ;;  %v4846_v38 = vunpack.i.l.bf16 %v4845_v19  ;;  %v1434_v48 = vsel %vm1318_vm3, %v1402_v52, %v4847_v7 }
 0x157   : > { %1754 = vmatmul.f32.gmra.mxu1 %v1463_v55  ;;  %v4860_v40 = vpop.permute.xlu1 %4859 }
 0x158   : > { %v1433_v4 = vsel %vm1318_vm3, %v1401_v6, %v4846_v38  ;;  %v4861_v19 = vunpack.i.l.bf16 %v4860_v40  ;;  %v4865_v6 = vpop.permute.xlu2 %4864 }
 0x159   : > { %v1465_v55 = vsel %vm1351_vm4, %v1433_v4, %v4851_v34  ;;  %v4866_v61 = vunpack.i.l.bf16 %v4865_v6  ;;  %v4857_v4 = vunpack.i.h.bf16 %v4855_v35  ;;  %v4867_v52 = vunpack.i.h.bf16 %v4865_v6 }
 0x15a   : > { %v1435_v34 = vsel %vm1318_vm3, %v1403_v51, %v4861_v19 }
 0x15b   : > { %v6898_v49 = vpop.f32.mrf.mxu0  ;;  %v1467_v7 = vsel %vm1351_vm4, %v1435_v34, %v4866_v61 }
 0x15c   : > { %v6900_v50 = vpop.f32.mrf.mxu1  ;;  %v4870_v2 = vpop.permute.xlu0 %4869 }
 0x15d   : > { %v4872_v61 = vunpack.i.h.bf16 %v4870_v2 }
 0x15e   : > { %4368 = vmatmul.msk.f32.gmra.mxu0 %vm1285_vm2, %v9550_v41  ;;  %v1466_v41 = vsel %vm1351_vm4, %v1434_v48, %v4852_v23  ;;  %v4871_v48 = vunpack.i.l.bf16 %v4870_v2 }
 0x15f   : > { %1757 = vmatmul.f32.gmra.mxu1 %v1464_v57 }
 0x160   : > { %v4880_v51 = vpop.permute.xlu2 %4879 }
 0x161   : > { %v4875_v35 = vpop.permute.xlu1 %4874 }
 0x163   : > { %v6910_v59 = vpop.f32.mrf.mxu0 }
 0x164   : > { %v6912_v29 = vpop.f32.mrf.mxu1 }
 0x166   : > { %4369 = vmatmul.msk.f32.gmra.mxu0 %vm1285_vm2, %v9551_v63  ;;  %v4862_v63 = vunpack.i.h.bf16 %v4860_v40  ;;  %v4876_v40 = vunpack.i.l.bf16 %v4875_v35 }
 0x167   : > { %1760 = vmatmul.f32.gmra.mxu1 %v1465_v55 }
 0x16b   : > { %v6920_v57 = vpop.f32.mrf.mxu0 }
 0x16c   : > { %v6922_v38 = vpop.f32.mrf.mxu1 }
 0x16e   : > { %4370 = vmatmul.msk.f32.gmra.mxu0 %vm1285_vm2, %v5901_v31  ;;  %v1404_v31 = vsel %vm1285_vm2, %v9513_v42, %v4857_v4  ;;  %v4881_v42 = vunpack.i.l.bf16 %v4880_v51 }
 0x16f   : > { %1763 = vmatmul.f32.gmra.mxu1 %v1466_v41  ;;  %v1436_v23 = vsel %vm1318_vm3, %v1404_v31, %v4862_v63  ;;  %v4877_v63 = vunpack.i.h.bf16 %v4875_v35  ;;  %v4882_v31 = vunpack.i.h.bf16 %v4880_v51 }
 0x170   : > { %v1468_v19 = vsel %vm1351_vm4, %v1436_v23, %v4867_v52 }
 0x171   : > { %v4890_v2 = vpop.permute.xlu1 %4889 }
 0x172   : > { %v4891_v35 = vunpack.i.l.bf16 %v4890_v2 }
 0x173   : > { %v6930_v14 = vpop.f32.mrf.mxu0 }
 0x174   : > { %v6932_v55 = vpop.f32.mrf.mxu1 }
 0x176   : > { %4371 = vmatmul.msk.f32.gmra.mxu0 %vm1285_vm2, %v5939_v54  ;;  %v1405_v54 = vsel %vm1285_vm2, %v9518_v13, %v4871_v48  ;;  %v4885_v13 = vpop.permute.xlu0 %4884 }
 0x177   : > { %1766 = vmatmul.f32.gmra.mxu1 %v1467_v7  ;;  %v1437_v6 = vsel %vm1318_vm3, %v1405_v54, %v4876_v40  ;;  %v4886_v23 = vunpack.i.l.bf16 %v4885_v13  ;;  %v4895_v54 = vpop.permute.xlu2 %4894 }
 0x178   : > { %v1469_v7 = vsel %vm1351_vm4, %v1437_v6, %v4881_v42  ;;  %v4887_v42 = vunpack.i.h.bf16 %v4885_v13 }
 0x17b   : > { %v6940_v30 = vpop.f32.mrf.mxu0 }
 0x17c   : > { %v6942_v41 = vpop.f32.mrf.mxu1 }
 0x17e   : > { %4372 = vmatmul.msk.f32.gmra.mxu0 %vm1285_vm2, %v5983_v32  ;;  %v1406_v32 = vsel %vm1285_vm2, %v9519_v27, %v4872_v61  ;;  %v4896_v27 = vunpack.i.l.bf16 %v4895_v54 }
 0x17f   : > { %1769 = vmatmul.f32.gmra.mxu1 %v1468_v19  ;;  %v1438_v52 = vsel %vm1318_vm3, %v1406_v32, %v4877_v63  ;;  %v4900_v63 = vpop.permute.xlu0 %4899  ;;  %v4892_v32 = vunpack.i.h.bf16 %v4890_v2 }
 0x180   : > { %v1470_v40 = vsel %vm1351_vm4, %v1438_v52, %v4882_v31  ;;  %v4897_v52 = vunpack.i.h.bf16 %v4895_v54 }
 0x181   : > { %v4905_v31 = vpop.permute.xlu1 %4904 }
 0x182   : > { %v4907_v44 = vunpack.i.h.bf16 %v4905_v31 }
 0x183   : > { %v6950_v34 = vpop.f32.mrf.mxu0 }
 0x184   : > { %v6952_v4 = vpop.f32.mrf.mxu1 }
 0x186   : > { %4373 = vmatmul.msk.f32.gmra.mxu0 %vm1285_vm2, %v6014_v12  ;;  %v1407_v12 = vsel %vm1285_vm2, %v9524_v16, %v4886_v23  ;;  %v4910_v16 = vpop.permute.xlu2 %4909  ;;  %v4901_v23 = vunpack.i.l.bf16 %v4900_v63 }
 0x187   : > { %1772 = vmatmul.f32.gmra.mxu1 %v1469_v7  ;;  %v1439_v51 = vsel %vm1318_vm3, %v1407_v12, %v4891_v35  ;;  %v4911_v54 = vunpack.i.l.bf16 %v4910_v16 }
 0x188   : > { %v1471_v7 = vsel %vm1351_vm4, %v1439_v51, %v4896_v27  ;;  %v4906_v27 = vunpack.i.l.bf16 %v4905_v31 }
 0x18b   : > { %v6960_v48 = vpop.f32.mrf.mxu0 }
 0x18c   : > { %v6962_v19 = vpop.f32.mrf.mxu1 }
 0x18d   : > { %v4915_v2 = vpop.permute.xlu0 %4914 }
 0x18e   : > { %4374 = vmatmul.msk.f32.gmra.mxu0 %vm1285_vm2, %v6051_v26  ;;  %v1408_v26 = vsel %vm1285_vm2, %v9525_v43, %v4887_v42  ;;  %v6991_v43 = vpop.permute.xlu2 %4924 }
 0x18f   : > { %1775 = vmatmul.f32.gmra.mxu1 %v1470_v40  ;;  %v1440_v13 = vsel %vm1318_vm3, %v1408_v26, %v4892_v32 }
 0x190   : > { %v1472_v12 = vsel %vm1351_vm4, %v1440_v13, %v4897_v52 }
 0x191   : > { %v6985_v51 = vpop.permute.xlu1 %4919 }
 0x192   : > { %v4921_v20 = vunpack.i.l.bf16 %v6985_v51 }
 0x193   : > { %v6970_v6 = vpop.f32.mrf.mxu0 }
 0x194   : > { %v6972_v61 = vpop.f32.mrf.mxu1 }
 0x196   : > { %4375 = vmatmul.msk.f32.gmra.mxu0 %vm1285_vm2, %v6076_v15  ;;  %v1409_v15 = vsel %vm1285_vm2, %v9531_v58, %v4901_v23 }
 0x197   : > { %1778 = vmatmul.f32.gmra.mxu1 %v1471_v7  ;;  %v1441_v42 = vsel %vm1318_vm3, %v1409_v15, %v4906_v27  ;;  %v4902_v7 = vunpack.i.h.bf16 %v4900_v63  ;;  %v4912_v27 = vunpack.i.h.bf16 %v4910_v16 }
 0x198   : > { %v1473_v52 = vsel %vm1351_vm4, %v1441_v42, %v4911_v54  ;;  %v4916_v42 = vunpack.i.l.bf16 %v4915_v2 }
 0x199   : > { %v1410_v58 = vsel %vm1285_vm2, %v9532_v39, %v4902_v7 }
 0x19a   : > { %v1442_v54 = vsel %vm1318_vm3, %v1410_v58, %v4907_v44 }
 0x19b   : > { %v6980_v40 = vpop.f32.mrf.mxu0  ;;  %v7002_v3 = vpop.permute.xlu1 %4934 }
 0x19c   : > { %v6982_v35 = vpop.f32.mrf.mxu1  ;;  %v4936_v63 = vunpack.i.l.bf16 %v7002_v3  ;;  %v7009_v23 = vpop.permute.xlu2 %4939 }
 0x19e   : > { %4376 = vmatmul.msk.f32.gmra.mxu0 %vm1285_vm2, %v6106_v46  ;;  %v6999_v13 = vpop.permute.xlu0 %4929 }
 0x19f   : > { %1781 = vmatmul.f32.gmra.mxu1 %v1472_v12  ;;  %v4931_v46 = vunpack.i.l.bf16 %v6999_v13  ;;  %v4941_v12 = vunpack.i.l.bf16 %v7009_v23 }
 0x1a1   : > { %v1315_v31 = vsel %vm1285_vm2, %v6652_v47, %v4931_v46  ;;  %v1411_v47 = vsel %vm1285_vm2, %v6757_v56, %v4916_v42  ;;  %v704_v56 = vrot.slane %v6814_v25, 2 }
 0x1a2   : > { %v1348_v15 = vsel %vm1318_vm3, %v1315_v31, %v4936_v63  ;;  %v4926_v31 = vunpack.i.l.bf16 %v6991_v43 }
 0x1a3   : > { %v6994_v32 = vpop.f32.mrf.mxu0  ;;  %v4950_v60 = vpop.permute.xlu1 %4949 }
 0x1a4   : > { %v6996_v26 = vpop.f32.mrf.mxu1  ;;  %v4951_v16 = vunpack.i.l.bf16 %v4950_v60 }
 0x1a6   : > { %4377 = vmatmul.msk.f32.gmra.mxu0 %vm1285_vm2, %v9498_v5  ;;  %v1381_v5 = vsel %vm1351_vm4, %v1348_v15, %v4941_v12  ;;  %v4945_v44 = vpop.permute.xlu0 %4944  ;;  %v4955_v46 = vpop.permute.xlu2 %4954  ;;  %v705_v12 = vrot.slane %v6856_v18, 2 }
 0x1a7   : > { %1784 = vmatmul.f32.gmra.mxu1 %v1473_v52  ;;  %1683 = vmatmul.f32.vlgmr.msra.gmra.mxu3 %v1381_v5  ;;  %v1474_v52 = vsel %vm1351_vm4, %v1442_v54, %v4912_v27  ;;  %v4946_v58 = vunpack.i.l.bf16 %v4945_v44  ;;  %v4956_v63 = vunpack.i.l.bf16 %v4955_v46  ;;  %v1443_v27 = vsel %vm1318_vm3, %v1411_v47, %v4921_v20 }
 0x1a8   : > { %v4917_v54 = vunpack.i.h.bf16 %v4915_v2  ;;  %v1475_v18 = vsel %vm1351_vm4, %v1443_v27, %v4926_v31  ;;  %v706_v33 = vsel %vm570_vm1, %v704_v56, %v705_v12  ;;  %v4922_v20 = vunpack.i.h.bf16 %v6985_v51 }
 0x1a9   : > { %v1316_v15 = vsel %vm1285_vm2, %v6695_v9, %v4946_v58  ;;  %4394 = vmatmul.msk.f32.gmra.mxu2 %vm1285_vm2, %v706_v33  ;;  %v707_v33 = vrot.slane %v6860_v17, 2  ;;  %v4932_v31 = vunpack.i.h.bf16 %v6999_v13  ;;  %v4942_v13 = vunpack.i.h.bf16 %v7009_v23 }
 0x1aa   : > { %v1412_v9 = vsel %vm1285_vm2, %v6760_v37, %v4917_v54  ;;  %v4947_v56 = vunpack.i.h.bf16 %v4945_v44 }
 0x1ab   : > { %v7017_v39 = vpop.f32.mrf.mxu0  ;;  %v868_v47 = vpop.permute.xlu1 %867  ;;  %v1413_v17 = vsel %vm1285_vm2, %v6810_v21, %v4932_v31  ;;  %v4957_v21 = vunpack.i.h.bf16 %v4955_v46 }
 0x1ac   : > { %v7019_v7 = vpop.f32.mrf.mxu1 }
 0x1ae   : > { %4378 = vmatmul.msk.f32.gmra.mxu0 %vm1285_vm2, %v9499_v22  ;;  %v1349_v22 = vsel %vm1318_vm3, %v1316_v15, %v4951_v16  ;;  %v4960_v25 = vpop.permute.xlu0 %4959  ;;  %v4927_v16 = vunpack.i.h.bf16 %v6991_v43  ;;  %v964_v58 = vpop.permute.xlu2 %963  ;;  %v708_v15 = vsel %vm570_vm1, %v705_v12, %v707_v33 }
 0x1af   : > { %1787 = vmatmul.f32.gmra.mxu1 %v1474_v52  ;;  %v1382_v42 = vsel %vm1351_vm4, %v1349_v22, %v4956_v63  ;;  %v4961_v2 = vunpack.i.l.bf16 %v4960_v25  ;;  %v1444_v63 = vsel %vm1318_vm3, %v1412_v9, %v4922_v20  ;;  %v4937_v22 = vunpack.i.h.bf16 %v7002_v3  ;;  %v9553_v9 = vld [vmem:[#allocation6_spill] sm:$0xff] }
 0x1b0   : > { %1686 = vmatmul.f32.gmra.mxu3 %v1382_v42  ;;  %v1476_v43 = vsel %vm1351_vm4, %v1444_v63, %v4927_v16  ;;  %v4952_v3 = vunpack.i.h.bf16 %v4950_v60  ;;  %v4962_v23 = vunpack.i.h.bf16 %v4960_v25  ;;  %v9554_v63 = vld [vmem:[#allocation10_spill] sm:$0xff] }
 0x1b1   : > { %v1317_v51 = vsel %vm1285_vm2, %v6690_v10, %v4961_v2  ;;  %4395 = vmatmul.msk.f32.gmra.mxu2 %vm1285_vm2, %v708_v15  ;;  %v9552_v10 = vld [vmem:[#allocation44_spill] sm:$0xff]  ;;  %v1445_v12 = vsel %vm1318_vm3, %v1413_v17, %v4937_v22  ;;  %v1414_v2 = vsel %vm1285_vm2, %v6817_v36, %v4947_v56  ;;  %v7092_v22 = vpop.f32.mrf.mxu2 }
 0x1b2   : > { %v1477_v20 = vsel %vm1351_vm4, %v1445_v12, %v4942_v13 }
 0x1b3   : > { %v7034_v5 = vpop.f32.mrf.mxu0  ;;  %v1252_v33 = vpop.permute.xlu1 %1251 }
 0x1b4   : > { %v7037_v52 = vpop.f32.mrf.mxu1 }
 0x1b6   : > { %4379 = vmatmul.msk.f32.gmra.mxu0 %vm1285_vm2, %v6184_v0  ;;  %v1350_v0 = vsel %vm1318_vm3, %v1317_v51, %v868_v47  ;;  %v1446_v47 = vsel %vm1318_vm3, %v1414_v2, %v4952_v3  ;;  %v1156_v60 = vpop.permute.xlu0 %1155  ;;  %v1415_v51 = vsel %vm1285_vm2, %v6864_v53, %v4962_v23 }
 0x1b7   : > { %1790 = vmatmul.f32.gmra.mxu1 %v1475_v18  ;;  %v1383_v37 = vsel %vm1351_vm4, %v1350_v0, %v964_v58  ;;  %v1478_v44 = vsel %vm1351_vm4, %v1446_v47, %v4957_v21  ;;  %v1447_v36 = vsel %vm1318_vm3, %v1415_v51, %v1156_v60 }
 0x1b8   : > { %1689 = vmatmul.f32.gmra.mxu3 %v1383_v37  ;;  %v1479_v25 = vsel %vm1351_vm4, %v1447_v36, %v1252_v33 }
 0x1b9   : > { %v7096_v13 = vpop.f32.mrf.mxu2 }
 0x1ba   : > { %9556 = vst [vmem:[#allocation4_spill] sm:$0xff] %v7096_v13 }
 0x1bb   : > { %v7054_v27 = vpop.f32.mrf.mxu0 }
 0x1bc   : > { %v7058_v54 = vpop.f32.mrf.mxu1 }
 0x1be   : > { %4380 = vmatmul.msk.f32.gmra.mxu0 %vm1285_vm2, %v9552_v10 }
 0x1bf   : > { %1793 = vmatmul.f32.gmra.mxu1 %v1476_v43 }
 0x1c1   : > { %v7102_v3 = vpop.f32.mrf.mxu2 }
 0x1c2   : > { %9557 = vst [vmem:[#allocation8_spill] sm:$0xff] %v7102_v3 }
 0x1c3   : > { %v1826_v42 = vpop.f32.mrf.mxu0 }
 0x1c4   : > { %v7069_v18 = vpop.f32.mrf.mxu1 }
 0x1c6   : > { %4381 = vmatmul.msk.f32.gmra.mxu0 %vm1285_vm2, %v9553_v9 }
 0x1c7   : > { %1796 = vmatmul.f32.gmra.mxu1 %v1477_v20 }
 0x1c9   : > { %v7108_v21 = vpop.f32.mrf.mxu2 }
 0x1ca   : > { %9559 = vst [vmem:[#allocation7_spill] sm:$0xff] %v7108_v21  ;;  %v9565_v21 = vld [vmem:[#allocation41_spill] sm:$0xff] }
 0x1cb   : > { %v1829_v16 = vpop.f32.mrf.mxu0  ;;  %v1711_v13 = vadd.f32 %v6900_v50, %v9565_v21  ;;  %v1723_v50 = vadd.f32 %v6942_v41, %v6797_v11  ;;  %v1729_v11 = vadd.f32 %v6962_v19, %v6843_v62  ;;  %v1732_v62 = vadd.f32 %v6972_v61, %v6869_v1 }
 0x1cc   : > { %v7077_v58 = vpop.f32.mrf.mxu1 }
 0x1ce   : > { %4382 = vmatmul.msk.f32.gmra.mxu0 %vm1285_vm2, %v9554_v63 }
 0x1cf   : > { %1799 = vmatmul.f32.gmra.mxu1 %v1478_v44 }
 0x1d1   : > { %v7114_v44 = vpop.f32.mrf.mxu2 }
 0x1d2   : > { %9561 = vst [vmem:[#allocation19_spill] sm:$0xff] %v7114_v44  ;;  %v1717_v44 = vadd.f32 %v6922_v38, %v6736_v28 }
 0x1d3   : > { %v1832_v46 = vpop.f32.mrf.mxu0 }
 0x1d4   : > { %v7085_v31 = vpop.f32.mrf.mxu1 }
 0x1d7   : > { %1802 = vmatmul.f32.gmra.mxu1 %v1479_v25  ;;  %v9564_v25 = vld [vmem:[#allocation43_spill] sm:$0xff] }
 0x1d8   : > { %v1714_v3 = vadd.f32 %v6912_v29, %v9564_v25  ;;  %v1720_v29 = vadd.f32 %v6932_v55, %v6769_v8  ;;  %v7145_v25 = vadd.f32 %v1829_v16, %v1717_v44 }
 0x1d9   : > { %v7122_v36 = vpop.f32.mrf.mxu2 }
 0x1da   : > { %9563 = vst [vmem:[#allocation17_spill] sm:$0xff] %v7122_v36  ;;  %v7151_v38 = vadd.f32 %v1832_v46, %v1720_v29  ;;  %v1996_v55 = vmul.f32 %v7145_v25, %v7145_v25 }
 0x1db   : > { %v1835_v0 = vpop.f32.mrf.mxu0  ;;  %9567 = vst [vmem:[#allocation16_spill] sm:$0xff] %v7145_v25 }
 0x1dc   : > { %v7088_v37 = vpop.f32.mrf.mxu1  ;;  %v7161_v16 = vadd.f32 %v1835_v0, %v1723_v50  ;;  %v2029_v44 = vsel %vm1924_vm5, %v1996_v55, 0.0  ;;  %v1930_v29 = vsel %vm1924_vm5, %v7151_v38, 0.0 }
 0x1de   : > { %v1998_v50 = vmul.f32 %v7161_v16, %v7161_v16  ;;  %v1932_v61 = vsel %vm1924_vm5, %v7161_v16, 0.0 }
 0x1e1   : > { %v7141_v36 = vpop.f32.mrf.mxu2 }
 0x1e3   : > { %v1838_v15 = vpop.f32.mrf.mxu0 }
 0x1e4   : > { %v7090_v43 = vpop.f32.mrf.mxu1 }
 0x1eb   : > { %v1841_v10 = vpop.f32.mrf.mxu0 }
 0x1ec   : > { %v7094_v53 = vpop.f32.mrf.mxu1 }
 0x1ed   : > { %9555 = vst [vmem:[#allocation32_spill] sm:$0xff] %v7094_v53  ;;  %v7139_v53 = vadd.f32 %v7054_v27, %v1711_v13 }
 0x1ef   : > { %v1994_v27 = vmul.f32 %v7139_v53, %v7139_v53  ;;  %v1925_v41 = vsel %vm1924_vm5, %v7139_v53, 0.0 }
 0x1f1   : > { %v2026_v19 = vsel %vm1924_vm5, %v1994_v27, 0.0 }
 0x1f3   : > { %v1844_v17 = vpop.f32.mrf.mxu0 }
 0x1f4   : > { %v7098_v12 = vpop.f32.mrf.mxu1 }
 0x1fb   : > { %v1847_v56 = vpop.f32.mrf.mxu0 }
 0x1fc   : > { %v7100_v20 = vpop.f32.mrf.mxu1 }
 0x203   : > { %v7104_v9 = vpop.f32.mrf.mxu0 }
 0x204   : > { %v7106_v2 = vpop.f32.mrf.mxu1 }
 0x205   : > { %9558 = vst [vmem:[#allocation13_spill] sm:$0xff] %v7106_v2 }
 0x20b   : > { %v7110_v47 = vpop.f32.mrf.mxu0 }
 0x20c   : > { %v7112_v23 = vpop.f32.mrf.mxu1 }
 0x20d   : > { %9560 = vst [vmem:[#allocation15_spill] sm:$0xff] %v7112_v23  ;;  %v7134_v23 = vadd.f32 %v1826_v42, %v1714_v3  ;;  %v1726_v42 = vadd.f32 %v6952_v4, %v6826_v24  ;;  %v1928_v24 = vsel %vm1924_vm5, %v7145_v25, 0.0  ;;  %v1997_v4 = vmul.f32 %v7151_v38, %v7151_v38 }
 0x20f   : > { %9566 = vst [vmem:[#allocation23_spill] sm:$0xff] %v7134_v23  ;;  %v1995_v28 = vmul.f32 %v7134_v23, %v7134_v23  ;;  %v1926_v8 = vsel %vm1924_vm5, %v7134_v23, 0.0  ;;  %v7174_v3 = vadd.f32 %v1838_v15, %v1726_v42  ;;  %v1735_v15 = vadd.f32 %v6982_v35, %v6887_v45  ;;  %v7190_v23 = vpop.f32.mrf.mxu2 }
 0x210   : > { %v1927_v21 = vadd.f32 %v1926_v8, %v1925_v41  ;;  %v2031_v1 = vsel %vm1924_vm5, %v1997_v4, 0.0  ;;  %v7197_v8 = vadd.f32 %v1844_v17, %v1732_v62  ;;  %v2033_v45 = vsel %vm1924_vm5, %v1998_v50, 0.0 }
 0x211   : > { %v2027_v13 = vsel %vm1924_vm5, %v1995_v28, 0.0  ;;  %v7186_v28 = vadd.f32 %v1841_v10, %v1729_v11  ;;  %v1999_v27 = vmul.f32 %v7174_v3, %v7174_v3  ;;  %v1738_v10 = vadd.f32 %v6996_v26, %v6898_v49 }
 0x212   : > { %v2028_v42 = vadd.f32 %v2027_v13, %v2026_v19  ;;  %v1929_v25 = vadd.f32 %v1928_v24, %v1927_v21  ;;  %v1934_v35 = vsel %vm1924_vm5, %v7174_v3, 0.0  ;;  %v7206_v13 = vadd.f32 %v1847_v56, %v1735_v15 }
 0x213   : > { %v7116_v63 = vpop.f32.mrf.mxu0  ;;  %v2000_v41 = vmul.f32 %v7186_v28, %v7186_v28  ;;  %v1741_v24 = vadd.f32 %v7019_v7, %v6910_v59  ;;  %v2035_v49 = vsel %vm1924_vm5, %v1999_v27, 0.0  ;;  %v1936_v26 = vsel %vm1924_vm5, %v7186_v28, 0.0 }
 0x214   : > { %v7118_v60 = vpop.f32.mrf.mxu1  ;;  %v2030_v55 = vadd.f32 %v2029_v44, %v2028_v42  ;;  %v1931_v11 = vadd.f32 %v1930_v29, %v1929_v25  ;;  %v2001_v25 = vmul.f32 %v7197_v8, %v7197_v8  ;;  %v7216_v19 = vadd.f32 %v7104_v9, %v1738_v10 }
 0x215   : > { %9562 = vst [vmem:[#allocation12_spill] sm:$0xff] %v7118_v60  ;;  %v1744_v56 = vadd.f32 %v7037_v52, %v6920_v57  ;;  %v2037_v7 = vsel %vm1924_vm5, %v2000_v41, 0.0  ;;  %v1938_v29 = vsel %vm1924_vm5, %v7197_v8, 0.0  ;;  %v2002_v50 = vmul.f32 %v7206_v13, %v7206_v13 }
 0x216   : > { %v2032_v17 = vadd.f32 %v2031_v1, %v2030_v55  ;;  %v1933_v4 = vadd.f32 %v1932_v61, %v1931_v11  ;;  %v7228_v15 = vadd.f32 %v7110_v47, %v1741_v24  ;;  %v1747_v9 = vadd.f32 %v7058_v54, %v6930_v14 }
 0x217   : > { %v2039_v52 = vsel %vm1924_vm5, %v2001_v25, 0.0  ;;  %v1940_v1 = vsel %vm1924_vm5, %v7206_v13, 0.0  ;;  %v2003_v61 = vmul.f32 %v7216_v19, %v7216_v19  ;;  %v7238_v27 = vadd.f32 %v7116_v63, %v1744_v56  ;;  %v7242_v11 = vpop.f32.mrf.mxu2 }
 0x218   : > { %v2034_v21 = vadd.f32 %v2033_v45, %v2032_v17  ;;  %v1935_v44 = vadd.f32 %v1934_v35, %v1933_v4  ;;  %v1750_v47 = vadd.f32 %v7069_v18, %v6940_v30  ;;  %v2041_v14 = vsel %vm1924_vm5, %v2002_v50, 0.0 }
 0x219   : > { %v1942_v54 = vsel %vm1924_vm5, %v7216_v19, 0.0  ;;  %v2004_v45 = vmul.f32 %v7228_v15, %v7228_v15  ;;  %v1753_v63 = vadd.f32 %v7077_v58, %v6950_v34  ;;  %v2043_v24 = vsel %vm1924_vm5, %v2003_v61, 0.0 }
 0x21a   : > { %v2036_v42 = vadd.f32 %v2035_v49, %v2034_v21  ;;  %v1937_v57 = vadd.f32 %v1936_v26, %v1935_v44  ;;  %v1944_v17 = vsel %vm1924_vm5, %v7228_v15, 0.0  ;;  %v2005_v4 = vmul.f32 %v7238_v27, %v7238_v27 }
 0x21b   : > { %v7120_v51 = vpop.f32.mrf.mxu0  ;;  %v2045_v34 = vsel %vm1924_vm5, %v2004_v45, 0.0  ;;  %v1946_v58 = vsel %vm1924_vm5, %v7238_v27, 0.0 }
 0x21c   : > { %v7124_v33 = vpop.f32.mrf.mxu1  ;;  %v2038_v10 = vadd.f32 %v2037_v7, %v2036_v42  ;;  %v1939_v55 = vadd.f32 %v1938_v29, %v1937_v57  ;;  %v7250_v35 = vadd.f32 %v7120_v51, %v1747_v9  ;;  %v1756_v51 = vadd.f32 %v7085_v31, %v6960_v48 }
 0x21d   : > { %v2047_v48 = vsel %vm1924_vm5, %v2005_v4, 0.0 }
 0x21e   : > { %v2040_v41 = vadd.f32 %v2039_v52, %v2038_v10  ;;  %v1941_v30 = vadd.f32 %v1940_v1, %v1939_v55  ;;  %v2006_v56 = vmul.f32 %v7250_v35, %v7250_v35  ;;  %v1948_v31 = vsel %vm1924_vm5, %v7250_v35, 0.0 }
 0x21f   : > { %v7292_v10 = vpop.f32.mrf.mxu2 }
 0x220   : > { %v2042_v26 = vadd.f32 %v2041_v14, %v2040_v41  ;;  %v1943_v25 = vadd.f32 %v1942_v54, %v1941_v30  ;;  %v1768_v54 = vadd.f32 %v7098_v12, %v7017_v39 }
 0x222   : > { %v2044_v44 = vadd.f32 %v2043_v24, %v2042_v26  ;;  %v1945_v7 = vadd.f32 %v1944_v17, %v1943_v25  ;;  %v1771_v26 = vadd.f32 %v7100_v20, %v7034_v5 }
 0x223   : > { %v7130_v2 = vpop.f32.mrf.mxu0 }
 0x224   : > { %v7136_v60 = vpop.f32.mrf.mxu1  ;;  %v7260_v49 = vadd.f32 %v7130_v2, %v1750_v47  ;;  %v1759_v2 = vadd.f32 %v7088_v37, %v6970_v6  ;;  %v2046_v42 = vadd.f32 %v2045_v34, %v2044_v44  ;;  %v1947_v57 = vadd.f32 %v1946_v58, %v1945_v7  ;;  %v9569_v7 = vld [vmem:[#allocation26_spill] sm:$0xff] }
 0x225   : > { %v2049_v6 = vsel %vm1924_vm5, %v2006_v56, 0.0  ;;  %v7320_v34 = vadd.f32 %v7092_v22, %v1768_v54  ;;  %v9571_v22 = vld [vmem:[#allocation4_spill] sm:$0xff] }
 0x226   : > { %v2007_v50 = vmul.f32 %v7260_v49, %v7260_v49  ;;  %v1950_v37 = vsel %vm1924_vm5, %v7260_v49, 0.0  ;;  %v2048_v61 = vadd.f32 %v2047_v48, %v2046_v42  ;;  %v1949_v47 = vadd.f32 %v1948_v31, %v1947_v57  ;;  %v9570_v48 = vld [vmem:[#allocation13_spill] sm:$0xff] }
 0x227   : > { %v1774_v31 = vadd.f32 %v9570_v48, %v9569_v7  ;;  %v7329_v57 = vpop.f32.mrf.mxu2 }
 0x228   : > { %v2051_v55 = vsel %vm1924_vm5, %v2007_v50, 0.0  ;;  %v2050_v45 = vadd.f32 %v2049_v6, %v2048_v61  ;;  %v7332_v6 = vadd.f32 %v9571_v22, %v1771_v26 }
 0x22a   : > { %v2052_v24 = vadd.f32 %v2051_v55, %v2050_v45  ;;  %v7308_v4 = vpop.f32.mrf.mxu3  ;;  %v9575_v45 = vld [vmem:[#allocation42_spill] sm:$0xff] }
 0x22b   : > { %v7167_v46 = vpop.f32.mrf.mxu0 }
 0x22c   : > { %v7176_v0 = vpop.f32.mrf.mxu1  ;;  %v7270_v21 = vadd.f32 %v7167_v46, %v1753_v63  ;;  %v1762_v46 = vadd.f32 %v7090_v43, %v6980_v40  ;;  %v1951_v63 = vadd.f32 %v1950_v37, %v1949_v47  ;;  %v9572_v37 = vld [vmem:[#allocation11_spill] sm:$0xff] }
 0x22e   : > { %v2008_v52 = vmul.f32 %v7270_v21, %v7270_v21  ;;  %v1952_v40 = vsel %vm1924_vm5, %v7270_v21, 0.0 }
 0x22f   : > { %v1953_v17 = vadd.f32 %v1952_v40, %v1951_v63  ;;  %v9576_v63 = vld [vmem:[#allocation12_spill] sm:$0xff] }
 0x230   : > { %v2053_v41 = vsel %vm1924_vm5, %v2008_v52, 0.0  ;;  %v9573_v52 = vld [vmem:[#allocation15_spill] sm:$0xff] }
 0x231   : > { %v2054_v58 = vadd.f32 %v2053_v41, %v2052_v24  ;;  %v1777_v61 = vadd.f32 %v9573_v52, %v9572_v37  ;;  %v1780_v41 = vadd.f32 %v9576_v63, %v9575_v45  ;;  %v9577_v24 = vld [vmem:[#allocation27_spill] sm:$0xff]  ;;  %v9581_v37 = vld [vmem:[#allocation17_spill] sm:$0xff] }
 0x232   : > { %v9582_v45 = vld [vmem:[#allocation35_spill] sm:$0xff] }
 0x233   : > { %v1868_v62 = vpop.f32.mrf.mxu0  ;;  %v1789_v63 = vadd.f32 %v7176_v0, %v9582_v45 }
 0x234   : > { %v7220_v59 = vpop.f32.mrf.mxu1  ;;  %v7281_v9 = vadd.f32 %v1868_v62, %v1756_v51 }
 0x236   : > { %v2009_v43 = vmul.f32 %v7281_v9, %v7281_v9  ;;  %v1954_v30 = vsel %vm1924_vm5, %v7281_v9, 0.0 }
 0x237   : > { %v1955_v56 = vadd.f32 %v1954_v30, %v1953_v17  ;;  %v1783_v17 = vadd.f32 %v7124_v33, %v9577_v24  ;;  %v1913_v24 = vpop.f32.mrf.mxu2 }
 0x238   : > { %v2055_v39 = vsel %vm1924_vm5, %v2009_v43, 0.0  ;;  %v9574_v43 = vld [vmem:[#allocation8_spill] sm:$0xff] }
 0x239   : > { %v2056_v50 = vadd.f32 %v2055_v39, %v2054_v58  ;;  %v7342_v54 = vadd.f32 %v9574_v43, %v1774_v31  ;;  %v9578_v58 = vld [vmem:[#allocation7_spill] sm:$0xff]  ;;  %v7371_v52 = vadd.f32 %v9581_v37, %v1783_v17 }
 0x23b   : > { %v1871_v18 = vpop.f32.mrf.mxu0  ;;  %v2018_v0 = vmul.f32 %v7371_v52, %v7371_v52 }
 0x23c   : > { %v7274_v29 = vpop.f32.mrf.mxu1  ;;  %v7290_v1 = vadd.f32 %v1871_v18, %v1759_v2  ;;  %v9568_v2 = vld [vmem:[#allocation32_spill] sm:$0xff] }
 0x23d   : > { %v1765_v44 = vadd.f32 %v9568_v2, %v6994_v32 }
 0x23e   : > { %v2010_v18 = vmul.f32 %v7290_v1, %v7290_v1  ;;  %v1956_v12 = vsel %vm1924_vm5, %v7290_v1, 0.0 }
 0x240   : > { %v2057_v5 = vsel %vm1924_vm5, %v2010_v18, 0.0 }
 0x241   : > { %v2058_v55 = vadd.f32 %v2057_v5, %v2056_v50  ;;  %v1687_v5 = vpop.f32.mrf.mxu3  ;;  %v1964_v50 = vsel %vm1924_vm5, %v7332_v6, 0.0 }
 0x243   : > { %v1874_v62 = vpop.f32.mrf.mxu0 }
 0x244   : > { %v7299_v14 = vadd.f32 %v1874_v62, %v1762_v46  ;;  %v7310_v51 = vpop.f32.mrf.mxu1  ;;  %v1957_v46 = vadd.f32 %v1956_v12, %v1955_v56  ;;  %v2013_v62 = vmul.f32 %v7320_v34, %v7320_v34  ;;  %v1962_v12 = vsel %vm1924_vm5, %v7320_v34, 0.0 }
 0x245   : > { %v7357_v56 = vadd.f32 %v9578_v58, %v1777_v61 }
 0x246   : > { %v2011_v25 = vmul.f32 %v7299_v14, %v7299_v14  ;;  %v1958_v20 = vsel %vm1924_vm5, %v7299_v14, 0.0 }
 0x247   : > { %v1959_v40 = vadd.f32 %v1958_v20, %v1957_v46  ;;  %v2063_v20 = vsel %vm1924_vm5, %v2013_v62, 0.0  ;;  %v2015_v46 = vmul.f32 %v7342_v54, %v7342_v54  ;;  %v1921_v62 = vld [vmem:[%s9377_s4] sm:$0xff]  ;;  %v2016_v43 = vmul.f32 %v7357_v56, %v7357_v56 }
 0x248   : > { %v2059_v32 = vsel %vm1924_vm5, %v2011_v25, 0.0  ;;  %v2014_v25 = vmul.f32 %v7332_v6, %v7332_v6 }
 0x249   : > { %v2060_v26 = vadd.f32 %v2059_v32, %v2058_v55  ;;  %v1922_v32 = vld [vmem:[%s9377_s4 + $0x8] sm:$0xff]  ;;  %v2067_v17 = vsel %vm1924_vm5, %v2015_v46, 0.0 }
 0x24a   : > { %v2065_v55 = vsel %vm1924_vm5, %v2014_v25, 0.0  ;;  %2112 = vmatpush.msrb.mxu3 %v1922_v32 }
 0x24b   : > { %v1877_v42 = vpop.f32.mrf.mxu0 }
 0x24c   : > { %v7337_v47 = vadd.f32 %v1877_v42, %v1765_v44  ;;  %v9579_v44 = vld [vmem:[#allocation20_spill] sm:$0xff]  ;;  %v1800_v33 = vpop.f32.mrf.mxu1  ;;  %v9580_v42 = vld [vmem:[#allocation19_spill] sm:$0xff]  ;;  %2113 = vmatpush.msrb.mxu3 %v1921_v62 }
 0x24d   : > { %v1786_v7 = vadd.f32 %v7136_v60, %v9579_v44  ;;  %v7368_v22 = vadd.f32 %v9580_v42, %v1780_v41  ;;  %v1972_v42 = vsel %vm1924_vm5, %v7371_v52, 0.0 }
 0x24e   : > { %v1960_v30 = vsel %vm1924_vm5, %v7337_v47, 0.0  ;;  %v2012_v18 = vmul.f32 %v7337_v47, %v7337_v47  ;;  %2143 = vmatpush.msra.mxu3 %v1922_v32  ;;  %v1690_v32 = vpop.f32.mrf.mxu3 }
 0x24f   : > { %v1961_v39 = vadd.f32 %v1960_v30, %v1959_v40  ;;  %v1966_v40 = vsel %vm1924_vm5, %v7342_v54, 0.0  ;;  %v7387_v41 = vadd.f32 %v7141_v36, %v1786_v7  ;;  %v1970_v44 = vsel %vm1924_vm5, %v7368_v22, 0.0 }
 0x250   : > { %v2061_v2 = vsel %vm1924_vm5, %v2012_v18, 0.0  ;;  %v7402_v7 = vadd.f32 %v7190_v23, %v1789_v63  ;;  %2144 = vmatpush.msra.mxu3 %v1921_v62  ;;  %v1798_v23 = vadd.f32 %v7310_v51, %v7308_v4 }
 0x251   : > { %v1963_v48 = vadd.f32 %v1962_v12, %v1961_v39  ;;  %v2062_v31 = vadd.f32 %v2061_v2, %v2060_v26  ;;  %v1968_v26 = vsel %vm1924_vm5, %v7357_v56, 0.0  ;;  %v2017_v39 = vmul.f32 %v7368_v22, %v7368_v22  ;;  %v9583_v12 = vld [vmem:[#allocation21_spill] sm:$0xff] }
 0x252   : > { %v1792_v25 = vadd.f32 %v7220_v59, %v9583_v12  ;;  %v2069_v2 = vsel %vm1924_vm5, %v2016_v43, 0.0  ;;  %v2019_v59 = vmul.f32 %v7387_v41, %v7387_v41  ;;  %v1974_v62 = vsel %vm1924_vm5, %v7387_v41, 0.0  ;;  %v1916_v12 = vpop.f32.mrf.mxu2 }
 0x253   : > { %v1965_v61 = vadd.f32 %v1964_v50, %v1963_v48  ;;  %v2064_v60 = vadd.f32 %v2063_v20, %v2062_v31  ;;  %v9584_v48 = vld [vmem:[#allocation3_spill] sm:$0xff]  ;;  %v2071_v46 = vsel %vm1924_vm5, %v2017_v39, 0.0  ;;  %v1976_v51 = vsel %vm1924_vm5, %v7402_v7, 0.0 }
 0x254   : > { %v1795_v31 = vadd.f32 %v7274_v29, %v9584_v48  ;;  %v7412_v37 = vadd.f32 %v7242_v11, %v1792_v25  ;;  %v1801_v11 = vadd.f32 %v1800_v33, %v1687_v5  ;;  %v2075_v45 = vsel %vm1924_vm5, %v2019_v59, 0.0 }
 0x255   : > { %v1967_v30 = vadd.f32 %v1966_v40, %v1965_v61  ;;  %v2066_v18 = vadd.f32 %v2065_v55, %v2064_v60  ;;  %v2073_v61 = vsel %vm1924_vm5, %v2018_v0, 0.0  ;;  %v1803_v55 = vpop.f32.mrf.mxu1  ;;  %v2020_v40 = vmul.f32 %v7402_v7, %v7402_v7 }
 0x256   : > { %v7422_v43 = vadd.f32 %v7292_v10, %v1795_v31  ;;  %v1978_v5 = vsel %vm1924_vm5, %v7412_v37, 0.0  ;;  %v7437_v25 = vadd.f32 %v1913_v24, %v1801_v11 }
 0x257   : > { %v1969_v36 = vadd.f32 %v1968_v26, %v1967_v30  ;;  %v2068_v58 = vadd.f32 %v2067_v17, %v2066_v18  ;;  %v2021_v30 = vmul.f32 %v7412_v37, %v7412_v37  ;;  %v7430_v18 = vadd.f32 %v7329_v57, %v1798_v23 }
 0x258   : > { %v1804_v17 = vadd.f32 %v1803_v55, %v1690_v32  ;;  %v2077_v10 = vsel %vm1924_vm5, %v2020_v40, 0.0  ;;  %v2022_v33 = vmul.f32 %v7422_v43, %v7422_v43  ;;  %v1980_v57 = vsel %vm1924_vm5, %v7422_v43, 0.0 }
 0x259   : > { %v1971_v20 = vadd.f32 %v1970_v44, %v1969_v36  ;;  %v2070_v50 = vadd.f32 %v2069_v2, %v2068_v58  ;;  %v2079_v58 = vsel %vm1924_vm5, %v2021_v30, 0.0  ;;  %v2023_v2 = vmul.f32 %v7430_v18, %v7430_v18 }
 0x25a   : > { %v7444_v44 = vadd.f32 %v1916_v12, %v1804_v17  ;;  %v2081_v59 = vsel %vm1924_vm5, %v2022_v33, 0.0  ;;  %v1982_v24 = vsel %vm1924_vm5, %v7430_v18, 0.0  ;;  %v1984_v23 = vsel %vm1924_vm5, %v7437_v25, 0.0 }
 0x25b   : > { %v2072_v29 = vadd.f32 %v2071_v46, %v2070_v50  ;;  %v1973_v60 = vadd.f32 %v1972_v42, %v1971_v20  ;;  %v2024_v20 = vmul.f32 %v7437_v25, %v7437_v25  ;;  %v2083_v42 = vsel %vm1924_vm5, %v2023_v2, 0.0 }
 0x25c   : > { %v1986_v55 = vsel %vm1924_vm5, %v7444_v44, 0.0 }
 0x25d   : > { %v1975_v63 = vadd.f32 %v1974_v62, %v1973_v60  ;;  %v2074_v4 = vadd.f32 %v2073_v61, %v2072_v29  ;;  %v2025_v61 = vmul.f32 %v7444_v44, %v7444_v44  ;;  %v2085_v32 = vsel %vm1924_vm5, %v2024_v20, 0.0 }
 0x25f   : > { %v1977_v26 = vadd.f32 %v1976_v51, %v1975_v63  ;;  %v2076_v39 = vadd.f32 %v2075_v45, %v2074_v4  ;;  %v2087_v11 = vsel %vm1924_vm5, %v2025_v61, 0.0 }
 0x261   : > { %v1979_v0 = vadd.f32 %v1978_v5, %v1977_v26  ;;  %v2078_v36 = vadd.f32 %v2077_v10, %v2076_v39 }
 0x263   : > { %v1981_v48 = vadd.f32 %v1980_v57, %v1979_v0  ;;  %v2080_v31 = vadd.f32 %v2079_v58, %v2078_v36  ;;  %v1923_v36 = vld [vmem:[%s9378_s5] sm:$0xff]  ;;  %v5561_v58 = vmov 512.0  }
 0x264   : > { %5508 = vrcp.f32 %v5561_v58 }
 0x265   : > { %v1983_v50 = vadd.f32 %v1982_v24, %v1981_v48  ;;  %v2082_v46 = vadd.f32 %v2081_v59, %v2080_v31 }
 0x267   : > { %v2084_v29 = vadd.f32 %v2083_v42, %v2082_v46  ;;  %v1985_v60 = vadd.f32 %v1984_v23, %v1983_v50 }
 0x269   : > { %v2086_v62 = vadd.f32 %v2085_v32, %v2084_v29  ;;  %v1987_v40 = vadd.f32 %v1986_v55, %v1985_v60 }
 0x26a   : > { %v5509_v57 = vpop.eup %5508 }
 0x26b   : > { %v1988_v45 = vrot.slane %v1987_v40, 4  ;;  %v2088_v63 = vadd.f32 %v2087_v11, %v2086_v62  ;;  %v2119_v2 = vmul.f32 512.0, %v5509_v57  ;;  %vm2123_vm6 = vweird.f32 %v5509_v57 }
 0x26d   : > { %v1989_v4 = vadd.f32 %v1988_v45, %v1987_v40  ;;  %v2089_v51 = vrot.slane %v2088_v63, 4  ;;  %v2120_v48 = vsub.f32 1.0, %v2119_v2 }
 0x26f   : > { %v1990_v30 = vrot.slane %v1989_v4, 2  ;;  %v2090_v17 = vadd.f32 %v2089_v51, %v2088_v63  ;;  %v2121_v31 = vmul.f32 %v5509_v57, %v2120_v48 }
 0x271   : > { %v2091_v26 = vrot.slane %v2090_v17, 2  ;;  %v1991_v39 = vadd.f32 %v1990_v30, %v1989_v4  ;;  %v2122_v59 = vadd.f32 %v5509_v57, %v2121_v31  ;;  %v5562_v4 = vmov 0.0  }
 0x272   : > { %2314 = vst.msk [vmem:[#allocation2] sm:$0xff] %vm1924_vm5, %v5562_v4 }
 0x273   : > { %v1992_v12 = vrot.slane %v1991_v39, 1  ;;  %v2092_v10 = vadd.f32 %v2091_v26, %v2090_v17  ;;  %v7465_v24 = vsel %vm2123_vm6, %v5509_v57, %v2122_v59  ;;  %2315 = vst.msk [vmem:[#allocation2 + $0x8] sm:$0xff] %vm1924_vm5, %v5562_v4  ;;  %v3592_v59 = vld [vmem:[%s9379_s6 + $0x88] sm:$0xff] }
 0x274   : > { %2317 = vst.msk [vmem:[#allocation2 + $0x10] sm:$0x3] %vm2316_vm11, %v5562_v4  ;;  %3784 = vmatpush.msrb.mxu2 %v3592_v59 }
 0x275   : > { %v1993_v5 = vadd.f32 %v1992_v12, %v1991_v39  ;;  %v2093_v33 = vrot.slane %v2092_v10, 1  ;;  %2319 = vst.msk [vmem:[#allocation2 + $0x198] sm:$0xff] %vm1924_vm5, %v5562_v4 }
 0x276   : > { %2320 = vst.msk [vmem:[#allocation2 + $0x1a0] sm:$0xff] %vm1924_vm5, %v5562_v4 }
 0x277   : > { %4396 = vmatmul.msk.f32.vlgmr.msrb.gmra.mxu3 %vm1924_vm5, %v1993_v5  ;;  %v2094_v0 = vadd.f32 %v2093_v33, %v2092_v10  ;;  %2321 = vst.msk [vmem:[#allocation2 + $0x1a8] sm:$0x3] %vm2316_vm11, %v5562_v4 }
 0x278   : > { %2183 = vmatpush.msrb.mxu3 %v1923_v36  ;;  %2326 = vst.msk [vmem:[#allocation2 + $0x48] sm:$0x1] %vm2323_vm12, %v5562_v4 }
 0x279   : > { %v7481_v51 = vld [vmem:[#allocation2] sm:$0xff]  ;;  %2324 = vst.msk [vmem:[#allocation2 + $0x18] sm:$0x1] %vm2323_vm12, %v5562_v4 }
 0x27a   : > { %v2389_v30 = vld [vmem:[#allocation2 + $0x8] sm:$0xff]  ;;  %v2490_v17 = vrot.slane %v7481_v51, 1  ;;  %v2570_v5 = vrot.slane %v7481_v51, 2  ;;  %2325 = vst.msk [vmem:[#allocation2 + $0x30] sm:$0x1] %vm2323_vm12, %v5562_v4 }
 0x27b   : > { %v2390_v26 = vld [vmem:[#allocation2 + $0x10] sm:$0x3]  ;;  %v2491_v39 = vrot.slane %v2389_v30, 1  ;;  %v2571_v33 = vrot.slane %v2389_v30, 2  ;;  %2327 = vst.msk [vmem:[#allocation2 + $0x60] sm:$0x1] %vm2323_vm12, %v5562_v4 }
 0x27c   : > { %v2493_v12 = vrot.slane %v2390_v26, 1  ;;  %2328 = vst.msk [vmem:[#allocation2 + $0x78] sm:$0x1] %vm2323_vm12, %v5562_v4 }
 0x27d   : > { %v2492_v10 = vsel %vm489_vm0, %v2490_v17, %v2491_v39  ;;  %v2572_v57 = vsel %vm570_vm1, %v2570_v5, %v2571_v33  ;;  %2329 = vst.msk [vmem:[#allocation2 + $0x90] sm:$0x1] %vm2323_vm12, %v5562_v4 }
 0x27e   : > { %2330 = vst.msk [vmem:[#allocation2 + $0xa8] sm:$0x1] %vm2323_vm12, %v5562_v4 }
 0x27f   : > { %4397 = vmatmul.msk.f32.vlgmr.msra.gmra.mxu3 %vm1924_vm5, %v2094_v0  ;;  %v2573_v0 = vrot.slane %v2390_v26, 2  ;;  %2331 = vst.msk [vmem:[#allocation2 + $0xc0] sm:$0x1] %vm2323_vm12, %v5562_v4 }
 0x280   : > { %2206 = vmatpush.msra.mxu3 %v1923_v36  ;;  %v2494_v36 = vsel %vm489_vm0, %v2491_v39, %v2493_v12  ;;  %2332 = vst.msk [vmem:[#allocation2 + $0xd8] sm:$0x1] %vm2323_vm12, %v5562_v4 }
 0x281   : > { %v4963_v58 = vpack.i.bf16 %v2494_v36, %v2492_v10  ;;  %v2574_v2 = vsel %vm570_vm1, %v2571_v33, %v2573_v0  ;;  %2333 = vst.msk [vmem:[#allocation2 + $0xf0] sm:$0x1] %vm2323_vm12, %v5562_v4 }
 0x282   : > { %v4968_v31 = vpack.i.bf16 %v2574_v2, %v2572_v57  ;;  %2334 = vst.msk [vmem:[#allocation2 + $0x108] sm:$0x1] %vm2323_vm12, %v5562_v4 }
 0x283   : > { %4964 = vrot.lane.b32.xlu2 %v4963_v58, %s5563_s21  ;;  %2335 = vst.msk [vmem:[#allocation2 + $0x120] sm:$0x1] %vm2323_vm12, %v5562_v4 }
 0x284   : > { %4969 = vrot.lane.b32.xlu0 %v4968_v31, %s5559_s24  ;;  %2336 = vst.msk [vmem:[#allocation2 + $0x138] sm:$0x1] %vm2323_vm12, %v5562_v4 }
 0x285   : > { %2337 = vst.msk [vmem:[#allocation2 + $0x150] sm:$0x1] %vm2323_vm12, %v5562_v4 }
 0x286   : > { %2338 = vst.msk [vmem:[#allocation2 + $0x168] sm:$0x1] %vm2323_vm12, %v5562_v4 }
 0x287   : > { %2339 = vst.msk [vmem:[#allocation2 + $0x180] sm:$0x1] %vm2323_vm12, %v5562_v4 }
 0x288   : > { %2340 = vst.msk [vmem:[#allocation2 + $0x29] sm:$0x1] %vm2323_vm12, %v5562_v4 }
 0x289   : > { %2341 = vst.msk [vmem:[#allocation2 + $0x41] sm:$0x1] %vm2323_vm12, %v5562_v4 }
 0x28a   : > { %2342 = vst.msk [vmem:[#allocation2 + $0x59] sm:$0x1] %vm2323_vm12, %v5562_v4 }
 0x28b   : > { %2343 = vst.msk [vmem:[#allocation2 + $0x71] sm:$0x1] %vm2323_vm12, %v5562_v4 }
 0x28c   : > { %2344 = vst.msk [vmem:[#allocation2 + $0x89] sm:$0x1] %vm2323_vm12, %v5562_v4 }
 0x28d   : > { %2345 = vst.msk [vmem:[#allocation2 + $0xa1] sm:$0x1] %vm2323_vm12, %v5562_v4 }
 0x28e   : > { %2346 = vst.msk [vmem:[#allocation2 + $0xb9] sm:$0x1] %vm2323_vm12, %v5562_v4 }
 0x28f   : > { %2347 = vst.msk [vmem:[#allocation2 + $0xd1] sm:$0x1] %vm2323_vm12, %v5562_v4 }
 0x290   : > { %2348 = vst.msk [vmem:[#allocation2 + $0xe9] sm:$0x1] %vm2323_vm12, %v5562_v4 }
 0x291   : > { %2349 = vst.msk [vmem:[#allocation2 + $0x101] sm:$0x1] %vm2323_vm12, %v5562_v4 }
 0x292   : > { %2350 = vst.msk [vmem:[#allocation2 + $0x119] sm:$0x1] %vm2323_vm12, %v5562_v4 }
 0x293   : > { %2351 = vst.msk [vmem:[#allocation2 + $0x131] sm:$0x1] %vm2323_vm12, %v5562_v4 }
 0x294   : > { %2352 = vst.msk [vmem:[#allocation2 + $0x149] sm:$0x1] %vm2323_vm12, %v5562_v4 }
 0x295   : > { %2353 = vst.msk [vmem:[#allocation2 + $0x161] sm:$0x1] %vm2323_vm12, %v5562_v4 }
 0x296   : > { %2354 = vst.msk [vmem:[#allocation2 + $0x179] sm:$0x1] %vm2323_vm12, %v5562_v4 }
 0x297   : > { %2355 = vst.msk [vmem:[#allocation2 + $0x191] sm:$0x1] %vm2323_vm12, %v5562_v4 }
 0x2fa   : > { %v2115_v20 = vpop.f32.mrf.mxu3 }
 0x2fb   : > { %v2125_v50 = vmul.f32 %v7465_v24, %v2115_v20  ;;  %v1919_v20 = vld [vmem:[%s9375_s2] sm:$0x1] }
 0x2fd   : > { %4398 = vmatmul.msk.f32.vlgmr.msrb.gmra.mxu3 %vm2164_vm7, %v2125_v50  ;;  %v2150_v42 = vmul.f32 %v2125_v50, %v2125_v50 }
 0x302   : > { %v2146_v46 = vpop.f32.mrf.mxu3 }
 0x303   : > { %v2149_v23 = vmul.f32 %v2146_v46, %v7465_v24 }
 0x305   : > { %v2151_v61 = vsub.f32 %v2149_v23, %v2150_v42  ;;  %v1920_v23 = vld [vmem:[%s9376_s3] sm:$0x1] }
 0x307   : > { %v2152_v29 = vmax.f32 %v2151_v61, 0.0 }
 0x309   : > { %v2153_v60 = vadd.f32 1e-05, %v2152_v29 }
 0x30b   : > { %5510 = vrsqrt.f32 %v2153_v60  ;;  %vm2160_vm9 = vweird.f32 %v2153_v60 }
 0x311   : > { %v5511_v32 = vpop.eup %5510 }
 0x312   : > { %v2155_v55 = vmul.f32 %v5511_v32, %v2153_v60  ;;  %vm2161_vm8 = vweird.f32 %v5511_v32 }
 0x313   : > { %vm2162_vm10 = vmor %vm2160_vm9, %vm2161_vm8 }
 0x314   : > { %v2156_v62 = vmul.f32 %v5511_v32, %v2155_v55  ;;  %v9585_v55 = vld [vmem:[#allocation23_spill] sm:$0xff] }
 0x316   : > { %v2157_v40 = vmul.f32 0.5, %v2156_v62 }
 0x318   : > { %v2158_v11 = vsub.f32 1.5, %v2157_v40  ;;  %v9586_v40 = vld [vmem:[#allocation16_spill] sm:$0xff] }
 0x31a   : > { %v2159_v45 = vmul.f32 %v5511_v32, %v2158_v11 }
 0x31c   : > { %v2163_v63 = vsel %vm2162_vm10, %v5511_v32, %v2159_v45 }
 0x31d   : > { %4399 = vmatmul.msk.f32.vlgmr.msra.gmra.mxu3 %vm2164_vm7, %v2163_v63 }
 0x380   : > { %v2185_v48 = vpop.f32.mrf.mxu3 }
 0x3a0   : > { %v2208_v50 = vpop.f32.mrf.mxu3 }
 0x3a1   : > { %v2211_v46 = vmul.f32 %v2208_v50, %v1919_v20 }
 0x3a3   : > { %v2212_v42 = vmul.f32 %v2211_v46, %v2185_v48  ;;  %v7500_v29 = vperm.slane %v2211_v46, 0 }
 0x3a5   : > { %v2213_v61 = vsub.f32 %v1920_v23, %v2212_v42  ;;  %v2215_v32 = vmul.f32 %v7500_v29, %v7139_v53  ;;  %v2216_v62 = vmul.f32 %v7500_v29, %v9585_v55  ;;  %v2217_v11 = vmul.f32 %v7500_v29, %v9586_v40 }
 0x3a6   : > { %v2218_v45 = vmul.f32 %v7500_v29, %v7151_v38  ;;  %v2219_v63 = vmul.f32 %v7500_v29, %v7161_v16  ;;  %v2220_v26 = vmul.f32 %v7500_v29, %v7174_v3  ;;  %v2221_v12 = vmul.f32 %v7500_v29, %v7186_v28 }
 0x3a7   : > { %v7502_v60 = vperm.slane %v2213_v61, 0  ;;  %v2222_v38 = vmul.f32 %v7500_v29, %v7197_v8  ;;  %v2223_v5 = vmul.f32 %v7500_v29, %v7206_v13  ;;  %v2224_v36 = vmul.f32 %v7500_v29, %v7216_v19  ;;  %v3591_v8 = vld [vmem:[%s9379_s6 + $0x80] sm:$0xff] }
 0x3a8   : > { %v2225_v2 = vmul.f32 %v7500_v29, %v7228_v15  ;;  %3785 = vmatpush.msrb.mxu2 %v3591_v8  ;;  %v2226_v19 = vmul.f32 %v7500_v29, %v7238_v27  ;;  %v2227_v20 = vmul.f32 %v7500_v29, %v7250_v35  ;;  %v2228_v46 = vmul.f32 %v7500_v29, %v7260_v49 }
 0x3a9   : > { %v2250_v30 = vadd.f32 %v7502_v60, %v2215_v32  ;;  %v2251_v17 = vadd.f32 %v7502_v60, %v2216_v62  ;;  %v2252_v53 = vadd.f32 %v7502_v60, %v2217_v11  ;;  %v2253_v39 = vadd.f32 %v7502_v60, %v2218_v45 }
 0x3aa   : > { %v2254_v10 = vadd.f32 %v7502_v60, %v2219_v63  ;;  %v2255_v16 = vadd.f32 %v7502_v60, %v2220_v26  ;;  %v2256_v33 = vadd.f32 %v7502_v60, %v2221_v12  ;;  %v2257_v58 = vadd.f32 %v7502_v60, %v2222_v38 }
 0x3ab   : > { %v2282_v3 = vmax.f32 %v2250_v30, 0.0  ;;  %v2283_v0 = vmax.f32 %v2251_v17, 0.0  ;;  %v2284_v28 = vmax.f32 %v2252_v53, 0.0  ;;  %v2285_v57 = vmax.f32 %v2253_v39, 0.0 }
 0x3ac   : > { %v2258_v13 = vadd.f32 %v7502_v60, %v2223_v5  ;;  %v2286_v48 = vmax.f32 %v2254_v10, 0.0  ;;  %v2259_v31 = vadd.f32 %v7502_v60, %v2224_v36  ;;  %v2287_v59 = vmax.f32 %v2255_v16, 0.0 }
 0x3ad   : > { %2356 = vst.msk [vmem:[#allocation2 + $0x19] sm:$0xff] %vm1924_vm5, %v2282_v3  ;;  %v2260_v50 = vadd.f32 %v7502_v60, %v2225_v2  ;;  %v2288_v15 = vmax.f32 %v2256_v33, 0.0  ;;  %v2261_v42 = vadd.f32 %v7502_v60, %v2226_v19  ;;  %v2289_v23 = vmax.f32 %v2257_v58, 0.0 }
 0x3ae   : > { %2357 = vst.msk [vmem:[#allocation2 + $0x21] sm:$0xff] %vm1924_vm5, %v2283_v0  ;;  %v2229_v27 = vmul.f32 %v7500_v29, %v7270_v21  ;;  %v2262_v61 = vadd.f32 %v7502_v60, %v2227_v20  ;;  %v2290_v32 = vmax.f32 %v2258_v13, 0.0  ;;  %v2230_v35 = vmul.f32 %v7500_v29, %v7281_v9 }
 0x3af   : > { %2358 = vst.msk [vmem:[#allocation2 + $0x31] sm:$0xff] %vm1924_vm5, %v2284_v28  ;;  %v2263_v55 = vadd.f32 %v7502_v60, %v2228_v46  ;;  %v2291_v62 = vmax.f32 %v2259_v31, 0.0  ;;  %v2231_v49 = vmul.f32 %v7500_v29, %v7290_v1  ;;  %v2292_v11 = vmax.f32 %v2260_v50, 0.0 }
 0x3b0   : > { %2359 = vst.msk [vmem:[#allocation2 + $0x39] sm:$0xff] %vm1924_vm5, %v2285_v57  ;;  %v2264_v40 = vadd.f32 %v7502_v60, %v2229_v27  ;;  %v2232_v21 = vmul.f32 %v7500_v29, %v7299_v14  ;;  %v2265_v45 = vadd.f32 %v7502_v60, %v2230_v35  ;;  %v2293_v63 = vmax.f32 %v2261_v42, 0.0 }
 0x3b1   : > { %2360 = vst.msk [vmem:[#allocation2 + $0x49] sm:$0xff] %vm1924_vm5, %v2286_v48  ;;  %v2233_v9 = vmul.f32 %v7500_v29, %v7337_v47  ;;  %v2266_v30 = vadd.f32 %v7502_v60, %v2231_v49  ;;  %v2294_v17 = vmax.f32 %v2262_v61, 0.0  ;;  %v2234_v1 = vmul.f32 %v7500_v29, %v7320_v34 }
 0x3b2   : > { %2361 = vst.msk [vmem:[#allocation2 + $0x51] sm:$0xff] %vm1924_vm5, %v2287_v59  ;;  %v2267_v26 = vadd.f32 %v7502_v60, %v2232_v21  ;;  %v2295_v53 = vmax.f32 %v2263_v55, 0.0  ;;  %v2235_v14 = vmul.f32 %v7500_v29, %v7332_v6  ;;  %v2296_v12 = vmax.f32 %v2264_v40, 0.0 }
 0x3b3   : > { %2362 = vst.msk [vmem:[#allocation2 + $0x61] sm:$0xff] %vm1924_vm5, %v2288_v15  ;;  %v2268_v39 = vadd.f32 %v7502_v60, %v2233_v9  ;;  %v2236_v47 = vmul.f32 %v7500_v29, %v7342_v54  ;;  %v2269_v10 = vadd.f32 %v7502_v60, %v2234_v1  ;;  %v2297_v38 = vmax.f32 %v2265_v45, 0.0 }
 0x3b4   : > { %2363 = vst.msk [vmem:[#allocation2 + $0x69] sm:$0xff] %vm1924_vm5, %v2289_v23  ;;  %v2237_v34 = vmul.f32 %v7500_v29, %v7357_v56  ;;  %v2270_v16 = vadd.f32 %v7502_v60, %v2235_v14  ;;  %v2298_v5 = vmax.f32 %v2266_v30, 0.0  ;;  %v2238_v6 = vmul.f32 %v7500_v29, %v7368_v22  ;;  %v7663_v49 = vld [vmem:[#allocation2 + $0x18] sm:$0xff] }
 0x3b5   : > { %2364 = vst.msk [vmem:[#allocation2 + $0x79] sm:$0xff] %vm1924_vm5, %v2290_v32  ;;  %v2271_v33 = vadd.f32 %v7502_v60, %v2236_v47  ;;  %v2299_v3 = vmax.f32 %v2267_v26, 0.0  ;;  %v2239_v54 = vmul.f32 %v7500_v29, %v7371_v52  ;;  %v2300_v36 = vmax.f32 %v2268_v39, 0.0  ;;  %v7653_v35 = vld [vmem:[#allocation2 + $0x20] sm:$0xff] }
 0x3b6   : > { %2365 = vst.msk [vmem:[#allocation2 + $0x81] sm:$0xff] %vm1924_vm5, %v2291_v62  ;;  %v2272_v0 = vadd.f32 %v7502_v60, %v2237_v34  ;;  %v2240_v56 = vmul.f32 %v7500_v29, %v7387_v41  ;;  %v2273_v58 = vadd.f32 %v7502_v60, %v2238_v6  ;;  %v2301_v28 = vmax.f32 %v2269_v10, 0.0  ;;  %v2393_v6 = vld [vmem:[#allocation2 + $0x28] sm:$0x3] }
 0x3b7   : > { %2366 = vst.msk [vmem:[#allocation2 + $0x91] sm:$0xff] %vm1924_vm5, %v2292_v11  ;;  %v2241_v22 = vmul.f32 %v7500_v29, %v7402_v7  ;;  %v2274_v57 = vadd.f32 %v7502_v60, %v2239_v54  ;;  %v2302_v8 = vmax.f32 %v2270_v16, 0.0  ;;  %v2242_v52 = vmul.f32 %v7500_v29, %v7412_v37  ;;  %v7649_v32 = vld [vmem:[#allocation2 + $0x38] sm:$0xff]  ;;  %v7668_v11 = vld [vmem:[#allocation2 + $0x30] sm:$0xff] }
 0x3b8   : > { %2367 = vst.msk [vmem:[#allocation2 + $0x99] sm:$0xff] %vm1924_vm5, %v2293_v63  ;;  %v2275_v2 = vadd.f32 %v7502_v60, %v2240_v56  ;;  %v2303_v13 = vmax.f32 %v2271_v33, 0.0  ;;  %v2243_v41 = vmul.f32 %v7500_v29, %v7422_v43  ;;  %v2304_v19 = vmax.f32 %v2272_v0, 0.0  ;;  %v7655_v55 = vld [vmem:[#allocation2 + $0x48] sm:$0xff] }
 0x3b9   : > { %2368 = vst.msk [vmem:[#allocation2 + $0xa9] sm:$0xff] %vm1924_vm5, %v2294_v17  ;;  %v2276_v48 = vadd.f32 %v7502_v60, %v2241_v22  ;;  %v2244_v7 = vmul.f32 %v7500_v29, %v7430_v18  ;;  %v2277_v31 = vadd.f32 %v7502_v60, %v2242_v52  ;;  %v2305_v59 = vmax.f32 %v2273_v58, 0.0  ;;  %v2399_v4 = vld [vmem:[#allocation2 + $0x58] sm:$0x3] }
 0x3ba   : > { %2369 = vst.msk [vmem:[#allocation2 + $0xb1] sm:$0xff] %vm1924_vm5, %v2295_v53  ;;  %v2245_v37 = vmul.f32 %v7500_v29, %v7437_v25  ;;  %v2278_v20 = vadd.f32 %v7502_v60, %v2243_v41  ;;  %v2306_v50 = vmax.f32 %v2274_v57, 0.0  ;;  %v2246_v43 = vmul.f32 %v7500_v29, %v7444_v44  ;;  %v7691_v30 = vld [vmem:[#allocation2 + $0x60] sm:$0xff] }
 0x3bb   : > { %2370 = vst.msk [vmem:[#allocation2 + $0xc1] sm:$0xff] %vm1924_vm5, %v2296_v12  ;;  %v2279_v15 = vadd.f32 %v7502_v60, %v2244_v7  ;;  %v2307_v46 = vmax.f32 %v2275_v2, 0.0  ;;  %v2308_v42 = vmax.f32 %v2276_v48, 0.0  ;;  %v2309_v23 = vmax.f32 %v2277_v31, 0.0  ;;  %v7693_v17 = vld [vmem:[#allocation2 + $0x68] sm:$0xff] }
 0x3bc   : > { %2371 = vst.msk [vmem:[#allocation2 + $0xc9] sm:$0xff] %vm1924_vm5, %v2297_v38  ;;  %v2280_v18 = vadd.f32 %v7502_v60, %v2245_v37  ;;  %v2281_v25 = vadd.f32 %v7502_v60, %v2246_v43  ;;  %v2310_v27 = vmax.f32 %v2278_v20, 0.0  ;;  %v7645_v60 = vld [vmem:[#allocation2 + $0x50] sm:$0xff]  ;;  %v2581_v40 = vrot.slane %v7649_v32, 2  ;;  %v7724_v14 = vld [vmem:[#allocation2 + $0x78] sm:$0xff] }
 0x3bd   : > { %2372 = vst.msk [vmem:[#allocation2 + $0xd9] sm:$0xff] %vm1924_vm5, %v2298_v5  ;;  %v2311_v61 = vmax.f32 %v2279_v15, 0.0  ;;  %v4993_v62 = vpack.i.bf16 %v7645_v60, %v7655_v55  ;;  %v4973_v21 = vpack.i.bf16 %v7653_v35, %v7663_v49  ;;  %v4983_v45 = vpack.i.bf16 %v7649_v32, %v7668_v11  ;;  %v7726_v39 = vld [vmem:[#allocation2 + $0x80] sm:$0xff] }
 0x3be   : > { %2373 = vst.msk [vmem:[#allocation2 + $0xe1] sm:$0xff] %vm1924_vm5, %v2299_v3  ;;  %v2312_v44 = vmax.f32 %v2280_v18, 0.0  ;;  %v2313_v29 = vmax.f32 %v2281_v25, 0.0  ;;  %v2580_v63 = vrot.slane %v7668_v11, 2  ;;  %v4998_v1 = vpack.i.bf16 %v7693_v17, %v7691_v30  ;;  %v7716_v26 = vld [vmem:[#allocation2 + $0x90] sm:$0xff] }
 0x3bf   : > { %2374 = vst.msk [vmem:[#allocation2 + $0xf1] sm:$0xff] %vm1924_vm5, %v2300_v36  ;;  %4994 = vrot.lane.b32.xlu0 %v4993_v62, %s5564_s14  ;;  %4974 = vrot.lane.b32.xlu1 %v4973_v21, %s5564_s14  ;;  %v7718_v53 = vld [vmem:[#allocation2 + $0x98] sm:$0xff]  ;;  %v7730_v12 = vld [vmem:[#allocation2 + $0x40] sm:$0x3]  ;;  %v5013_v38 = vpack.i.bf16 %v7726_v39, %v7724_v14  ;;  %v2585_v33 = vrot.slane %v7655_v55, 2  ;;  %v2586_v3 = vrot.slane %v7645_v60, 2 }
 0x3c0   : > { %2375 = vst.msk [vmem:[#allocation2 + $0xf9] sm:$0xff] %vm1924_vm5, %v2301_v28  ;;  %4984 = vrot.lane.b32.xlu2 %v4983_v45, %s5564_s14  ;;  %v7685_v9 = vsel %vm570_vm1, %v2580_v63, %v2581_v40  ;;  %v5023_v47 = vpack.i.bf16 %v7718_v53, %v7716_v26  ;;  %v2583_v10 = vrot.slane %v7730_v12, 2  ;;  %v7755_v16 = vld [vmem:[#allocation2 + $0xa8] sm:$0xff]  ;;  %v2575_v0 = vrot.slane %v7663_v49, 2 }
 0x3c1   : > { %2376 = vst.msk [vmem:[#allocation2 + $0x109] sm:$0xff] %vm1924_vm5, %v2302_v8  ;;  %4400 = vmatmul.msk.f32.vlgmr.msrb.gmra.mxu2 %vm1924_vm5, %v7685_v9  ;;  %v7757_v5 = vld [vmem:[#allocation2 + $0xb0] sm:$0xff]  ;;  %v2576_v36 = vrot.slane %v7653_v35, 2  ;;  %v2578_v56 = vrot.slane %v2393_v6, 2  ;;  %v7771_v58 = vsel %vm570_vm1, %v2585_v33, %v2586_v3  ;;  %v2588_v57 = vrot.slane %v2399_v4, 2 }
 0x3c2   : > { %2377 = vst.msk [vmem:[#allocation2 + $0x111] sm:$0xff] %vm1924_vm5, %v2303_v13  ;;  %v7745_v34 = vsel %vm570_vm1, %v2581_v40, %v2583_v10  ;;  %v5028_v54 = vpack.i.bf16 %v7757_v5, %v7755_v16  ;;  %v7779_v8 = vld [vmem:[#allocation2 + $0xc0] sm:$0xff]  ;;  %v2495_v13 = vrot.slane %v7663_v49, 1  ;;  %v2496_v41 = vrot.slane %v7653_v35, 1  ;;  %v2405_v33 = vld [vmem:[#allocation2 + $0x88] sm:$0x3] }
 0x3c3   : > { %2378 = vst.msk [vmem:[#allocation2 + $0x121] sm:$0xff] %vm1924_vm5, %v2304_v19  ;;  %v2577_v28 = vsel %vm570_vm1, %v2575_v0, %v2576_v36  ;;  %v2579_v22 = vsel %vm570_vm1, %v2576_v36, %v2578_v56  ;;  %v7781_v52 = vld [vmem:[#allocation2 + $0xc8] sm:$0xff]  ;;  %v2498_v48 = vrot.slane %v2393_v6, 1  ;;  %v2589_v7 = vsel %vm570_vm1, %v2586_v3, %v2588_v57 }
 0x3c4   : > { %2379 = vst.msk [vmem:[#allocation2 + $0x129] sm:$0xff] %vm1924_vm5, %v2305_v59  ;;  %v5053_v2 = vpack.i.bf16 %v2579_v22, %v2577_v28  ;;  %v5043_v19 = vpack.i.bf16 %v7781_v52, %v7779_v8  ;;  %v2497_v31 = vsel %vm489_vm0, %v2495_v13, %v2496_v41  ;;  %v2590_v37 = vrot.slane %v7691_v30, 2  ;;  %v2408_v22 = vld [vmem:[#allocation2 + $0xa0] sm:$0x3] }
 0x3c5   : > { %2380 = vst.msk [vmem:[#allocation2 + $0x139] sm:$0xff] %vm1924_vm5, %v2306_v50  ;;  %v2499_v59 = vsel %vm489_vm0, %v2496_v41, %v2498_v48  ;;  %v2591_v20 = vrot.slane %v7693_v17, 2  ;;  %v2503_v43 = vrot.slane %v7730_v12, 1  ;;  %v2500_v15 = vrot.slane %v7668_v11, 1  ;;  %v7819_v12 = vld [vmem:[#allocation2 + $0xe0] sm:$0xff]  ;;  %v7858_v41 = vpop.permute.xlu2 %4964 }
 0x3c6   : > { %2381 = vst.msk [vmem:[#allocation2 + $0x141] sm:$0xff] %vm1924_vm5, %v2307_v46  ;;  %v5068_v50 = vpack.i.bf16 %v2499_v59, %v2497_v31  ;;  %v2501_v46 = vrot.slane %v7649_v32, 1  ;;  %v2595_v63 = vrot.slane %v7724_v14, 2  ;;  %v5083_v10 = vpack.i.bf16 %v7745_v34, %v7685_v9 }
 0x3c7   : > { %2382 = vst.msk [vmem:[#allocation2 + $0x151] sm:$0xff] %vm1924_vm5, %v2308_v42  ;;  %4999 = vrot.lane.b32.xlu0 %v4998_v1, %s5558_s23  ;;  %4979 = vrot.lane.b32.xlu1 %v4983_v45, %s5558_s23  ;;  %v2592_v18 = vsel %vm570_vm1, %v2590_v37, %v2591_v20  ;;  %v2402_v42 = vld [vmem:[#allocation2 + $0x70] sm:$0x3]  ;;  %v2598_v3 = vrot.slane %v2405_v33, 2  ;;  %v2600_v9 = vrot.slane %v7716_v26, 2  ;;  %v5128_v0 = vpack.i.bf16 %v2589_v7, %v7771_v58 }
 0x3c8   : > { %2383 = vst.msk [vmem:[#allocation2 + $0x159] sm:$0xff] %vm1924_vm5, %v2309_v23  ;;  %4989 = vrot.lane.b32.xlu2 %v4993_v62, %s5558_s23  ;;  %v2502_v25 = vsel %vm489_vm0, %v2500_v15, %v2501_v46  ;;  %v2504_v23 = vsel %vm489_vm0, %v2501_v46, %v2503_v43  ;;  %v2506_v62 = vrot.slane %v7645_v60, 1  ;;  %v7817_v60 = vld [vmem:[#allocation2 + $0xd8] sm:$0xff]  ;;  %v2513_v36 = vrot.slane %v2402_v42, 1 }
 0x3c9   : > { %2384 = vst.msk [vmem:[#allocation2 + $0x169] sm:$0xff] %vm1924_vm5, %v2310_v27  ;;  %4401 = vmatmul.msk.f32.gmra.mxu2 %vm1924_vm5, %v7745_v34  ;;  %v2593_v27 = vrot.slane %v2402_v42, 2  ;;  %v2601_v34 = vrot.slane %v7718_v53, 2  ;;  %v2510_v56 = vrot.slane %v7691_v30, 1  ;;  %v2605_v48 = vrot.slane %v7755_v16, 2 }
 0x3ca   : > { %2385 = vst.msk [vmem:[#allocation2 + $0x171] sm:$0xff] %vm1924_vm5, %v2311_v61  ;;  %v5078_v61 = vpack.i.bf16 %v2504_v23, %v2502_v25  ;;  %v2515_v31 = vrot.slane %v7724_v14, 1  ;;  %v2516_v59 = vrot.slane %v7726_v39, 1  ;;  %v3590_v14 = vld [vmem:[%s9379_s6 + $0x78] sm:$0xff]  ;;  %v2520_v25 = vrot.slane %v7716_v26, 1  ;;  %v3588_v26 = vld [vmem:[%s9379_s6 + $0x68] sm:$0xff] }
 0x3cb   : > { %2386 = vst.msk [vmem:[#allocation2 + $0x181] sm:$0xff] %vm1924_vm5, %v2312_v44  ;;  %v2508_v44 = vrot.slane %v2399_v4, 1  ;;  %v2594_v40 = vsel %vm570_vm1, %v2591_v20, %v2593_v27  ;;  %v2511_v4 = vrot.slane %v7693_v17, 1  ;;  %v7842_v28 = vsel %vm570_vm1, %v2600_v9, %v2601_v34  ;;  %v7872_v20 = vld [vmem:[#allocation2 + $0xb8] sm:$0x3]  ;;  %3657 = vmatpush.msrb.mxu3 %v3590_v14 }
 0x3cc   : > { %2387 = vst.msk [vmem:[#allocation2 + $0x189] sm:$0xff] %vm1924_vm5, %v2313_v29  ;;  %v2505_v29 = vrot.slane %v7655_v55, 1  ;;  %v5138_v13 = vpack.i.bf16 %v2594_v40, %v2592_v18  ;;  %v2608_v15 = vrot.slane %v7872_v20, 2  ;;  %v2521_v23 = vrot.slane %v7718_v53, 1 }
 0x3cd   : > { %v2509_v45 = vsel %vm489_vm0, %v2506_v62, %v2508_v44  ;;  %v2514_v57 = vsel %vm489_vm0, %v2511_v4, %v2513_v36  ;;  %v3582_v36 = vld [vmem:[%s9379_s6 + $0x38] sm:$0xff]  ;;  %v2526_v14 = vrot.slane %v7757_v5, 1 }
 0x3ce   : > { %v2507_v21 = vsel %vm489_vm0, %v2505_v29, %v2506_v62  ;;  %v2522_v53 = vsel %vm489_vm0, %v2520_v25, %v2521_v23  ;;  %v7902_v62 = vld [vmem:[#allocation2 + $0xf0] sm:$0xff] }
 0x3cf   : > { %5024 = vrot.lane.b32.xlu0 %v5023_v47, %s5564_s14  ;;  %5004 = vrot.lane.b32.xlu1 %v4998_v1, %s5564_s14  ;;  %v2596_v1 = vrot.slane %v7726_v39, 2  ;;  %v2517_v39 = vsel %vm489_vm0, %v2515_v31, %v2516_v59 }
 0x3d0   : > { %5014 = vrot.lane.b32.xlu2 %v5013_v38, %s5564_s14 }
 0x3d1   : > { %4402 = vmatmul.msk.f32.gmra.mxu2 %vm1924_vm5, %v7771_v58  ;;  %v2597_v6 = vsel %vm570_vm1, %v2595_v63, %v2596_v1  ;;  %v2512_v58 = vsel %vm489_vm0, %v2510_v56, %v2511_v4  ;;  %v2611_v63 = vrot.slane %v7781_v52, 2 }
 0x3d2   : > { %v5118_v30 = vpack.i.bf16 %v2514_v57, %v2512_v58  ;;  %v3581_v58 = vld [vmem:[%s9379_s6 + $0x30] sm:$0xff] }
 0x3d7   : > { %5029 = vrot.lane.b32.xlu0 %v5028_v54, %s5558_s23  ;;  %5009 = vrot.lane.b32.xlu1 %v5013_v38, %s5558_s23  ;;  %v5063_v38 = vpack.i.bf16 %v7819_v12, %v7817_v60 }
 0x3d8   : > { %5019 = vrot.lane.b32.xlu2 %v5023_v47, %s5558_s23  ;;  %v5088_v47 = vpack.i.bf16 %v2509_v45, %v2507_v21  ;;  %v3587_v21 = vld [vmem:[%s9379_s6 + $0x60] sm:$0xff]  ;;  %v2610_v45 = vrot.slane %v7779_v8, 2 }
 0x3d9   : > { %4403 = vmatmul.msk.f32.gmra.mxu2 %vm1924_vm5, %v2589_v7  ;;  %v2518_v7 = vrot.slane %v2405_v33, 1  ;;  %v7929_v33 = vld [vmem:[#allocation2 + $0xd0] sm:$0x3] }
 0x3df   : > { %5054 = vrot.lane.b32.xlu0 %v5053_v2, %s5565_s15  ;;  %5034 = vrot.lane.b32.xlu1 %v5028_v54, %s5564_s14  ;;  %v2599_v54 = vsel %vm570_vm1, %v2596_v1, %v2598_v3  ;;  %v3585_v3 = vld [vmem:[%s9379_s6 + $0x50] sm:$0xff] }
 0x3e0   : > { %5044 = vrot.lane.b32.xlu2 %v5043_v19, %s5564_s14  ;;  %v5163_v42 = vpack.i.bf16 %v2599_v54, %v2597_v6 }
 0x3e1   : > { %4404 = vmatmul.msk.f32.gmra.mxu2 %vm1924_vm5, %v2592_v18  ;;  %v2523_v18 = vrot.slane %v2408_v22, 1 }
 0x3e3   : > { %v2524_v44 = vsel %vm489_vm0, %v2521_v23, %v2523_v18  ;;  %v3576_v23 = vld [vmem:[%s9379_s6 + $0x8] sm:$0xff] }
 0x3e4   : > { %v7911_v1 = vpack.i.bf16 %v2524_v44, %v2522_v53 }
 0x3e7   : > { %5069 = vrot.lane.b32.xlu0 %v5068_v50, %s5563_s21  ;;  %5039 = vrot.lane.b32.xlu1 %v5043_v19, %s5558_s23  ;;  %v2606_v19 = vrot.slane %v7757_v5, 2  ;;  %v3577_v5 = vld [vmem:[%s9379_s6 + $0x10] sm:$0xff] }
 0x3e8   : > { %5049 = vrot.lane.b32.xlu2 %v5068_v50, %s5560_s25  ;;  %v2519_v50 = vsel %vm489_vm0, %v2516_v59, %v2518_v7  ;;  %v2528_v7 = vrot.slane %v7872_v20, 1  ;;  %v2525_v59 = vrot.slane %v7755_v16, 1  ;;  %v7994_v20 = vld [vmem:[#allocation2 + $0xe8] sm:$0x3] }
 0x3e9   : > { %4405 = vmatmul.msk.f32.gmra.mxu2 %vm1924_vm5, %v2594_v40  ;;  %v7866_v37 = vsel %vm570_vm1, %v2605_v48, %v2606_v19  ;;  %v5158_v46 = vpack.i.bf16 %v2519_v50, %v2517_v39  ;;  %v7886_v27 = vsel %vm570_vm1, %v2606_v19, %v2608_v15  ;;  %v7904_v40 = vld [vmem:[#allocation2 + $0xf8] sm:$0xff]  ;;  %v3580_v48 = vld [vmem:[%s9379_s6 + $0x28] sm:$0xff]  ;;  %v3579_v19 = vld [vmem:[%s9379_s6 + $0x20] sm:$0xff]  ;;  %v2618_v25 = vrot.slane %v7994_v20, 2 }
 0x3ea   : > { %v3578_v39 = vld [vmem:[%s9379_s6 + $0x18] sm:$0xff]  ;;  %v2527_v18 = vsel %vm489_vm0, %v2525_v59, %v2526_v14 }
 0x3ef   : > { %5079 = vrot.lane.b32.xlu0 %v5078_v61, %s5560_s25  ;;  %5074 = vrot.lane.b32.xlu1 %v5053_v2, %s5559_s24  ;;  %v2603_v2 = vrot.slane %v2408_v22, 2 }
 0x3f0   : > { %5059 = vrot.lane.b32.xlu2 %v5078_v61, %s5566_s16 }
 0x3f1   : > { %4406 = vmatmul.msk.f32.gmra.mxu2 %vm1924_vm5, %v2597_v6  ;;  %v7852_v17 = vsel %vm570_vm1, %v2601_v34, %v2603_v2  ;;  %v7923_v6 = vsel %vm570_vm1, %v2610_v45, %v2611_v63  ;;  %v3583_v34 = vld [vmem:[%s9379_s6 + $0x40] sm:$0xff]  ;;  %v7965_v2 = vld [vmem:[#allocation2 + $0x110] sm:$0xff]  ;;  %v2620_v45 = vrot.slane %v7902_v62, 2 }
 0x3f2   : > { %v5198_v56 = vpack.i.bf16 %v7852_v17, %v7842_v28 }
 0x3f7   : > { %5089 = vrot.lane.b32.xlu0 %v5088_v47, %s5566_s16  ;;  %5084 = vrot.lane.b32.xlu1 %v5083_v10, %s5565_s15 }
 0x3f8   : > { %5064 = vrot.lane.b32.xlu2 %v5063_v38, %s5558_s23 }
 0x3f9   : > { %4407 = vmatmul.msk.f32.gmra.mxu2 %vm1924_vm5, %v2599_v54  ;;  %v3584_v54 = vld [vmem:[%s9379_s6 + $0x48] sm:$0xff] }
 0x3ff   : > { %5094 = vrot.lane.b32.xlu0 %v5063_v38, %s5564_s14  ;;  %5099 = vrot.lane.b32.xlu1 %v5078_v61, %s5563_s21  ;;  %v3589_v61 = vld [vmem:[%s9379_s6 + $0x70] sm:$0xff]  ;;  %v7920_v38 = vpop.permute.xlu0 %4969 }
 0x400   : > { %5104 = vrot.lane.b32.xlu2 %v5083_v10, %s5559_s24  ;;  %3658 = vmatpush.msrb.mxu3 %v3589_v61  ;;  %v5178_v10 = vpack.i.bf16 %v7904_v40, %v7902_v62  ;;  %v5233_v61 = vpack.i.bf16 %v7886_v27, %v7866_v37 }
 0x401   : > { %4408 = vmatmul.msk.f32.gmra.mxu2 %vm1924_vm5, %v7842_v28 }
 0x402   : > { %3659 = vmatpush.msrb.mxu3 %v3588_v26  ;;  %v3575_v26 = vld [vmem:[%s9379_s6] sm:$0xff] }
 0x404   : > { %3660 = vmatpush.msrb.mxu3 %v3587_v21 }
 0x407   : > { %5129 = vrot.lane.b32.xlu0 %v5128_v0, %s5559_s24  ;;  %5109 = vrot.lane.b32.xlu1 %v5088_v47, %s5560_s25 }
 0x408   : > { %5114 = vrot.lane.b32.xlu2 %v5128_v0, %s5565_s15  ;;  %v2613_v0 = vrot.slane %v7929_v33, 2 }
 0x409   : > { %4409 = vmatmul.msk.f32.gmra.mxu2 %vm1924_vm5, %v7852_v17  ;;  %v7969_v17 = vld [vmem:[#allocation2 + $0x108] sm:$0xff] }
 0x40a   : > { %v7950_v4 = vsel %vm570_vm1, %v2611_v63, %v2613_v0  ;;  %v5213_v31 = vpack.i.bf16 %v7965_v2, %v7969_v17  ;;  %v2621_v63 = vrot.slane %v7904_v40, 2 }
 0x40f   : > { %5139 = vrot.lane.b32.xlu0 %v5138_v13, %s5565_s15  ;;  %5119 = vrot.lane.b32.xlu1 %v5118_v30, %s5566_s16 }
 0x410   : > { %5124 = vrot.lane.b32.xlu2 %v5088_v47, %s5563_s21  ;;  %v3586_v47 = vld [vmem:[%s9379_s6 + $0x58] sm:$0xff] }
 0x411   : > { %4410 = vmatmul.msk.f32.gmra.mxu2 %vm1924_vm5, %v7866_v37  ;;  %3661 = vmatpush.msrb.mxu3 %v3586_v47  ;;  %v2533_v47 = vrot.slane %v7929_v33, 1 }
 0x413   : > { %3662 = vmatpush.msrb.mxu3 %v3585_v3  ;;  %v2531_v3 = vrot.slane %v7781_v52, 1 }
 0x415   : > { %3663 = vmatpush.msrb.mxu3 %v3584_v54  ;;  %v8044_v54 = vld [vmem:[#allocation2 + $0x100] sm:$0x3]  ;;  %v2534_v0 = vsel %vm489_vm0, %v2531_v3, %v2533_v47 }
 0x417   : > { %5149 = vrot.lane.b32.xlu0 %v5118_v30, %s5563_s21  ;;  %5154 = vrot.lane.b32.xlu1 %v5138_v13, %s5559_s24  ;;  %v2615_v13 = vrot.slane %v7817_v60, 2 }
 0x418   : > { %5134 = vrot.lane.b32.xlu2 %v5118_v30, %s5560_s25  ;;  %3664 = vmatpush.msrb.mxu3 %v3583_v34  ;;  %v2616_v30 = vrot.slane %v7819_v12, 2 }
 0x419   : > { %4411 = vmatmul.msk.f32.gmra.mxu2 %vm1924_vm5, %v7886_v27 }
 0x41a   : > { %v7879_v43 = vpop.permute.xlu2 %4984  ;;  %3665 = vmatpush.msrb.mxu3 %v3582_v36  ;;  %v7987_v50 = vsel %vm570_vm1, %v2615_v13, %v2616_v30  ;;  %v8018_v44 = vsel %vm570_vm1, %v2616_v30, %v2618_v25  ;;  %v2536_v13 = vrot.slane %v7819_v12, 1  ;;  %v4971_v30 = vunpack.i.l.bf16 %v7920_v38 }
 0x41b   : > { %v2625_v12 = vrot.slane %v7969_v17, 2 }
 0x41c   : > { %3666 = vmatpush.msrb.mxu3 %v3581_v58  ;;  %v2535_v58 = vrot.slane %v7817_v60, 1 }
 0x41e   : > { %3667 = vmatpush.msrb.mxu3 %v3580_v48  ;;  %v2538_v48 = vrot.slane %v7994_v20, 1 }
 0x41f   : > { %5159 = vrot.lane.b32.xlu0 %v5158_v46, %s5560_s25  ;;  %5164 = vrot.lane.b32.xlu1 %v5163_v42, %s5565_s15 }
 0x420   : > { %5144 = vrot.lane.b32.xlu2 %v5158_v46, %s5566_s16  ;;  %3668 = vmatpush.msrb.mxu3 %v3579_v19 }
 0x421   : > { %4412 = vmatmul.msk.f32.gmra.mxu2 %vm1924_vm5, %v7923_v6 }
 0x422   : > { %v7900_v29 = vpop.permute.xlu2 %4989  ;;  %3669 = vmatpush.msrb.mxu3 %v3578_v39  ;;  %v4972_v39 = vunpack.i.h.bf16 %v7920_v38 }
 0x424   : > { %3670 = vmatpush.msrb.mxu3 %v3577_v5  ;;  %v2539_v5 = vsel %vm489_vm0, %v2536_v13, %v2538_v48 }
 0x426   : > { %3671 = vmatpush.msrb.mxu3 %v3576_v23 }
 0x427   : > { %5169 = vrot.lane.b32.xlu0 %v7911_v1, %s5566_s16  ;;  %5179 = vrot.lane.b32.xlu1 %v5178_v10, %s5564_s14 }
 0x428   : > { %5189 = vrot.lane.b32.xlu2 %v5163_v42, %s5559_s24  ;;  %v2529_v42 = vsel %vm489_vm0, %v2526_v14, %v2528_v7  ;;  %3672 = vmatpush.msrb.mxu3 %v3575_v26  ;;  %v4967_v7 = vunpack.i.h.bf16 %v7858_v41 }
 0x429   : > { %4413 = vmatmul.msk.f32.gmra.mxu2 %vm1924_vm5, %v7950_v4  ;;  %v5203_v53 = vpack.i.bf16 %v2529_v42, %v2527_v18  ;;  %v5524_v18 = vld [vmem:[#allocation2 + $0x8] sm:$0xff] }
 0x42a   : > { %v7937_v9 = vpop.permute.xlu2 %5014  ;;  %v3349_v42 = vsel %vm1924_vm5, %v5524_v18, %v4967_v7 }
 0x42f   : > { %5174 = vrot.lane.b32.xlu0 %v5178_v10, %s5558_s23  ;;  %5184 = vrot.lane.b32.xlu1 %v5158_v46, %s5563_s21  ;;  %v2530_v10 = vrot.slane %v7779_v8, 1  ;;  %v4966_v8 = vunpack.i.l.bf16 %v7858_v41  ;;  %v2537_v41 = vsel %vm489_vm0, %v2535_v58, %v2536_v13  ;;  %v5263_v58 = vpack.i.bf16 %v7950_v4, %v7923_v6 }
 0x430   : > { %5199 = vrot.lane.b32.xlu2 %v5198_v56, %s5565_s15 }
 0x431   : > { %v7956_v22 = vpop.permute.xlu0 %4994  ;;  %v7961_v57 = vpop.permute.xlu1 %4974  ;;  %4414 = vmatmul.msk.f32.gmra.mxu2 %vm1924_vm5, %v7987_v50  ;;  %v2532_v52 = vsel %vm489_vm0, %v2530_v10, %v2531_v3  ;;  %v2626_v10 = vrot.slane %v7965_v2, 2 }
 0x432   : > { %v7963_v28 = vpop.permute.xlu2 %5019  ;;  %v8060_v19 = vpack.i.bf16 %v2534_v0, %v2532_v52  ;;  %v4976_v59 = vunpack.i.l.bf16 %v7961_v57  ;;  %v4977_v25 = vunpack.i.h.bf16 %v7961_v57  ;;  %v8097_v52 = vld [vmem:[#allocation2 + $0x128] sm:$0xff]  ;;  %v3381_v0 = vsel %vm1285_vm2, %v3349_v42, %v4972_v39 }
 0x434   : > { %v3414_v13 = vsel %vm3412_vm13, %v3381_v0, %v4977_v25 }
 0x437   : > { %5224 = vrot.lane.b32.xlu0 %v5198_v56, %s5559_s24  ;;  %5194 = vrot.lane.b32.xlu1 %v7911_v1, %s5560_s25  ;;  %v2623_v56 = vrot.slane %v8044_v54, 2 }
 0x438   : > { %5214 = vrot.lane.b32.xlu2 %v5213_v31, %s5564_s14 }
 0x439   : > { %v7996_v16 = vpop.permute.xlu0 %4999  ;;  %v8001_v15 = vpop.permute.xlu1 %4979  ;;  %4415 = vmatmul.msk.f32.gmra.mxu2 %vm1924_vm5, %v8018_v44  ;;  %v8070_v60 = vsel %vm570_vm1, %v2621_v63, %v2623_v56  ;;  %v8100_v56 = vpack.i.bf16 %v2539_v5, %v2537_v41 }
 0x43a   : > { %v8003_v46 = vpop.permute.xlu2 %5044  ;;  %v4981_v26 = vunpack.i.l.bf16 %v8001_v15  ;;  %v4982_v4 = vunpack.i.h.bf16 %v8001_v15 }
 0x43f   : > { %5234 = vrot.lane.b32.xlu0 %v5233_v61, %s5565_s15  ;;  %5204 = vrot.lane.b32.xlu1 %v5203_v53, %s5566_s16 }
 0x440   : > { %5219 = vrot.lane.b32.xlu2 %v7911_v1, %s5563_s21  ;;  %v8038_v1 = vsel %vm570_vm1, %v2620_v45, %v2621_v63 }
 0x441   : > { %v8025_v37 = vpop.permute.xlu0 %5024  ;;  %v8027_v27 = vpop.permute.xlu1 %5004  ;;  %4416 = vmatmul.msk.f32.gmra.mxu2 %vm1924_vm5, %v8038_v1 }
 0x442   : > { %v8029_v21 = vpop.permute.xlu2 %5049 }
 0x443   : > { %v5051_v14 = vunpack.i.l.bf16 %v8029_v21 }
 0x447   : > { %5249 = vrot.lane.b32.xlu0 %v5203_v53, %s5563_s21  ;;  %5209 = vrot.lane.b32.xlu1 %v5213_v31, %s5558_s23  ;;  %v3348_v31 = vsel %vm1924_vm5, %v7481_v51, %v4966_v8  ;;  %v8095_v8 = vld [vmem:[#allocation2 + $0x120] sm:$0xff] }
 0x448   : > { %5229 = vrot.lane.b32.xlu2 %v5203_v53, %s5560_s25  ;;  %v3380_v51 = vsel %vm1285_vm2, %v3348_v31, %v4971_v30  ;;  %v5052_v53 = vunpack.i.h.bf16 %v8029_v21  ;;  %v5243_v7 = vpack.i.bf16 %v8097_v52, %v8095_v8  ;;  %v8113_v31 = vsel %vm570_vm1, %v2625_v12, %v2626_v10 }
 0x449   : > { %v8046_v34 = vpop.permute.xlu0 %5029  ;;  %v8049_v33 = vpop.permute.xlu1 %5009  ;;  %4417 = vmatmul.msk.f32.gmra.mxu2 %vm1924_vm5, %v8070_v60  ;;  %v3413_v23 = vsel %vm3412_vm13, %v3380_v51, %v4976_v59  ;;  %v8121_v59 = vld [vmem:[#allocation2 + $0x118] sm:$0x3] }
 0x44a   : > { %v8053_v36 = vpop.permute.xlu2 %5059  ;;  %v3445_v45 = vsel %vm1318_vm3, %v3413_v23, %v5051_v14  ;;  %v3446_v48 = vsel %vm1318_vm3, %v3414_v13, %v5052_v53  ;;  %v2630_v53 = vrot.slane %v8095_v8, 2  ;;  %v8156_v13 = vld [vmem:[#allocation2 + $0x130] sm:$0x3] }
 0x44b   : > { %v5061_v47 = vunpack.i.l.bf16 %v8053_v36  ;;  %v5062_v51 = vunpack.i.h.bf16 %v8053_v36 }
 0x44f   : > { %5259 = vrot.lane.b32.xlu0 %v8060_v19, %s5560_s25  ;;  %5254 = vrot.lane.b32.xlu1 %v5233_v61, %s5559_s24 }
 0x450   : > { %5239 = vrot.lane.b32.xlu2 %v8060_v19, %s5566_s16 }
 0x451   : > { %v5055_v20 = vpop.permute.xlu0 %5054  ;;  %v8085_v38 = vpop.permute.xlu1 %5034  ;;  %4418 = vmatmul.msk.f32.gmra.mxu2 %vm1924_vm5, %v8113_v31 }
 0x452   : > { %v5056_v61 = vunpack.i.l.bf16 %v5055_v20  ;;  %v8090_v63 = vpop.permute.xlu2 %5064  ;;  %v5057_v3 = vunpack.i.h.bf16 %v5055_v20  ;;  %v2628_v20 = vrot.slane %v8121_v59, 2 }
 0x454   : > { %v3478_v57 = vsel %vm3477_vm14, %v3445_v45, %v5056_v61  ;;  %v3479_v6 = vsel %vm3477_vm14, %v3446_v48, %v5057_v3  ;;  %v8133_v5 = vsel %vm570_vm1, %v2626_v10, %v2628_v20  ;;  %v2631_v45 = vrot.slane %v8097_v52, 2 }
 0x455   : > { %v3510_v21 = vsel %vm1351_vm4, %v3478_v57, %v4981_v26  ;;  %v3511_v12 = vsel %vm1351_vm4, %v3479_v6, %v4982_v4  ;;  %v4991_v20 = vunpack.i.l.bf16 %v7900_v29 }
 0x456   : > { %v3543_v30 = vsel %vm3542_vm15, %v3510_v21, %v5061_v47  ;;  %v3544_v15 = vsel %vm3542_vm15, %v3511_v12, %v5062_v51  ;;  %v2543_v47 = vrot.slane %v8044_v54, 1  ;;  %v4987_v21 = vunpack.i.h.bf16 %v7879_v43 }
 0x457   : > { %5269 = vrot.lane.b32.xlu0 %v8100_v56, %s5566_s16  ;;  %3673 = vmatmul.f32.vlgmr.msrb.gmra.mxu3 %v3543_v30  ;;  %v4992_v51 = vunpack.i.h.bf16 %v7900_v29 }
 0x458   : > { %5264 = vrot.lane.b32.xlu1 %v5263_v58, %s5565_s15  ;;  %5244 = vrot.lane.b32.xlu2 %v5243_v7, %s5558_s23 }
 0x459   : > { %v5070_v14 = vpop.permute.xlu0 %5069  ;;  %v8123_v41 = vpop.permute.xlu1 %5039  ;;  %4419 = vmatmul.msk.f32.gmra.mxu2 %vm1924_vm5, %v8133_v5 }
 0x45a   : > { %v8125_v39 = vpop.permute.xlu2 %5104  ;;  %v5072_v18 = vunpack.i.h.bf16 %v5070_v14  ;;  %v5071_v42 = vunpack.i.l.bf16 %v5070_v14 }
 0x45c   : > { %v3351_v10 = vsel %vm1924_vm5, %v7653_v35, %v5072_v18  ;;  %v3350_v3 = vsel %vm1924_vm5, %v7663_v49, %v5071_v42  ;;  %v8161_v35 = vsel %vm570_vm1, %v2630_v53, %v2631_v45  ;;  %v5318_v42 = vpack.i.bf16 %v8070_v60, %v8038_v1 }
 0x45d   : > { %v2548_v60 = vrot.slane %v8121_v59, 1 }
 0x45f   : > { %5274 = vrot.lane.b32.xlu0 %v5243_v7, %s5564_s14  ;;  %3676 = vmatmul.f32.gmra.mxu3 %v3544_v15 }
 0x460   : > { %5279 = vrot.lane.b32.xlu1 %v8060_v19, %s5563_s21  ;;  %5284 = vrot.lane.b32.xlu2 %v5263_v58, %s5559_s24  ;;  %v5308_v19 = vpack.i.bf16 %v8018_v44, %v7987_v50  ;;  %v4986_v58 = vunpack.i.l.bf16 %v7879_v43  ;;  %v2540_v50 = vrot.slane %v7902_v62, 1  ;;  %v2541_v44 = vrot.slane %v7904_v40, 1 }
 0x461   : > { %v5080_v36 = vpop.permute.xlu0 %5079  ;;  %v5075_v25 = vpop.permute.xlu1 %5074  ;;  %4420 = vmatmul.msk.f32.gmra.mxu2 %vm1924_vm5, %v8161_v35  ;;  %v2633_v40 = vrot.slane %v8156_v13, 2 }
 0x462   : > { %v5077_v23 = vunpack.i.h.bf16 %v5075_v25  ;;  %v5076_v61 = vunpack.i.l.bf16 %v5075_v25  ;;  %v8140_v26 = vpop.permute.xlu2 %5114  ;;  %v5082_v30 = vunpack.i.h.bf16 %v5080_v36  ;;  %v5081_v62 = vunpack.i.l.bf16 %v5080_v36 }
 0x463   : > { %v2542_v14 = vsel %vm489_vm0, %v2540_v50, %v2541_v44  ;;  %v2544_v12 = vsel %vm489_vm0, %v2541_v44, %v2543_v47  ;;  %v8187_v47 = vld [vmem:[#allocation2 + $0x138] sm:$0xff]  ;;  %v8192_v1 = vsel %vm570_vm1, %v2631_v45, %v2633_v40 }
 0x464   : > { %v3382_v57 = vsel %vm1285_vm2, %v3350_v3, %v5076_v61  ;;  %v3383_v0 = vsel %vm1285_vm2, %v3351_v10, %v5077_v23  ;;  %v5298_v61 = vpack.i.bf16 %v2544_v12, %v2542_v14  ;;  %v8189_v10 = vld [vmem:[#allocation2 + $0x140] sm:$0xff]  ;;  %v2635_v45 = vrot.slane %v8187_v47, 2 }
 0x465   : > { %v3415_v49 = vsel %vm3412_vm13, %v3382_v57, %v4986_v58  ;;  %v3416_v43 = vsel %vm3412_vm13, %v3383_v0, %v4987_v21  ;;  %v2545_v57 = vrot.slane %v7969_v17, 1  ;;  %v2546_v0 = vrot.slane %v7965_v2, 1 }
 0x466   : > { %v3447_v15 = vsel %vm1318_vm3, %v3415_v49, %v5081_v62  ;;  %v3448_v18 = vsel %vm1318_vm3, %v3416_v43, %v5082_v30  ;;  %v2636_v21 = vrot.slane %v8189_v10, 2  ;;  %v8208_v49 = vld [vmem:[#allocation2 + $0x148] sm:$0x3]  ;;  %v2553_v43 = vrot.slane %v8156_v13, 1 }
 0x467   : > { %5309 = vrot.lane.b32.xlu0 %v5308_v19, %s5559_s24  ;;  %v2547_v2 = vsel %vm489_vm0, %v2545_v57, %v2546_v0  ;;  %v2549_v30 = vsel %vm489_vm0, %v2546_v0, %v2548_v60  ;;  %v4997_v12 = vunpack.i.h.bf16 %v7956_v22  ;;  %v5525_v57 = vld [vmem:[#allocation2 + $0x50] sm:$0xff] }
 0x468   : > { %5289 = vrot.lane.b32.xlu1 %v8100_v56, %s5560_s25  ;;  %5294 = vrot.lane.b32.xlu2 %v5308_v19, %s5565_s15  ;;  %v8218_v62 = vsel %vm570_vm1, %v2635_v45, %v2636_v21  ;;  %v8231_v14 = vpack.i.bf16 %v2549_v30, %v2547_v2  ;;  %v8262_v2 = vpop.f32.mrf.mxu2 }
 0x469   : > { %v5090_v54 = vpop.permute.xlu0 %5089  ;;  %v5085_v48 = vpop.permute.xlu1 %5084  ;;  %4421 = vmatmul.msk.f32.gmra.mxu2 %vm1924_vm5, %v8192_v1 }
 0x46a   : > { %v5087_v7 = vunpack.i.h.bf16 %v5085_v48  ;;  %v5086_v6 = vunpack.i.l.bf16 %v5085_v48  ;;  %v8171_v4 = vpop.permute.xlu2 %5124  ;;  %v5091_v36 = vunpack.i.l.bf16 %v5090_v54  ;;  %v5092_v17 = vunpack.i.h.bf16 %v5090_v54 }
 0x46c   : > { %v3480_v25 = vsel %vm3477_vm14, %v3447_v15, %v5086_v6  ;;  %v3481_v23 = vsel %vm3477_vm14, %v3448_v18, %v5087_v7  ;;  %v2638_v7 = vrot.slane %v8208_v49, 2  ;;  %v5126_v6 = vunpack.i.l.bf16 %v8171_v4 }
 0x46d   : > { %v3512_v53 = vsel %vm1351_vm4, %v3480_v25, %v4991_v20  ;;  %v3513_v19 = vsel %vm1351_vm4, %v3481_v23, %v4992_v51  ;;  %v5127_v51 = vunpack.i.h.bf16 %v8171_v4  ;;  %v4996_v18 = vunpack.i.l.bf16 %v7956_v22 }
 0x46e   : > { %v3545_v29 = vsel %vm3542_vm15, %v3512_v53, %v5091_v36  ;;  %v3546_v54 = vsel %vm3542_vm15, %v3513_v19, %v5092_v17  ;;  %v5001_v25 = vunpack.i.l.bf16 %v7996_v16  ;;  %v5117_v4 = vunpack.i.h.bf16 %v8140_v26 }
 0x46f   : > { %5319 = vrot.lane.b32.xlu0 %v5318_v42, %s5565_s15  ;;  %3679 = vmatmul.f32.gmra.mxu3 %v3545_v29  ;;  %v5116_v29 = vunpack.i.l.bf16 %v8140_v26  ;;  %v3355_v0 = vsel %vm1924_vm5, %v5525_v57, %v5127_v51  ;;  %v5007_v17 = vunpack.i.h.bf16 %v8027_v27 }
 0x470   : > { %5299 = vrot.lane.b32.xlu1 %v5298_v61, %s5566_s16  ;;  %5304 = vrot.lane.b32.xlu2 %v8100_v56, %s5563_s21  ;;  %v8212_v56 = vpack.i.bf16 %v8133_v5, %v8113_v31  ;;  %v5107_v31 = vunpack.i.h.bf16 %v8125_v39  ;;  %v5106_v5 = vunpack.i.l.bf16 %v8125_v39 }
 0x471   : > { %v8200_v3 = vpop.permute.xlu0 %5094  ;;  %v5100_v58 = vpop.permute.xlu1 %5099  ;;  %4422 = vmatmul.msk.f32.gmra.mxu2 %vm1924_vm5, %v8218_v62 }
 0x472   : > { %v5102_v50 = vunpack.i.h.bf16 %v5100_v58  ;;  %v5101_v44 = vunpack.i.l.bf16 %v5100_v58  ;;  %v8206_v59 = vpop.permute.xlu2 %5134 }
 0x474   : > { %v3353_v40 = vsel %vm1924_vm5, %v7649_v32, %v5102_v50  ;;  %v3352_v48 = vsel %vm1924_vm5, %v7668_v11, %v5101_v44  ;;  %v2550_v32 = vrot.slane %v8095_v8, 1  ;;  %v2551_v11 = vrot.slane %v8097_v52, 1 }
 0x475   : > { %v3384_v39 = vsel %vm1285_vm2, %v3352_v48, %v5106_v5  ;;  %v3385_v20 = vsel %vm1285_vm2, %v3353_v40, %v5107_v31  ;;  %v5002_v8 = vunpack.i.h.bf16 %v7996_v16  ;;  %v5006_v50 = vunpack.i.l.bf16 %v8027_v27  ;;  %v8274_v5 = vld [vmem:[#allocation2 + $0x150] sm:$0xff] }
 0x476   : > { %v3417_v22 = vsel %vm3412_vm13, %v3384_v39, %v4996_v18  ;;  %v3418_v60 = vsel %vm3412_vm13, %v3385_v20, %v4997_v12  ;;  %v8269_v48 = vsel %vm570_vm1, %v2636_v21, %v2638_v7  ;;  %v5136_v27 = vunpack.i.l.bf16 %v8206_v59 }
 0x477   : > { %5329 = vrot.lane.b32.xlu0 %v5298_v61, %s5563_s21  ;;  %3682 = vmatmul.f32.gmra.mxu3 %v3546_v54  ;;  %v2552_v7 = vsel %vm489_vm0, %v2550_v32, %v2551_v11  ;;  %v5137_v12 = vunpack.i.h.bf16 %v8206_v59  ;;  %v5011_v18 = vunpack.i.l.bf16 %v8049_v33  ;;  %v5012_v32 = vunpack.i.h.bf16 %v8049_v33 }
 0x478   : > { %5334 = vrot.lane.b32.xlu1 %v5318_v42, %s5559_s24  ;;  %5314 = vrot.lane.b32.xlu2 %v5298_v61, %s5560_s25  ;;  %v3354_v61 = vsel %vm1924_vm5, %v7655_v55, %v5126_v6  ;;  %v8282_v6 = vld [vmem:[#allocation2 + $0x158] sm:$0xff] }
 0x479   : > { %v5130_v15 = vpop.permute.xlu0 %5129  ;;  %v5110_v42 = vpop.permute.xlu1 %5109  ;;  %4423 = vmatmul.msk.f32.gmra.mxu2 %vm1924_vm5, %v8269_v48  ;;  %v2641_v59 = vrot.slane %v8282_v6, 2 }
 0x47a   : > { %v5132_v52 = vunpack.i.h.bf16 %v5130_v15  ;;  %v5131_v36 = vunpack.i.l.bf16 %v5130_v15  ;;  %v5112_v23 = vunpack.i.h.bf16 %v5110_v42  ;;  %v5111_v53 = vunpack.i.l.bf16 %v5110_v42  ;;  %v8246_v19 = vpop.permute.xlu2 %5144 }
 0x47b   : > { %v2554_v15 = vsel %vm489_vm0, %v2551_v11, %v2553_v43 }
 0x47c   : > { %v3449_v16 = vsel %vm1318_vm3, %v3417_v22, %v5111_v53  ;;  %v3450_v45 = vsel %vm1318_vm3, %v3418_v60, %v5112_v23  ;;  %v3386_v58 = vsel %vm1285_vm2, %v3354_v61, %v5131_v36  ;;  %v3387_v26 = vsel %vm1285_vm2, %v3355_v0, %v5132_v52  ;;  %v8314_v61 = vpop.f32.mrf.mxu2  ;;  %v8320_v60 = vld [vmem:[#allocation2 + $0x160] sm:$0x3] }
 0x47d   : > { %v3482_v44 = vsel %vm3477_vm14, %v3449_v16, %v5116_v29  ;;  %v3483_v55 = vsel %vm3477_vm14, %v3450_v45, %v5117_v4  ;;  %v3419_v31 = vsel %vm3412_vm13, %v3386_v58, %v5006_v50  ;;  %v3420_v54 = vsel %vm3412_vm13, %v3387_v26, %v5007_v17 }
 0x47e   : > { %v3514_v30 = vsel %vm1351_vm4, %v3482_v44, %v5001_v25  ;;  %v3515_v40 = vsel %vm1351_vm4, %v3483_v55, %v5002_v8  ;;  %v2640_v8 = vrot.slane %v8274_v5, 2  ;;  %v3451_v36 = vsel %vm1318_vm3, %v3419_v31, %v5136_v27  ;;  %v5526_v55 = vld [vmem:[#allocation2 + $0x68] sm:$0xff] }
 0x47f   : > { %5339 = vrot.lane.b32.xlu0 %v8231_v14, %s5560_s25  ;;  %v3452_v4 = vsel %vm1318_vm3, %v3420_v54, %v5137_v12  ;;  %v8299_v43 = vpack.i.bf16 %v2554_v15, %v2552_v7  ;;  %v5358_v53 = vpack.i.bf16 %v8189_v10, %v8187_v47  ;;  %v2643_v50 = vrot.slane %v8320_v60, 2  ;;  %v8328_v27 = vld [vmem:[#allocation2 + $0x168] sm:$0xff] }
 0x480   : > { %5344 = vrot.lane.b32.xlu1 %v8212_v56, %s5565_s15  ;;  %5324 = vrot.lane.b32.xlu2 %v8231_v14, %s5566_s16  ;;  %v8311_v29 = vsel %vm570_vm1, %v2640_v8, %v2641_v59  ;;  %v5378_v54 = vpack.i.bf16 %v8192_v1, %v8161_v35  ;;  %v2645_v35 = vrot.slane %v8328_v27, 2 }
 0x481   : > { %v5140_v21 = vpop.permute.xlu0 %5139  ;;  %v5120_v51 = vpop.permute.xlu1 %5119  ;;  %4424 = vmatmul.msk.f32.gmra.mxu2 %vm1924_vm5, %v8311_v29  ;;  %v8336_v7 = vsel %vm570_vm1, %v2641_v59, %v2643_v50  ;;  %v2558_v50 = vrot.slane %v8208_v49, 1  ;;  %v8381_v49 = vld [vmem:[#allocation2 + $0x178] sm:$0x3] }
 0x482   : > { %v5142_v39 = vunpack.i.h.bf16 %v5140_v21  ;;  %v5141_v20 = vunpack.i.l.bf16 %v5140_v21  ;;  %v5121_v42 = vunpack.i.l.bf16 %v5120_v51  ;;  %v8291_v52 = vpop.permute.xlu2 %5189  ;;  %v5122_v22 = vunpack.i.h.bf16 %v5120_v51  ;;  %v8333_v21 = vld [vmem:[#allocation2 + $0x170] sm:$0xff] }
 0x483   : > { %v2646_v15 = vrot.slane %v8333_v21, 2 }
 0x484   : > { %v3484_v25 = vsel %vm3477_vm14, %v3451_v36, %v5141_v20  ;;  %v3547_v13 = vsel %vm3542_vm15, %v3514_v30, %v5121_v42  ;;  %v3485_v23 = vsel %vm3477_vm14, %v3452_v4, %v5142_v39  ;;  %v5527_v30 = vld [vmem:[#allocation2 + $0x60] sm:$0xff]  ;;  %v5016_v39 = vunpack.i.l.bf16 %v7937_v9 }
 0x485   : > { %v3516_v11 = vsel %vm1351_vm4, %v3484_v25, %v5011_v18  ;;  %3685 = vmatmul.f32.gmra.mxu3 %v3547_v13  ;;  %v8306_v33 = vsel %vm1351_vm4, %v3485_v23, %v5012_v32  ;;  %v5146_v20 = vunpack.i.l.bf16 %v8246_v19  ;;  %v5022_v4 = vunpack.i.h.bf16 %v7963_v28 }
 0x486   : > { %v5021_v13 = vunpack.i.l.bf16 %v7963_v28  ;;  %v5393_v28 = vpack.i.bf16 %v8282_v6, %v8274_v5 }
 0x487   : > { %5349 = vrot.lane.b32.xlu0 %v8299_v43, %s5566_s16 }
 0x488   : > { %5359 = vrot.lane.b32.xlu1 %v5358_v53, %s5564_s14  ;;  %5369 = vrot.lane.b32.xlu2 %v8212_v56, %s5559_s24  ;;  %v3548_v56 = vsel %vm3542_vm15, %v3515_v40, %v5122_v22  ;;  %v5017_v40 = vunpack.i.h.bf16 %v7937_v9  ;;  %v3549_v22 = vsel %vm3542_vm15, %v3516_v11, %v5146_v20  ;;  %v2556_v11 = vrot.slane %v8189_v10, 1 }
 0x489   : > { %v5150_v57 = vpop.permute.xlu0 %5149  ;;  %v5155_v0 = vpop.permute.xlu1 %5154  ;;  %4425 = vmatmul.msk.f32.gmra.mxu2 %vm1924_vm5, %v8336_v7 }
 0x48a   : > { %v5152_v16 = vunpack.i.h.bf16 %v5150_v57  ;;  %v5151_v45 = vunpack.i.l.bf16 %v5150_v57  ;;  %v8322_v58 = vpop.permute.xlu2 %5199  ;;  %v5157_v26 = vunpack.i.h.bf16 %v5155_v0  ;;  %v5156_v44 = vunpack.i.l.bf16 %v5155_v0 }
 0x48c   : > { %v3357_v17 = vsel %vm1924_vm5, %v5526_v55, %v5152_v16  ;;  %v3356_v31 = vsel %vm1924_vm5, %v5527_v30, %v5151_v45 }
 0x48d   : > { %3688 = vmatmul.f32.gmra.mxu3 %v3548_v56  ;;  %v3389_v12 = vsel %vm1285_vm2, %v3357_v17, %v5157_v26  ;;  %v3388_v51 = vsel %vm1285_vm2, %v3356_v31, %v5156_v44  ;;  %v2555_v26 = vrot.slane %v8187_v47, 1  ;;  %v8374_v44 = vsel %vm570_vm1, %v2645_v35, %v2646_v15 }
 0x48e   : > { %v3421_v9 = vsel %vm3412_vm13, %v3388_v51, %v5016_v39  ;;  %v3422_v59 = vsel %vm3412_vm13, %v3389_v12, %v5017_v40  ;;  %v5147_v47 = vunpack.i.h.bf16 %v8246_v19  ;;  %v2559_v31 = vsel %vm489_vm0, %v2556_v11, %v2558_v50  ;;  %v8401_v40 = vld [vmem:[#allocation2 + $0x180] sm:$0xff]  ;;  %v8403_v19 = vld [vmem:[#allocation2 + $0x188] sm:$0xff] }
 0x48f   : > { %5354 = vrot.lane.b32.xlu0 %v5358_v53, %s5558_s23  ;;  %v2557_v30 = vsel %vm489_vm0, %v2555_v26, %v2556_v11  ;;  %v2648_v56 = vrot.slane %v8381_v49, 2  ;;  %v8397_v12 = vpack.i.bf16 %v8269_v48, %v8218_v62  ;;  %v2658_v62 = vrot.slane %v8401_v40, 2 }
 0x490   : > { %5364 = vrot.lane.b32.xlu1 %v8231_v14, %s5563_s21  ;;  %5379 = vrot.lane.b32.xlu2 %v5378_v54, %s5565_s15  ;;  %v8350_v14 = vpop.f32.mrf.mxu2  ;;  %v3550_v51 = vsel %vm3542_vm15, %v8306_v33, %v5147_v47  ;;  %v5383_v39 = vpack.i.bf16 %v2559_v31, %v2557_v30  ;;  %v2659_v48 = vrot.slane %v8403_v19, 2  ;;  %v2563_v33 = vrot.slane %v8320_v60, 1  ;;  %v8425_v60 = vld [vmem:[#allocation2 + $0x190] sm:$0x3] }
 0x491   : > { %v5160_v1 = vpop.permute.xlu0 %5159  ;;  %v5165_v18 = vpop.permute.xlu1 %5164  ;;  %4426 = vmatmul.msk.f32.gmra.mxu2 %vm1924_vm5, %v8374_v44  ;;  %v8408_v35 = vsel %vm570_vm1, %v2646_v15, %v2648_v56  ;;  %v2560_v15 = vrot.slane %v8274_v5, 1  ;;  %v5191_v50 = vunpack.i.l.bf16 %v8291_v52  ;;  %v2566_v26 = vrot.slane %v8333_v21, 1 }
 0x492   : > { %v5162_v8 = vunpack.i.h.bf16 %v5160_v1  ;;  %v5161_v42 = vunpack.i.l.bf16 %v5160_v1  ;;  %v5167_v36 = vunpack.i.h.bf16 %v5165_v18  ;;  %v5166_v32 = vunpack.i.l.bf16 %v5165_v18  ;;  %v8354_v25 = vpop.permute.xlu2 %5214 }
 0x493   : > { %v2561_v18 = vrot.slane %v8282_v6, 1  ;;  %v5027_v11 = vunpack.i.h.bf16 %v8025_v37  ;;  %v5026_v56 = vunpack.i.l.bf16 %v8025_v37  ;;  %v5202_v37 = vunpack.i.h.bf16 %v8322_v58 }
 0x494   : > { %v3453_v23 = vsel %vm1318_vm3, %v3421_v9, %v5161_v42  ;;  %v3454_v53 = vsel %vm1318_vm3, %v3422_v59, %v5162_v8  ;;  %v2568_v9 = vrot.slane %v8381_v49, 1  ;;  %v8431_v59 = vsel %vm570_vm1, %v2658_v62, %v2659_v48 }
 0x495   : > { %v3486_v57 = vsel %vm3477_vm14, %v3453_v23, %v5166_v32  ;;  %v3487_v0 = vsel %vm3477_vm14, %v3454_v53, %v5167_v36  ;;  %3691 = vmatmul.f32.gmra.mxu3 %v3549_v22  ;;  %v2562_v5 = vsel %vm489_vm0, %v2560_v15, %v2561_v18  ;;  %v2564_v6 = vsel %vm489_vm0, %v2561_v18, %v2563_v33  ;;  %v5529_v23 = vld [vmem:[#allocation2 + $0x78] sm:$0xff] }
 0x496   : > { %v3518_v16 = vsel %vm1351_vm4, %v3486_v57, %v5021_v13  ;;  %v8365_v45 = vsel %vm1351_vm4, %v3487_v0, %v5022_v4  ;;  %v5528_v4 = vld [vmem:[#allocation2 + $0x80] sm:$0xff]  ;;  %v2661_v22 = vrot.slane %v8425_v60, 2  ;;  %v5192_v0 = vunpack.i.h.bf16 %v8291_v52 }
 0x497   : > { %5404 = vrot.lane.b32.xlu0 %v5378_v54, %s5559_s24  ;;  %v8450_v31 = vpack.i.bf16 %v2564_v6, %v2562_v5  ;;  %v5032_v33 = vunpack.i.h.bf16 %v8046_v34 }
 0x498   : > { %5374 = vrot.lane.b32.xlu1 %v8299_v43, %s5560_s25  ;;  %5394 = vrot.lane.b32.xlu2 %v5393_v28, %s5564_s14  ;;  %v8393_v54 = vpop.f32.mrf.mxu2 }
 0x499   : > { %v8383_v55 = vpop.permute.xlu0 %5169  ;;  %v8385_v17 = vpop.permute.xlu1 %5179  ;;  %4427 = vmatmul.msk.f32.gmra.mxu2 %vm1924_vm5, %v8408_v35 }
 0x49a   : > { %v8388_v10 = vpop.permute.xlu2 %5219  ;;  %v5171_v1 = vunpack.i.l.bf16 %v8383_v55  ;;  %v5172_v47 = vunpack.i.h.bf16 %v8383_v55 }
 0x49b   : > { %v5221_v30 = vunpack.i.l.bf16 %v8388_v10  ;;  %v5222_v52 = vunpack.i.h.bf16 %v8388_v10  ;;  %v5201_v10 = vunpack.i.l.bf16 %v8322_v58 }
 0x49d   : > { %3694 = vmatmul.f32.gmra.mxu3 %v3550_v51 }
 0x49f   : > { %5414 = vrot.lane.b32.xlu0 %v8397_v12, %s5565_s15 }
 0x4a0   : > { %5384 = vrot.lane.b32.xlu1 %v5383_v39, %s5566_s16  ;;  %5399 = vrot.lane.b32.xlu2 %v8299_v43, %s5563_s21  ;;  %v3551_v43 = vsel %vm3542_vm15, %v3518_v16, %v5171_v1  ;;  %v8439_v57 = vpop.f32.mrf.mxu2  ;;  %v2565_v16 = vrot.slane %v8328_v27, 1 }
 0x4a1   : > { %v8419_v20 = vpop.permute.xlu0 %5174  ;;  %v5185_v8 = vpop.permute.xlu1 %5184  ;;  %4428 = vmatmul.msk.f32.gmra.mxu2 %vm1924_vm5, %v8431_v59 }
 0x4a2   : > { %v5187_v42 = vunpack.i.h.bf16 %v5185_v8  ;;  %v5186_v36 = vunpack.i.l.bf16 %v5185_v8  ;;  %v8423_v32 = vpop.permute.xlu2 %5229 }
 0x4a4   : > { %v3359_v13 = vsel %vm1924_vm5, %v5528_v4, %v5187_v42  ;;  %v3358_v53 = vsel %vm1924_vm5, %v5529_v23, %v5186_v36  ;;  %v5531_v4 = vld [vmem:[#allocation2 + $0x98] sm:$0xff] }
 0x4a5   : > { %3697 = vmatmul.f32.gmra.mxu3 %v3551_v43  ;;  %v3390_v51 = vsel %vm1285_vm2, %v3358_v53, %v5191_v50  ;;  %v3391_v62 = vsel %vm1285_vm2, %v3359_v13, %v5192_v0  ;;  %v5530_v43 = vld [vmem:[#allocation2 + $0x90] sm:$0xff]  ;;  %v3361_v13 = vsel %vm1924_vm5, %v5531_v4, %v5222_v52  ;;  %v5036_v0 = vunpack.i.l.bf16 %v8085_v38 }
 0x4a6   : > { %v3360_v5 = vsel %vm1924_vm5, %v5530_v43, %v5221_v30  ;;  %v3424_v6 = vsel %vm3412_vm13, %v3391_v62, %v5027_v11  ;;  %v8486_v52 = vsel %vm570_vm1, %v2659_v48, %v2661_v22  ;;  %v2567_v48 = vsel %vm489_vm0, %v2565_v16, %v2566_v26 }
 0x4a7   : > { %5429 = vrot.lane.b32.xlu0 %v5383_v39, %s5563_s21  ;;  %v5232_v22 = vunpack.i.h.bf16 %v8423_v32 }
 0x4a8   : > { %5389 = vrot.lane.b32.xlu1 %v5393_v28, %s5558_s23  ;;  %5409 = vrot.lane.b32.xlu2 %v5383_v39, %s5560_s25  ;;  %v5031_v28 = vunpack.i.l.bf16 %v8046_v34  ;;  %v3423_v39 = vsel %vm3412_vm13, %v3390_v51, %v5026_v56  ;;  %v3552_v34 = vsel %vm3542_vm15, %v8365_v45, %v5172_v47  ;;  %v5037_v45 = vunpack.i.h.bf16 %v8085_v38  ;;  %v8491_v62 = vpop.f32.mrf.mxu2 }
 0x4a9   : > { %v5225_v55 = vpop.permute.xlu0 %5224  ;;  %v5195_v1 = vpop.permute.xlu1 %5194  ;;  %v5231_v38 = vunpack.i.l.bf16 %v8423_v32  ;;  %4429 = vmatmul.msk.f32.gmra.mxu2 %vm1924_vm5, %v8486_v52 }
 0x4aa   : > { %v5227_v15 = vunpack.i.h.bf16 %v5225_v55  ;;  %v5226_v18 = vunpack.i.l.bf16 %v5225_v55  ;;  %v5197_v8 = vunpack.i.h.bf16 %v5195_v1  ;;  %v5196_v42 = vunpack.i.l.bf16 %v5195_v1  ;;  %v8463_v36 = vpop.permute.xlu2 %5239 }
 0x4ac   : > { %v3455_v23 = vsel %vm1318_vm3, %v3423_v39, %v5196_v42  ;;  %v3456_v58 = vsel %vm1318_vm3, %v3424_v6, %v5197_v8  ;;  %v3392_v53 = vsel %vm1285_vm2, %v3360_v5, %v5226_v18  ;;  %v3393_v50 = vsel %vm1285_vm2, %v3361_v13, %v5227_v15 }
 0x4ad   : > { %3700 = vmatmul.f32.gmra.mxu3 %v3552_v34  ;;  %v3488_v30 = vsel %vm3477_vm14, %v3455_v23, %v5201_v10  ;;  %v3489_v11 = vsel %vm3477_vm14, %v3456_v58, %v5202_v37  ;;  %v3425_v51 = vsel %vm3412_vm13, %v3392_v53, %v5036_v0  ;;  %v3426_v55 = vsel %vm3412_vm13, %v3393_v50, %v5037_v45 }
 0x4ae   : > { %v3520_v47 = vsel %vm1351_vm4, %v3488_v30, %v5031_v28  ;;  %v3521_v56 = vsel %vm1351_vm4, %v3489_v11, %v5032_v33  ;;  %v2569_v15 = vsel %vm489_vm0, %v2566_v26, %v2568_v9  ;;  %v5041_v18 = vunpack.i.l.bf16 %v8123_v41  ;;  %v5532_v11 = vld [vmem:[#allocation2 + $0xb0] sm:$0xff] }
 0x4af   : > { %5439 = vrot.lane.b32.xlu0 %v8450_v31, %s5560_s25  ;;  %v3457_v8 = vsel %vm1318_vm3, %v3425_v51, %v5231_v38  ;;  %v5042_v42 = vunpack.i.h.bf16 %v8123_v41  ;;  %v3458_v32 = vsel %vm1318_vm3, %v3426_v55, %v5232_v22  ;;  %v8512_v5 = vpack.i.bf16 %v2569_v15, %v2567_v48 }
 0x4b0   : > { %5434 = vrot.lane.b32.xlu1 %v8397_v12, %s5559_s24  ;;  %5419 = vrot.lane.b32.xlu2 %v8450_v31, %s5566_s16  ;;  %v5443_v26 = vpack.i.bf16 %v8336_v7, %v8311_v29  ;;  %v5423_v41 = vpack.i.bf16 %v8333_v21, %v8328_v27  ;;  %v5241_v58 = vunpack.i.l.bf16 %v8463_v36  ;;  %v5458_v30 = vpack.i.bf16 %v8403_v19, %v8401_v40 }
 0x4b1   : > { %v5235_v33 = vpop.permute.xlu0 %5234  ;;  %v5205_v28 = vpop.permute.xlu1 %5204  ;;  %v2653_v51 = vrot.slane %v8401_v40, 1  ;;  %v5047_v48 = vunpack.i.h.bf16 %v8003_v46  ;;  %v5046_v22 = vunpack.i.l.bf16 %v8003_v46 }
 0x4b2   : > { %v5237_v1 = vunpack.i.h.bf16 %v5235_v33  ;;  %v5236_v12 = vunpack.i.l.bf16 %v5235_v33  ;;  %v5206_v37 = vunpack.i.l.bf16 %v5205_v28  ;;  %v8505_v10 = vpop.permute.xlu2 %5244  ;;  %v5207_v6 = vunpack.i.h.bf16 %v5205_v28 }
 0x4b3   : > { %v2654_v33 = vrot.slane %v8403_v19, 1  ;;  %v5478_v28 = vpack.i.bf16 %v8408_v35, %v8374_v44  ;;  %v5242_v35 = vunpack.i.h.bf16 %v8463_v36 }
 0x4b4   : > { %v3490_v16 = vsel %vm3477_vm14, %v3457_v8, %v5236_v12  ;;  %v3553_v43 = vsel %vm3542_vm15, %v3520_v47, %v5206_v37  ;;  %v3491_v9 = vsel %vm3477_vm14, %v3458_v32, %v5237_v1  ;;  %v3554_v29 = vsel %vm3542_vm15, %v3521_v56, %v5207_v6  ;;  %v5533_v47 = vld [vmem:[#allocation2 + $0xa8] sm:$0xff] }
 0x4b5   : > { %v3522_v49 = vsel %vm1351_vm4, %v3490_v16, %v5041_v18  ;;  %3703 = vmatmul.f32.gmra.mxu3 %v3553_v43  ;;  %v3523_v39 = vsel %vm1351_vm4, %v3491_v9, %v5042_v42  ;;  %v2656_v1 = vrot.slane %v8425_v60, 1  ;;  %v2655_v44 = vsel %vm489_vm0, %v2653_v51, %v2654_v33 }
 0x4b6   : > { %v3555_v56 = vsel %vm3542_vm15, %v3522_v49, %v5241_v58  ;;  %v5067_v16 = vunpack.i.h.bf16 %v8090_v63  ;;  %v5066_v32 = vunpack.i.l.bf16 %v8090_v63  ;;  %v3556_v9 = vsel %vm3542_vm15, %v3523_v39, %v5242_v35  ;;  %v5534_v58 = vld [vmem:[#allocation2 + $0xc8] sm:$0xff] }
 0x4b7   : > { %5449 = vrot.lane.b32.xlu0 %v8512_v5, %s5566_s16  ;;  %v2657_v42 = vsel %vm489_vm0, %v2654_v33, %v2656_v1  ;;  %v5097_v51 = vunpack.i.h.bf16 %v8200_v3 }
 0x4b8   : > { %5444 = vrot.lane.b32.xlu1 %v5443_v26, %s5565_s15  ;;  %5424 = vrot.lane.b32.xlu2 %v5423_v41, %s5558_s23 }
 0x4b9   : > { %v5250_v34 = vpop.permute.xlu0 %5249  ;;  %v8525_v4 = vpop.permute.xlu1 %5209 }
 0x4ba   : > { %v8527_v13 = vpop.permute.xlu2 %5284  ;;  %v5252_v7 = vunpack.i.h.bf16 %v5250_v34  ;;  %v5251_v27 = vunpack.i.l.bf16 %v5250_v34 }
 0x4bc   : > { %v3363_v45 = vsel %vm1924_vm5, %v5532_v11, %v5252_v7  ;;  %v5535_v11 = vld [vmem:[#allocation2 + $0xc0] sm:$0xff] }
 0x4bd   : > { %3706 = vmatmul.f32.gmra.mxu3 %v3554_v29 }
 0x4bf   : > { %5454 = vrot.lane.b32.xlu0 %v5423_v41, %s5564_s14  ;;  %v5483_v41 = vpack.i.bf16 %v2657_v42, %v2655_v44 }
 0x4c0   : > { %5464 = vrot.lane.b32.xlu1 %v8450_v31, %s5563_s21  ;;  %5469 = vrot.lane.b32.xlu2 %v5443_v26, %s5559_s24  ;;  %v3362_v31 = vsel %vm1924_vm5, %v5533_v47, %v5251_v27 }
 0x4c1   : > { %v5260_v21 = vpop.permute.xlu0 %5259  ;;  %v5255_v23 = vpop.permute.xlu1 %5254 }
 0x4c2   : > { %v5257_v53 = vunpack.i.h.bf16 %v5255_v23  ;;  %v5256_v0 = vunpack.i.l.bf16 %v5255_v23  ;;  %v8535_v50 = vpop.permute.xlu2 %5294  ;;  %v5262_v15 = vunpack.i.h.bf16 %v5260_v21  ;;  %v5261_v46 = vunpack.i.l.bf16 %v5260_v21 }
 0x4c4   : > { %v3394_v38 = vsel %vm1285_vm2, %v3362_v31, %v5256_v0  ;;  %v3395_v55 = vsel %vm1285_vm2, %v3363_v45, %v5257_v53  ;;  %v5287_v0 = vunpack.i.h.bf16 %v8527_v13  ;;  %v5286_v45 = vunpack.i.l.bf16 %v8527_v13  ;;  %v8600_v13 = vld [vmem:[#allocation2 + $0x1a0] sm:$0xff] }
 0x4c5   : > { %3709 = vmatmul.f32.gmra.mxu3 %v3555_v56  ;;  %v3427_v40 = vsel %vm3412_vm13, %v3394_v38, %v5046_v22  ;;  %v3428_v12 = vsel %vm3412_vm13, %v3395_v55, %v5047_v48  ;;  %v8594_v56 = vld [vmem:[#allocation2 + $0x198] sm:$0xff]  ;;  %v5096_v38 = vunpack.i.l.bf16 %v8200_v3  ;;  %v2667_v1 = vrot.slane %v8600_v13, 1  ;;  %v3886_v3 = vld [vmem:[%s9382_s9 + $0x8] sm:$0xff] }
 0x4c6   : > { %v3459_v43 = vsel %vm1318_vm3, %v3427_v40, %v5261_v46  ;;  %v3460_v49 = vsel %vm1318_vm3, %v3428_v12, %v5262_v15  ;;  %v5297_v40 = vunpack.i.h.bf16 %v8535_v50  ;;  %v5177_v15 = vunpack.i.h.bf16 %v8419_v20  ;;  %4099 = vmatpush.msra.mxu1 %v3886_v3  ;;  %4075 = vmatpush.msra.mxu0 %v3886_v3 }
 0x4c7   : > { %5459 = vrot.lane.b32.xlu0 %v5458_v30, %s5558_s23 }
 0x4c8   : > { %5474 = vrot.lane.b32.xlu1 %v8512_v5, %s5560_s25  ;;  %5479 = vrot.lane.b32.xlu2 %v5478_v28, %s5565_s15 }
 0x4c9   : > { %v8557_v19 = vpop.permute.xlu0 %5269 }
 0x4ca   : > { %v5265_v18 = vpop.permute.xlu1 %5264  ;;  %v8561_v8 = vpop.permute.xlu2 %5304  ;;  %v5271_v29 = vunpack.i.l.bf16 %v8557_v19 }
 0x4cb   : > { %v5267_v60 = vunpack.i.h.bf16 %v5265_v18  ;;  %v5266_v37 = vunpack.i.l.bf16 %v5265_v18 }
 0x4cd   : > { %v3492_v26 = vsel %vm3477_vm14, %v3459_v43, %v5266_v37  ;;  %v3493_v36 = vsel %vm3477_vm14, %v3460_v49, %v5267_v60  ;;  %3712 = vmatmul.f32.gmra.mxu3 %v3556_v9  ;;  %v5296_v60 = vunpack.i.l.bf16 %v8535_v50  ;;  %v5176_v43 = vunpack.i.l.bf16 %v8419_v20 }
 0x4ce   : > { %v3524_v6 = vsel %vm1351_vm4, %v3492_v26, %v5066_v32  ;;  %v3525_v34 = vsel %vm1351_vm4, %v3493_v36, %v5067_v16  ;;  %v5306_v50 = vunpack.i.l.bf16 %v8561_v8 }
 0x4cf   : > { %5499 = vrot.lane.b32.xlu0 %v5478_v28, %s5559_s24  ;;  %v3557_v23 = vsel %vm3542_vm15, %v3524_v6, %v5271_v29  ;;  %v5536_v29 = vld [vmem:[#allocation2 + $0xd8] sm:$0xff] }
 0x4d0   : > { %5484 = vrot.lane.b32.xlu1 %v5483_v41, %s5566_s16  ;;  %5494 = vrot.lane.b32.xlu2 %v8512_v5, %s5563_s21 }
 0x4d1   : > { %v8577_v63 = vpop.permute.xlu0 %5274 }
 0x4d2   : > { %v5280_v39 = vpop.permute.xlu1 %5279  ;;  %v8580_v21 = vpop.permute.xlu2 %5314 }
 0x4d3   : > { %v5282_v7 = vunpack.i.h.bf16 %v5280_v39  ;;  %v5281_v27 = vunpack.i.l.bf16 %v5280_v39  ;;  %v8637_v39 = vpop.f32.mrf.mxu2 }
 0x4d5   : > { %v3365_v53 = vsel %vm1924_vm5, %v5534_v58, %v5282_v7  ;;  %3715 = vmatmul.f32.gmra.mxu3 %v3557_v23  ;;  %v3364_v5 = vsel %vm1924_vm5, %v5535_v11, %v5281_v27  ;;  %v3366_v7 = vsel %vm1924_vm5, %v5536_v29, %v5306_v50  ;;  %v5181_v58 = vunpack.i.l.bf16 %v8385_v17 }
 0x4d6   : > { %v3397_v47 = vsel %vm1285_vm2, %v3365_v53, %v5287_v0  ;;  %v3396_v55 = vsel %vm1285_vm2, %v3364_v5, %v5286_v45  ;;  %v5307_v5 = vunpack.i.h.bf16 %v8561_v8 }
 0x4d7   : > { %3120 = vrot.lane.b32.xlu0 %v8431_v59, %s5565_s15  ;;  %v2666_v59 = vrot.slane %v8594_v56, 1  ;;  %v3430_v12 = vsel %vm3412_vm13, %v3397_v47, %v5097_v51  ;;  %v3429_v46 = vsel %vm3412_vm13, %v3396_v55, %v5096_v38  ;;  %v5316_v51 = vunpack.i.l.bf16 %v8580_v21 }
 0x4d8   : > { %5489 = vrot.lane.b32.xlu1 %v5458_v30, %s5564_s14  ;;  %5504 = vrot.lane.b32.xlu2 %v5483_v41, %s5560_s25  ;;  %v5272_v30 = vunpack.i.h.bf16 %v8557_v19  ;;  %v8632_v41 = vld [vmem:[#allocation2 + $0x1a8] sm:$0x3] }
 0x4d9   : > { %v8592_v31 = vpop.permute.xlu0 %5309  ;;  %v2668_v42 = vsel %vm489_vm0, %v2666_v59, %v2667_v1  ;;  %v2669_v20 = vrot.slane %v8632_v41, 1 }
 0x4da   : > { %v5290_v33 = vpop.permute.xlu1 %5289  ;;  %v8603_v28 = vpop.permute.xlu2 %5324  ;;  %v3558_v18 = vsel %vm3542_vm15, %v3525_v34, %v5272_v30  ;;  %v5312_v38 = vunpack.i.h.bf16 %v8592_v31  ;;  %v5537_v30 = vld [vmem:[#allocation2 + $0xe0] sm:$0xff] }
 0x4db   : > { %v5292_v48 = vunpack.i.h.bf16 %v5290_v33  ;;  %v5291_v22 = vunpack.i.l.bf16 %v5290_v33  ;;  %v8634_v6 = vpop.f32.mrf.mxu3  ;;  %v2670_v23 = vsel %vm489_vm0, %v2667_v1, %v2669_v20  ;;  %v8659_v1 = vpop.f32.mrf.mxu2 }
 0x4dd   : > { %v3462_v19 = vsel %vm1318_vm3, %v3430_v12, %v5292_v48  ;;  %v3461_v44 = vsel %vm1318_vm3, %v3429_v46, %v5291_v22  ;;  %3718 = vmatmul.f32.gmra.mxu3 %v3558_v18  ;;  %v3367_v48 = vsel %vm1924_vm5, %v5537_v30, %v5307_v5  ;;  %v5182_v12 = vunpack.i.h.bf16 %v8385_v17 }
 0x4de   : > { %v3495_v35 = vsel %vm3477_vm14, %v3462_v19, %v5297_v40  ;;  %v3494_v32 = vsel %vm3477_vm14, %v3461_v44, %v5296_v60  ;;  %v5211_v40 = vunpack.i.l.bf16 %v8525_v4  ;;  %v5326_v18 = vunpack.i.l.bf16 %v8603_v28 }
 0x4df   : > { %3122 = vrot.lane.b32.xlu0 %v8486_v52, %s5565_s15  ;;  %v3527_v37 = vsel %vm1351_vm4, %v3495_v35, %v5177_v15  ;;  %v5311_v52 = vunpack.i.l.bf16 %v8592_v31  ;;  %v3526_v36 = vsel %vm1351_vm4, %v3494_v32, %v5176_v43  ;;  %v3399_v31 = vsel %vm1285_vm2, %v3367_v48, %v5312_v38  ;;  %v5538_v43 = vld [vmem:[#allocation2 + $0xf0] sm:$0xff] }
 0x4e0   : > { %3216 = vrot.lane.b32.xlu1 %v8594_v56, %s5558_s23  ;;  %3312 = vrot.lane.b32.xlu2 %v2668_v42, %s5566_s16  ;;  %v3432_v19 = vsel %vm3412_vm13, %v3399_v31, %v5182_v12  ;;  %v5317_v60 = vunpack.i.h.bf16 %v8580_v21 }
 0x4e1   : > { %v5320_v16 = vpop.permute.xlu0 %5319  ;;  %v3398_v27 = vsel %vm1285_vm2, %v3366_v7, %v5311_v52  ;;  %v5216_v7 = vunpack.i.l.bf16 %v8354_v25 }
 0x4e2   : > { %v5300_v49 = vpop.permute.xlu1 %5299  ;;  %v8628_v26 = vpop.permute.xlu2 %5369  ;;  %v3431_v45 = vsel %vm3412_vm13, %v3398_v27, %v5181_v58  ;;  %v5321_v47 = vunpack.i.l.bf16 %v5320_v16  ;;  %v5322_v44 = vunpack.i.h.bf16 %v5320_v16  ;;  %v3464_v17 = vsel %vm1318_vm3, %v3432_v19, %v5317_v60  ;;  %v5540_v60 = vld [vmem:[#allocation2 + $0x108] sm:$0xff] }
 0x4e3   : > { %v5301_v9 = vunpack.i.l.bf16 %v5300_v49  ;;  %v5302_v53 = vunpack.i.h.bf16 %v5300_v49  ;;  %v3463_v59 = vsel %vm1318_vm3, %v3431_v45, %v5316_v51  ;;  %v8656_v22 = vpop.f32.mrf.mxu3  ;;  %v5212_v16 = vunpack.i.h.bf16 %v8525_v4 }
 0x4e4   : > { %v3496_v8 = vsel %vm3477_vm14, %v3463_v59, %v5321_v47  ;;  %v5327_v27 = vunpack.i.h.bf16 %v8603_v28  ;;  %v5539_v47 = vld [vmem:[#allocation2 + $0xf8] sm:$0xff] }
 0x4e5   : > { %v3559_v34 = vsel %vm3542_vm15, %v3526_v36, %v5301_v9  ;;  %v3560_v33 = vsel %vm3542_vm15, %v3527_v37, %v5302_v53  ;;  %v3528_v46 = vsel %vm1351_vm4, %v3496_v8, %v5211_v40  ;;  %v3497_v9 = vsel %vm3477_vm14, %v3464_v17, %v5322_v44  ;;  %v8677_v36 = vpop.f32.mrf.mxu2 }
 0x4e6   : > { %3721 = vmatmul.f32.gmra.mxu3 %v3559_v34  ;;  %v3561_v37 = vsel %vm3542_vm15, %v3528_v46, %v5326_v18  ;;  %v3529_v29 = vsel %vm1351_vm4, %v3497_v9, %v5212_v16  ;;  %v5217_v40 = vunpack.i.h.bf16 %v8354_v25 }
 0x4e7   : > { %v3562_v4 = vsel %vm3542_vm15, %v3529_v29, %v5327_v27 }
 0x4e8   : > { %3218 = vrot.lane.b32.xlu1 %v8600_v13, %s5558_s23  ;;  %3314 = vrot.lane.b32.xlu2 %v2670_v23, %s5566_s16 }
 0x4e9   : > { %v5330_v0 = vpop.permute.xlu0 %5329 }
 0x4ea   : > { %v5335_v11 = vpop.permute.xlu1 %5334  ;;  %v8651_v55 = vpop.permute.xlu2 %5379  ;;  %v5331_v35 = vunpack.i.l.bf16 %v5330_v0  ;;  %v5332_v23 = vunpack.i.h.bf16 %v5330_v0  ;;  %v5246_v0 = vunpack.i.l.bf16 %v8505_v10 }
 0x4eb   : > { %v5336_v42 = vunpack.i.l.bf16 %v5335_v11  ;;  %v5337_v5 = vunpack.i.h.bf16 %v5335_v11 }
 0x4ec   : > { %v3368_v49 = vsel %vm1924_vm5, %v5538_v43, %v5331_v35  ;;  %v3369_v51 = vsel %vm1924_vm5, %v5539_v47, %v5332_v23 }
 0x4ed   : > { %v3400_v21 = vsel %vm1285_vm2, %v3368_v49, %v5336_v42  ;;  %v3401_v48 = vsel %vm1285_vm2, %v3369_v51, %v5337_v5  ;;  %v8699_v12 = vpop.f32.mrf.mxu2  ;;  %v5372_v5 = vunpack.i.h.bf16 %v8628_v26 }
 0x4ee   : > { %3724 = vmatmul.f32.gmra.mxu3 %v3560_v33  ;;  %v3433_v53 = vsel %vm3412_vm13, %v3400_v21, %v5216_v7  ;;  %v3434_v18 = vsel %vm3412_vm13, %v3401_v48, %v5217_v40  ;;  %v5276_v21 = vunpack.i.l.bf16 %v8577_v63 }
 0x4f1   : > { %v5340_v3 = vpop.permute.xlu0 %5339 }
 0x4f2   : > { %v5345_v15 = vpop.permute.xlu1 %5344  ;;  %v8669_v32 = vpop.permute.xlu2 %5394  ;;  %v5341_v34 = vunpack.i.l.bf16 %v5340_v3  ;;  %v5342_v11 = vunpack.i.h.bf16 %v5340_v3  ;;  %v5371_v3 = vunpack.i.l.bf16 %v8628_v26 }
 0x4f3   : > { %v8673_v50 = vpop.f32.mrf.mxu3  ;;  %v5346_v58 = vunpack.i.l.bf16 %v5345_v15  ;;  %v5347_v19 = vunpack.i.h.bf16 %v5345_v15  ;;  %v5247_v15 = vunpack.i.h.bf16 %v8505_v10  ;;  %v5381_v10 = vunpack.i.l.bf16 %v8651_v55 }
 0x4f4   : > { %v3465_v45 = vsel %vm1318_vm3, %v3433_v53, %v5341_v34  ;;  %v3466_v35 = vsel %vm1318_vm3, %v3434_v18, %v5342_v11  ;;  %v5541_v53 = vld [vmem:[#allocation2 + $0x110] sm:$0xff]  ;;  %v5277_v11 = vunpack.i.h.bf16 %v8577_v63  ;;  %v5542_v63 = vld [vmem:[#allocation2 + $0x120] sm:$0xff] }
 0x4f5   : > { %v3498_v28 = vsel %vm3477_vm14, %v3465_v45, %v5346_v58  ;;  %v3499_v43 = vsel %vm3477_vm14, %v3466_v35, %v5347_v19  ;;  %v8720_v23 = vpop.f32.mrf.mxu2  ;;  %v5382_v35 = vunpack.i.h.bf16 %v8651_v55 }
 0x4f6   : > { %3727 = vmatmul.f32.gmra.mxu3 %v3561_v37  ;;  %v3530_v46 = vsel %vm1351_vm4, %v3498_v28, %v5246_v0  ;;  %v3531_v7 = vsel %vm1351_vm4, %v3499_v43, %v5247_v15 }
 0x4f9   : > { %v5350_v52 = vpop.permute.xlu0 %5349 }
 0x4fa   : > { %v8680_v20 = vpop.permute.xlu1 %5359  ;;  %v8689_v38 = vpop.permute.xlu2 %5399  ;;  %v5351_v33 = vunpack.i.l.bf16 %v5350_v52  ;;  %v5352_v42 = vunpack.i.h.bf16 %v5350_v52 }
 0x4fb   : > { %v8691_v59 = vpop.f32.mrf.mxu3  ;;  %v5401_v26 = vunpack.i.l.bf16 %v8689_v38 }
 0x4fc   : > { %v3563_v44 = vsel %vm3542_vm15, %v3530_v46, %v5351_v33  ;;  %v3564_v27 = vsel %vm3542_vm15, %v3531_v7, %v5352_v42 }
 0x4fe   : > { %3730 = vmatmul.f32.gmra.mxu3 %v3562_v4 }
 0x501   : > { %v8693_v30 = vpop.permute.xlu0 %5354 }
 0x502   : > { %v5365_v8 = vpop.permute.xlu1 %5364  ;;  %v8714_v9 = vpop.permute.xlu2 %5409  ;;  %v5356_v28 = vunpack.i.l.bf16 %v8693_v30 }
 0x503   : > { %v5366_v31 = vunpack.i.l.bf16 %v5365_v8  ;;  %v5367_v34 = vunpack.i.h.bf16 %v5365_v8 }
 0x505   : > { %v3370_v37 = vsel %vm1924_vm5, %v5540_v60, %v5366_v31  ;;  %v3371_v4 = vsel %vm1924_vm5, %v5541_v53, %v5367_v34  ;;  %v8743_v60 = vpop.f32.mrf.mxu2  ;;  %v5361_v34 = vunpack.i.l.bf16 %v8680_v20 }
 0x506   : > { %3733 = vmatmul.f32.gmra.mxu3 %v3563_v44  ;;  %v3402_v49 = vsel %vm1285_vm2, %v3370_v37, %v5371_v3  ;;  %v3403_v33 = vsel %vm1285_vm2, %v3371_v4, %v5372_v5  ;;  %v3372_v37 = vsel %vm1924_vm5, %v5542_v63, %v5401_v26  ;;  %v5543_v5 = vld [vmem:[#allocation2 + $0x128] sm:$0xff] }
 0x507   : > { %v3435_v52 = vsel %vm3412_vm13, %v3402_v49, %v5276_v21  ;;  %v3436_v46 = vsel %vm3412_vm13, %v3403_v33, %v5277_v11  ;;  %v5357_v49 = vunpack.i.h.bf16 %v8693_v30 }
 0x508   : > { %v8707_v25 = vpop.f32.mrf.mxu3 }
 0x509   : > { %v8709_v17 = vpop.permute.xlu0 %5404 }
 0x50a   : > { %v5375_v16 = vpop.permute.xlu1 %5374  ;;  %v8734_v40 = vpop.permute.xlu2 %5419  ;;  %v5406_v44 = vunpack.i.l.bf16 %v8709_v17 }
 0x50b   : > { %v5376_v29 = vunpack.i.l.bf16 %v5375_v16  ;;  %v5377_v0 = vunpack.i.h.bf16 %v5375_v16 }
 0x50c   : > { %v3404_v16 = vsel %vm1285_vm2, %v3372_v37, %v5406_v44  ;;  %v5544_v37 = vld [vmem:[#allocation2 + $0x138] sm:$0xff] }
 0x50d   : > { %v3467_v58 = vsel %vm1318_vm3, %v3435_v52, %v5376_v29  ;;  %v3468_v18 = vsel %vm1318_vm3, %v3436_v46, %v5377_v0  ;;  %v5402_v29 = vunpack.i.h.bf16 %v8689_v38  ;;  %v3437_v7 = vsel %vm3412_vm13, %v3404_v16, %v5361_v34 }
 0x50e   : > { %3736 = vmatmul.f32.gmra.mxu3 %v3564_v27  ;;  %v3500_v51 = vsel %vm3477_vm14, %v3467_v58, %v5381_v10  ;;  %v3501_v15 = vsel %vm3477_vm14, %v3468_v18, %v5382_v35  ;;  %v5411_v58 = vunpack.i.l.bf16 %v8714_v9  ;;  %v5407_v10 = vunpack.i.h.bf16 %v8709_v17  ;;  %v8768_v17 = vpop.f32.mrf.mxu2 }
 0x50f   : > { %v3532_v31 = vsel %vm1351_vm4, %v3500_v51, %v5356_v28  ;;  %v3533_v55 = vsel %vm1351_vm4, %v3501_v15, %v5357_v49  ;;  %v3373_v51 = vsel %vm1924_vm5, %v5543_v5, %v5402_v29  ;;  %v5412_v35 = vunpack.i.h.bf16 %v8714_v9 }
 0x510   : > { %v8726_v45 = vpop.f32.mrf.mxu3  ;;  %v3469_v4 = vsel %vm1318_vm3, %v3437_v7, %v5411_v58  ;;  %v3405_v0 = vsel %vm1285_vm2, %v3373_v51, %v5407_v10  ;;  %v5396_v16 = vunpack.i.l.bf16 %v8669_v32  ;;  %v5545_v51 = vld [vmem:[#allocation2 + $0x140] sm:$0xff] }
 0x511   : > { %v8728_v47 = vpop.permute.xlu0 %5414 }
 0x512   : > { %v5385_v48 = vpop.permute.xlu1 %5384  ;;  %v5416_v52 = vunpack.i.l.bf16 %v8728_v47  ;;  %v8759_v30 = vpop.permute.xlu2 %5424  ;;  %v5417_v18 = vunpack.i.h.bf16 %v8728_v47 }
 0x513   : > { %v5386_v8 = vunpack.i.l.bf16 %v5385_v48  ;;  %v5387_v3 = vunpack.i.h.bf16 %v5385_v48 }
 0x514   : > { %v3502_v28 = vsel %vm3477_vm14, %v3469_v4, %v5416_v52 }
 0x515   : > { %v3565_v19 = vsel %vm3542_vm15, %v3532_v31, %v5386_v8  ;;  %v3566_v27 = vsel %vm3542_vm15, %v3533_v55, %v5387_v3  ;;  %v5362_v8 = vunpack.i.h.bf16 %v8680_v20  ;;  %v5421_v31 = vunpack.i.l.bf16 %v8734_v40 }
 0x516   : > { %3739 = vmatmul.f32.gmra.mxu3 %v3565_v19 }
 0x517   : > { %v3438_v19 = vsel %vm3412_vm13, %v3405_v0, %v5362_v8 }
 0x518   : > { %v8746_v42 = vpop.f32.mrf.mxu3  ;;  %v3470_v49 = vsel %vm1318_vm3, %v3438_v19, %v5412_v35 }
 0x519   : > { %v5430_v43 = vpop.permute.xlu0 %5429  ;;  %v3503_v55 = vsel %vm3477_vm14, %v3470_v49, %v5417_v18 }
 0x51a   : > { %v5390_v21 = vpop.permute.xlu1 %5389  ;;  %v5431_v26 = vunpack.i.l.bf16 %v5430_v43  ;;  %v8777_v15 = vpop.permute.xlu2 %5469  ;;  %v5432_v7 = vunpack.i.h.bf16 %v5430_v43 }
 0x51b   : > { %v5391_v53 = vunpack.i.l.bf16 %v5390_v21  ;;  %v5392_v63 = vunpack.i.h.bf16 %v5390_v21  ;;  %v5422_v21 = vunpack.i.h.bf16 %v8734_v40  ;;  %v5426_v40 = vunpack.i.l.bf16 %v8759_v30 }
 0x51c   : > { %v3374_v3 = vsel %vm1924_vm5, %v5544_v37, %v5431_v26  ;;  %v2672_v26 = vrot.slane %v8600_v13, 2 }
 0x51d   : > { %v3534_v11 = vsel %vm1351_vm4, %v3502_v28, %v5391_v53  ;;  %v3535_v9 = vsel %vm1351_vm4, %v3503_v55, %v5392_v63  ;;  %v8788_v53 = vpop.f32.mrf.mxu2  ;;  %v3375_v28 = vsel %vm1924_vm5, %v5545_v51, %v5432_v7 }
 0x51e   : > { %3742 = vmatmul.f32.gmra.mxu3 %v3566_v27  ;;  %v3567_v44 = vsel %vm3542_vm15, %v3534_v11, %v5421_v31  ;;  %v3568_v4 = vsel %vm3542_vm15, %v3535_v9, %v5422_v21  ;;  %v5397_v11 = vunpack.i.h.bf16 %v8669_v32  ;;  %v2671_v31 = vrot.slane %v8594_v56, 2  ;;  %v5546_v56 = vld [vmem:[#allocation2 + $0x150] sm:$0xff] }
 0x51f   : > { %v5427_v9 = vunpack.i.h.bf16 %v8759_v30 }
 0x520   : > { %v8763_v38 = vpop.f32.mrf.mxu3  ;;  %v2673_v55 = vsel %vm570_vm1, %v2671_v31, %v2672_v26  ;;  %v2674_v31 = vrot.slane %v8632_v41, 2 }
 0x521   : > { %v5440_v33 = vpop.permute.xlu0 %5439  ;;  %4430 = vmatmul.msk.f32.gmra.mxu2 %vm1924_vm5, %v2673_v55 }
 0x522   : > { %v5435_v48 = vpop.permute.xlu1 %5434  ;;  %v5441_v10 = vunpack.i.l.bf16 %v5440_v33 }
 0x523   : > { %v5436_v46 = vunpack.i.l.bf16 %v5435_v48  ;;  %v5437_v58 = vunpack.i.h.bf16 %v5435_v48 }
 0x525   : > { %v3406_v20 = vsel %vm1285_vm2, %v3374_v3, %v5436_v46  ;;  %v3407_v43 = vsel %vm1285_vm2, %v3375_v28, %v5437_v58  ;;  %v5442_v3 = vunpack.i.h.bf16 %v5440_v33  ;;  %v8805_v49 = vpop.f32.mrf.mxu2 }
 0x526   : > { %3745 = vmatmul.f32.gmra.mxu3 %v3567_v44  ;;  %v3439_v52 = vsel %vm3412_vm13, %v3406_v20, %v5396_v16  ;;  %v3440_v18 = vsel %vm3412_vm13, %v3407_v43, %v5397_v11  ;;  %v5480_v44 = vpop.permute.xlu2 %5479  ;;  %v5547_v43 = vld [vmem:[#allocation2 + $0x158] sm:$0xff] }
 0x527   : > { %v3471_v5 = vsel %vm1318_vm3, %v3439_v52, %v5441_v10  ;;  %v3472_v32 = vsel %vm1318_vm3, %v3440_v18, %v5442_v3 }
 0x528   : > { %v8782_v34 = vpop.f32.mrf.mxu3 }
 0x529   : > { %v5450_v47 = vpop.permute.xlu0 %5449 }
 0x52a   : > { %v5445_v29 = vpop.permute.xlu1 %5444  ;;  %v5451_v63 = vunpack.i.l.bf16 %v5450_v47  ;;  %v5452_v58 = vunpack.i.h.bf16 %v5450_v47 }
 0x52b   : > { %v5446_v27 = vunpack.i.l.bf16 %v5445_v29  ;;  %v5447_v35 = vunpack.i.h.bf16 %v5445_v29  ;;  %v5471_v29 = vunpack.i.l.bf16 %v8777_v15 }
 0x52d   : > { %v3504_v0 = vsel %vm3477_vm14, %v3471_v5, %v5446_v27  ;;  %v3505_v16 = vsel %vm3477_vm14, %v3472_v32, %v5447_v35  ;;  %v8823_v47 = vpop.f32.mrf.mxu2  ;;  %v2675_v35 = vsel %vm570_vm1, %v2672_v26, %v2674_v31  ;;  %v5482_v26 = vunpack.i.h.bf16 %v5480_v44 }
 0x52e   : > { %3748 = vmatmul.f32.gmra.mxu3 %v3568_v4  ;;  %v3536_v19 = vsel %vm1351_vm4, %v3504_v0, %v5426_v40  ;;  %v3537_v27 = vsel %vm1351_vm4, %v3505_v16, %v5427_v9  ;;  %v5495_v51 = vpop.permute.xlu2 %5494  ;;  %v5481_v40 = vunpack.i.l.bf16 %v5480_v44  ;;  %4431 = vmatmul.msk.f32.gmra.mxu2 %vm1924_vm5, %v2675_v35 }
 0x52f   : > { %v3569_v20 = vsel %vm3542_vm15, %v3536_v19, %v5451_v63  ;;  %v3570_v30 = vsel %vm3542_vm15, %v3537_v27, %v5452_v58  ;;  %v5472_v19 = vunpack.i.h.bf16 %v8777_v15  ;;  %v5496_v9 = vunpack.i.l.bf16 %v5495_v51 }
 0x530   : > { %v8797_v48 = vpop.f32.mrf.mxu3 }
 0x531   : > { %v5455_v8 = vpop.permute.xlu0 %5454 }
 0x532   : > { %v5465_v46 = vpop.permute.xlu1 %5464  ;;  %v5456_v4 = vunpack.i.l.bf16 %v5455_v8  ;;  %v5457_v32 = vunpack.i.h.bf16 %v5455_v8 }
 0x533   : > { %v5466_v37 = vunpack.i.l.bf16 %v5465_v46  ;;  %v5467_v10 = vunpack.i.h.bf16 %v5465_v46 }
 0x535   : > { %v3376_v13 = vsel %vm1924_vm5, %v5546_v56, %v5466_v37  ;;  %v3377_v11 = vsel %vm1924_vm5, %v5547_v43, %v5467_v10 }
 0x536   : > { %3751 = vmatmul.f32.gmra.mxu3 %v3569_v20  ;;  %v3408_v7 = vsel %vm1285_vm2, %v3376_v13, %v5471_v29  ;;  %v3409_v63 = vsel %vm1285_vm2, %v3377_v11, %v5472_v19  ;;  %v5505_v29 = vpop.permute.xlu2 %5504 }
 0x537   : > { %v3441_v28 = vsel %vm3412_vm13, %v3408_v7, %v5456_v4  ;;  %v3442_v13 = vsel %vm3412_vm13, %v3409_v63, %v5457_v32  ;;  %v8838_v4 = vpop.f32.mrf.mxu2 }
 0x538   : > { %v8813_v33 = vpop.f32.mrf.mxu3 }
 0x539   : > { %v5460_v21 = vpop.permute.xlu0 %5459 }
 0x53a   : > { %v5475_v52 = vpop.permute.xlu1 %5474  ;;  %v5461_v3 = vunpack.i.l.bf16 %v5460_v21  ;;  %v5462_v58 = vunpack.i.h.bf16 %v5460_v21 }
 0x53b   : > { %v5476_v5 = vunpack.i.l.bf16 %v5475_v52  ;;  %v5477_v37 = vunpack.i.h.bf16 %v5475_v52 }
 0x53d   : > { %v3473_v0 = vsel %vm1318_vm3, %v3441_v28, %v5476_v5  ;;  %v3474_v55 = vsel %vm1318_vm3, %v3442_v13, %v5477_v37  ;;  %v5548_v5 = vld [vmem:[#allocation2 + $0x168] sm:$0xff] }
 0x53e   : > { %3754 = vmatmul.f32.gmra.mxu3 %v3570_v30  ;;  %v3506_v18 = vsel %vm3477_vm14, %v3473_v0, %v5481_v40  ;;  %v3507_v8 = vsel %vm3477_vm14, %v3474_v55, %v5482_v26  ;;  %v3378_v28 = vsel %vm1924_vm5, %v5548_v5, %v5496_v9  ;;  %v5506_v40 = vunpack.i.l.bf16 %v5505_v29  ;;  %v3313_v19 = vpop.permute.xlu2 %3312  ;;  %v3885_v9 = vld [vmem:[%s9382_s9] sm:$0xff] }
 0x53f   : > { %v3538_v15 = vsel %vm1351_vm4, %v3506_v18, %v5461_v3  ;;  %v3539_v44 = vsel %vm1351_vm4, %v3507_v8, %v5462_v58  ;;  %v5497_v18 = vunpack.i.h.bf16 %v5495_v51  ;;  %4100 = vmatpush.msra.mxu1 %v3885_v9  ;;  %4076 = vmatpush.msra.mxu0 %v3885_v9  ;;  %v8934_v9 = vadd.f32 %v8491_v62, %v8726_v45 }
 0x540   : > { %v8825_v46 = vpop.f32.mrf.mxu3 }
 0x541   : > { %v5500_v41 = vpop.permute.xlu0 %5499 }
 0x542   : > { %v5485_v20 = vpop.permute.xlu1 %5484  ;;  %v5501_v7 = vunpack.i.l.bf16 %v5500_v41  ;;  %v5502_v35 = vunpack.i.h.bf16 %v5500_v41  ;;  %v5507_v41 = vunpack.i.h.bf16 %v5505_v29 }
 0x543   : > { %v5486_v56 = vunpack.i.l.bf16 %v5485_v20  ;;  %v5487_v52 = vunpack.i.h.bf16 %v5485_v20 }
 0x544   : > { %v3410_v0 = vsel %vm1285_vm2, %v3378_v28, %v5501_v7 }
 0x545   : > { %v3571_v16 = vsel %vm3542_vm15, %v3538_v15, %v5486_v56  ;;  %v3572_v31 = vsel %vm3542_vm15, %v3539_v44, %v5487_v52  ;;  %v5549_v56 = vld [vmem:[#allocation2 + $0x170] sm:$0xff] }
 0x546   : > { %3757 = vmatmul.f32.gmra.mxu3 %v3571_v16  ;;  %v3379_v15 = vsel %vm1924_vm5, %v5549_v56, %v5497_v18  ;;  %v8852_v16 = vpop.f32.mrf.mxu2  ;;  %v3315_v8 = vpop.permute.xlu2 %3314  ;;  %v8895_v56 = vadd.f32 %v8314_v61, %v8656_v22 }
 0x547   : > { %v3411_v55 = vsel %vm1285_vm2, %v3379_v15, %v5502_v35  ;;  %v8899_v15 = vadd.f32 %v8262_v2, %v8634_v6 }
 0x548   : > { %v8835_v27 = vpop.f32.mrf.mxu3  ;;  %v3889_v2 = vsel %vm1924_vm5, %v8895_v56, 0.0 }
 0x549   : > { %v3121_v43 = vpop.permute.xlu0 %3120  ;;  %v3957_v61 = vmul.f32 %v8899_v15, %v8899_v15 }
 0x54a   : > { %v5490_v10 = vpop.permute.xlu1 %5489 }
 0x54b   : > { %v5491_v30 = vunpack.i.l.bf16 %v5490_v10  ;;  %v5492_v37 = vunpack.i.h.bf16 %v5490_v10 }
 0x54d   : > { %v3443_v11 = vsel %vm3412_vm13, %v3410_v0, %v5491_v30  ;;  %v3444_v51 = vsel %vm3412_vm13, %v3411_v55, %v5492_v37  ;;  %v8905_v55 = vadd.f32 %v8350_v14, %v8673_v50  ;;  %v8923_v14 = vadd.f32 %v8439_v57, %v8707_v25 }
 0x54e   : > { %3760 = vmatmul.f32.gmra.mxu3 %v3572_v31  ;;  %v3475_v21 = vsel %vm1318_vm3, %v3443_v11, %v5506_v40  ;;  %v3476_v7 = vsel %vm1318_vm3, %v3444_v51, %v5507_v41  ;;  %v8865_v29 = vpop.f32.mrf.mxu2  ;;  %v3958_v51 = vmul.f32 %v8895_v56, %v8895_v56  ;;  %v8911_v41 = vadd.f32 %v8393_v54, %v8691_v59 }
 0x54f   : > { %v3508_v3 = vsel %vm3477_vm14, %v3475_v21, %v3121_v43  ;;  %v3959_v6 = vmul.f32 %v8905_v55, %v8905_v55  ;;  %v3888_v50 = vsel %vm1924_vm5, %v8899_v15, 0.0  ;;  %v3891_v59 = vsel %vm1924_vm5, %v8905_v55, 0.0 }
 0x550   : > { %v8846_v63 = vpop.f32.mrf.mxu3  ;;  %v3990_v54 = vsel %vm1924_vm5, %v3958_v51, 0.0  ;;  %v8955_v51 = vadd.f32 %v8659_v1, %v8763_v38 }
 0x551   : > { %v3123_v26 = vpop.permute.xlu0 %3122  ;;  %v3992_v25 = vsel %vm1924_vm5, %v3959_v6, 0.0 }
 0x552   : > { %v3217_v20 = vpop.permute.xlu1 %3216  ;;  %v3509_v58 = vsel %vm3477_vm14, %v3476_v7, %v3123_v26  ;;  %v3960_v26 = vmul.f32 %v8911_v41, %v8911_v41  ;;  %v3989_v7 = vsel %vm1924_vm5, %v3957_v61, 0.0 }
 0x553   : > { %v3540_v32 = vsel %vm1351_vm4, %v3508_v3, %v3217_v20 }
 0x554   : > { %v3573_v13 = vsel %vm3542_vm15, %v3540_v32, %v3313_v19  ;;  %v3994_v45 = vsel %vm1924_vm5, %v3960_v26, 0.0 }
 0x556   : > { %3763 = vmatmul.f32.gmra.mxu3 %v3573_v13  ;;  %v8869_v0 = vpop.f32.mrf.mxu2 }
 0x558   : > { %v8860_v52 = vpop.f32.mrf.mxu3 }
 0x55a   : > { %v3219_v10 = vpop.permute.xlu1 %3218 }
 0x55b   : > { %v3541_v5 = vsel %vm1351_vm4, %v3509_v58, %v3219_v10  ;;  %v3893_v58 = vsel %vm1924_vm5, %v8911_v41, 0.0  ;;  %v3961_v10 = vmul.f32 %v8923_v14, %v8923_v14 }
 0x55c   : > { %v3574_v28 = vsel %vm3542_vm15, %v3541_v5, %v3315_v8  ;;  %v3890_v8 = vadd.f32 %v3889_v2, %v3888_v50  ;;  %v8946_v5 = vadd.f32 %v8637_v39, %v8746_v42  ;;  %v3897_v39 = vsel %vm1924_vm5, %v8934_v9, 0.0 }
 0x55d   : > { %v3996_v6 = vsel %vm1924_vm5, %v3961_v10, 0.0  ;;  %v8964_v50 = vadd.f32 %v8677_v36, %v8782_v34  ;;  %v3901_v10 = vsel %vm1924_vm5, %v8955_v51, 0.0 }
 0x55e   : > { %3766 = vmatmul.f32.gmra.mxu3 %v3574_v28  ;;  %v3847_v43 = vpop.f32.mrf.mxu2  ;;  %v3991_v28 = vadd.f32 %v3990_v54, %v3989_v7  ;;  %v3892_v62 = vadd.f32 %v3891_v59, %v3890_v8  ;;  %v3963_v42 = vmul.f32 %v8946_v5, %v8946_v5  ;;  %v3899_v38 = vsel %vm1924_vm5, %v8946_v5, 0.0 }
 0x55f   : > { %v3964_v7 = vmul.f32 %v8955_v51, %v8955_v51  ;;  %v8975_v8 = vadd.f32 %v8699_v12, %v8797_v48  ;;  %v3903_v48 = vsel %vm1924_vm5, %v8964_v50, 0.0 }
 0x560   : > { %v8867_v30 = vpop.f32.mrf.mxu3  ;;  %v3993_v61 = vadd.f32 %v3992_v25, %v3991_v28  ;;  %v3894_v2 = vadd.f32 %v3893_v58, %v3892_v62  ;;  %v4000_v34 = vsel %vm1924_vm5, %v3963_v42, 0.0  ;;  %v3965_v28 = vmul.f32 %v8964_v50, %v8964_v50 }
 0x561   : > { %v8986_v62 = vadd.f32 %v8720_v23, %v8813_v33  ;;  %v4002_v12 = vsel %vm1924_vm5, %v3964_v7, 0.0  ;;  %v3905_v23 = vsel %vm1924_vm5, %v8975_v8, 0.0  ;;  %v9004_v42 = vadd.f32 %v8768_v17, %v8835_v27 }
 0x562   : > { %v3995_v54 = vadd.f32 %v3994_v45, %v3993_v61  ;;  %v8995_v61 = vadd.f32 %v8743_v60, %v8825_v46 }
 0x563   : > { %v3967_v33 = vmul.f32 %v8986_v62, %v8986_v62  ;;  %v3907_v60 = vsel %vm1924_vm5, %v8986_v62, 0.0 }
 0x564   : > { %v3997_v25 = vadd.f32 %v3996_v6, %v3995_v54  ;;  %v3968_v46 = vmul.f32 %v8995_v61, %v8995_v61 }
 0x565   : > { %v4008_v27 = vsel %vm1924_vm5, %v3967_v33, 0.0 }
 0x566   : > { %v8877_v31 = vpop.f32.mrf.mxu2 }
 0x569   : > { %v8871_v44 = vpop.f32.mrf.mxu3 }
 0x56e   : > { %v8881_v19 = vpop.f32.mrf.mxu2 }
 0x571   : > { %v8873_v40 = vpop.f32.mrf.mxu3 }
 0x576   : > { %v8885_v37 = vpop.f32.mrf.mxu2 }
 0x579   : > { %v8875_v11 = vpop.f32.mrf.mxu3 }
 0x57e   : > { %v8891_v32 = vpop.f32.mrf.mxu2 }
 0x581   : > { %v8879_v21 = vpop.f32.mrf.mxu3 }
 0x586   : > { %v8915_v22 = vpop.f32.mrf.mxu2 }
 0x589   : > { %v3734_v18 = vpop.f32.mrf.mxu3 }
 0x58a   : > { %v8883_v35 = vadd.f32 %v3847_v43, %v3734_v18  ;;  %v3895_v43 = vsel %vm1924_vm5, %v8923_v14, 0.0  ;;  %v3962_v18 = vmul.f32 %v8934_v9, %v8934_v9 }
 0x58b   : > { %v3896_v59 = vadd.f32 %v3895_v43, %v3894_v2 }
 0x58c   : > { %v3998_v1 = vsel %vm1924_vm5, %v3962_v18, 0.0  ;;  %v3966_v18 = vmul.f32 %v8975_v8, %v8975_v8 }
 0x58d   : > { %v3898_v58 = vadd.f32 %v3897_v39, %v3896_v59  ;;  %v3999_v45 = vadd.f32 %v3998_v1, %v3997_v25  ;;  %v4004_v39 = vsel %vm1924_vm5, %v3965_v28, 0.0  ;;  %v9026_v28 = vadd.f32 %v8805_v49, %v8860_v52 }
 0x58e   : > { %v8966_v26 = vpop.f32.mrf.mxu2  ;;  %v4006_v1 = vsel %vm1924_vm5, %v3966_v18, 0.0 }
 0x58f   : > { %v3900_v43 = vadd.f32 %v3899_v38, %v3898_v58  ;;  %v4001_v2 = vadd.f32 %v4000_v34, %v3999_v45  ;;  %v9013_v38 = vadd.f32 %v8788_v53, %v8846_v63  ;;  %v3909_v34 = vsel %vm1924_vm5, %v8995_v61, 0.0 }
 0x590   : > { %v4010_v45 = vsel %vm1924_vm5, %v3968_v46, 0.0  ;;  %v3971_v52 = vmul.f32 %v9026_v28, %v9026_v28 }
 0x591   : > { %v8887_v3 = vpop.f32.mrf.mxu3  ;;  %v3902_v6 = vadd.f32 %v3901_v10, %v3900_v43  ;;  %v4003_v54 = vadd.f32 %v4002_v12, %v4001_v2  ;;  %v3969_v10 = vmul.f32 %v9004_v42, %v9004_v42  ;;  %v3911_v43 = vsel %vm1924_vm5, %v9004_v42, 0.0 }
 0x592   : > { %v3970_v12 = vmul.f32 %v9013_v38, %v9013_v38  ;;  %v3913_v49 = vsel %vm1924_vm5, %v9013_v38, 0.0 }
 0x593   : > { %v3904_v59 = vadd.f32 %v3903_v48, %v3902_v6  ;;  %v4005_v25 = vadd.f32 %v4004_v39, %v4003_v54  ;;  %v9035_v48 = vadd.f32 %v8823_v47, %v8867_v30  ;;  %v4012_v6 = vsel %vm1924_vm5, %v3969_v10, 0.0 }
 0x594   : > { %v9044_v39 = vadd.f32 %v8838_v4, %v8871_v44  ;;  %v4014_v54 = vsel %vm1924_vm5, %v3970_v12, 0.0  ;;  %v3915_v47 = vsel %vm1924_vm5, %v9026_v28, 0.0  ;;  %v4016_v4 = vsel %vm1924_vm5, %v3971_v52, 0.0 }
 0x595   : > { %v3906_v58 = vadd.f32 %v3905_v23, %v3904_v59  ;;  %v4007_v53 = vadd.f32 %v4006_v1, %v4005_v25  ;;  %v3972_v30 = vmul.f32 %v9035_v48, %v9035_v48  ;;  %v9053_v59 = vadd.f32 %v8852_v16, %v8873_v40 }
 0x596   : > { %v9015_v7 = vpop.f32.mrf.mxu2  ;;  %v3917_v44 = vsel %vm1924_vm5, %v9035_v48, 0.0  ;;  %v3973_v25 = vmul.f32 %v9044_v39, %v9044_v39  ;;  %v3919_v10 = vsel %vm1924_vm5, %v9044_v39, 0.0 }
 0x597   : > { %v3908_v63 = vadd.f32 %v3907_v60, %v3906_v58  ;;  %v4009_v18 = vadd.f32 %v4008_v27, %v4007_v53  ;;  %v9062_v58 = vadd.f32 %v8865_v29, %v8875_v11  ;;  %v4018_v40 = vsel %vm1924_vm5, %v3972_v30, 0.0 }
 0x598   : > { %v3974_v53 = vmul.f32 %v9053_v59, %v9053_v59  ;;  %v4020_v29 = vsel %vm1924_vm5, %v3973_v25, 0.0  ;;  %v3921_v11 = vsel %vm1924_vm5, %v9053_v59, 0.0  ;;  %v3977_v30 = vmul.f32 %v8883_v35, %v8883_v35 }
 0x599   : > { %v8889_v20 = vpop.f32.mrf.mxu3  ;;  %v3910_v2 = vadd.f32 %v3909_v34, %v3908_v63  ;;  %v4011_v23 = vadd.f32 %v4010_v45, %v4009_v18  ;;  %v9073_v63 = vadd.f32 %v8869_v0, %v8879_v21  ;;  %v3975_v12 = vmul.f32 %v9062_v58, %v9062_v58 }
 0x59a   : > { %v9087_v21 = vadd.f32 %v8877_v31, %v8887_v3  ;;  %v3927_v3 = vsel %vm1924_vm5, %v8883_v35, 0.0 }
 0x59b   : > { %v3912_v33 = vadd.f32 %v3911_v43, %v3910_v2  ;;  %v4013_v1 = vadd.f32 %v4012_v6, %v4011_v23  ;;  %v4022_v6 = vsel %vm1924_vm5, %v3974_v53, 0.0  ;;  %v3976_v0 = vmul.f32 %v9073_v63, %v9073_v63 }
 0x59d   : > { %v3914_v60 = vadd.f32 %v3913_v49, %v3912_v33  ;;  %v4015_v34 = vadd.f32 %v4014_v54, %v4013_v1  ;;  %v3923_v49 = vsel %vm1924_vm5, %v9062_v58, 0.0  ;;  %v4024_v54 = vsel %vm1924_vm5, %v3975_v12, 0.0 }
 0x59e   : > { %v9064_v27 = vpop.f32.mrf.mxu2  ;;  %v9096_v1 = vadd.f32 %v8881_v19, %v8889_v20  ;;  %v4026_v31 = vsel %vm1924_vm5, %v3976_v0, 0.0  ;;  %v4028_v19 = vsel %vm1924_vm5, %v3977_v30, 0.0  ;;  %v3929_v20 = vsel %vm1924_vm5, %v9087_v21, 0.0 }
 0x59f   : > { %v3916_v16 = vadd.f32 %v3915_v47, %v3914_v60  ;;  %v4017_v45 = vadd.f32 %v4016_v4, %v4015_v34  ;;  %v3925_v47 = vsel %vm1924_vm5, %v9073_v63, 0.0 }
 0x5a1   : > { %v8901_v13 = vpop.f32.mrf.mxu3  ;;  %v3918_v43 = vadd.f32 %v3917_v44, %v3916_v16  ;;  %v4019_v18 = vadd.f32 %v4018_v40, %v4017_v45  ;;  %v3978_v44 = vmul.f32 %v9087_v21, %v9087_v21 }
 0x5a2   : > { %v9105_v25 = vadd.f32 %v8885_v37, %v8901_v13  ;;  %v3931_v13 = vsel %vm1924_vm5, %v9096_v1, 0.0 }
 0x5a3   : > { %v3920_v2 = vadd.f32 %v3919_v10, %v3918_v43  ;;  %v4021_v52 = vadd.f32 %v4020_v29, %v4019_v18  ;;  %v3979_v10 = vmul.f32 %v9096_v1, %v9096_v1  ;;  %v4030_v37 = vsel %vm1924_vm5, %v3978_v44, 0.0 }
 0x5a4   : > { %v3980_v29 = vmul.f32 %v9105_v25, %v9105_v25 }
 0x5a5   : > { %v3922_v23 = vadd.f32 %v3921_v11, %v3920_v2  ;;  %v4023_v60 = vadd.f32 %v4022_v6, %v4021_v52 }
 0x5a6   : > { %v3874_v34 = vpop.f32.mrf.mxu2 }
 0x5a7   : > { %v3924_v4 = vadd.f32 %v3923_v49, %v3922_v23  ;;  %v4025_v16 = vadd.f32 %v4024_v54, %v4023_v60 }
 0x5a9   : > { %v8937_v57 = vpop.f32.mrf.mxu3  ;;  %v3926_v40 = vadd.f32 %v3925_v47, %v3924_v4  ;;  %v4027_v45 = vadd.f32 %v4026_v31, %v4025_v16 }
 0x5aa   : > { %v9114_v53 = vadd.f32 %v8891_v32, %v8937_v57  ;;  %v4032_v32 = vsel %vm1924_vm5, %v3979_v10, 0.0  ;;  %v3933_v57 = vsel %vm1924_vm5, %v9105_v25, 0.0 }
 0x5ab   : > { %v3928_v43 = vadd.f32 %v3927_v3, %v3926_v40  ;;  %v4029_v12 = vadd.f32 %v4028_v19, %v4027_v45 }
 0x5ac   : > { %v3981_v6 = vmul.f32 %v9114_v53, %v9114_v53 }
 0x5ad   : > { %v3930_v18 = vadd.f32 %v3929_v20, %v3928_v43  ;;  %v4031_v0 = vadd.f32 %v4030_v37, %v4029_v12 }
 0x5ae   : > { %v3877_v60 = vpop.f32.mrf.mxu2  ;;  %v4036_v4 = vsel %vm1924_vm5, %v3981_v6, 0.0 }
 0x5af   : > { %v3932_v52 = vadd.f32 %v3931_v13, %v3930_v18  ;;  %v4033_v47 = vadd.f32 %v4032_v32, %v4031_v0 }
 0x5b1   : > { %v8977_v36 = vpop.f32.mrf.mxu3  ;;  %v3934_v30 = vadd.f32 %v3933_v57, %v3932_v52 }
 0x5b2   : > { %v9123_v11 = vadd.f32 %v8915_v22, %v8977_v36  ;;  %v4034_v22 = vsel %vm1924_vm5, %v3980_v29, 0.0  ;;  %v3935_v36 = vsel %vm1924_vm5, %v9114_v53, 0.0 }
 0x5b3   : > { %v4035_v3 = vadd.f32 %v4034_v22, %v4033_v47  ;;  %v3936_v44 = vadd.f32 %v3935_v36, %v3934_v30 }
 0x5b4   : > { %v3982_v23 = vmul.f32 %v9123_v11, %v9123_v11 }
 0x5b5   : > { %v4037_v19 = vadd.f32 %v4036_v4, %v4035_v3 }
 0x5b6   : > { %v4038_v16 = vsel %vm1924_vm5, %v3982_v23, 0.0  ;;  %v3880_v22 = vpop.f32.mrf.mxu2 }
 0x5b7   : > { %v4039_v37 = vadd.f32 %v4038_v16, %v4037_v19 }
 0x5b9   : > { %v9017_v17 = vpop.f32.mrf.mxu3 }
 0x5ba   : > { %v9132_v49 = vadd.f32 %v8966_v26, %v9017_v17  ;;  %v3937_v26 = vsel %vm1924_vm5, %v9123_v11, 0.0 }
 0x5bb   : > { %v3938_v20 = vadd.f32 %v3937_v26, %v3936_v44 }
 0x5bc   : > { %v3983_v17 = vmul.f32 %v9132_v49, %v9132_v49 }
 0x5be   : > { %v4040_v45 = vsel %vm1924_vm5, %v3983_v17, 0.0 }
 0x5bf   : > { %v4041_v18 = vadd.f32 %v4040_v45, %v4039_v37 }
 0x5c1   : > { %v3755_v46 = vpop.f32.mrf.mxu3 }
 0x5c2   : > { %v9140_v54 = vadd.f32 %v9015_v7, %v3755_v46  ;;  %v3939_v7 = vsel %vm1924_vm5, %v9132_v49, 0.0 }
 0x5c3   : > { %v3940_v13 = vadd.f32 %v3939_v7, %v3938_v20 }
 0x5c4   : > { %v3984_v46 = vmul.f32 %v9140_v54, %v9140_v54 }
 0x5c6   : > { %v4042_v29 = vsel %vm1924_vm5, %v3984_v46, 0.0 }
 0x5c7   : > { %v4043_v0 = vadd.f32 %v4042_v29, %v4041_v18 }
 0x5c9   : > { %v3758_v33 = vpop.f32.mrf.mxu3 }
 0x5ca   : > { %v9148_v31 = vadd.f32 %v9064_v27, %v3758_v33  ;;  %v3941_v27 = vsel %vm1924_vm5, %v9140_v54, 0.0 }
 0x5cc   : > { %v3985_v33 = vmul.f32 %v9148_v31, %v9148_v31 }
 0x5ce   : > { %v4044_v32 = vsel %vm1924_vm5, %v3985_v33, 0.0 }
 0x5cf   : > { %v4045_v47 = vadd.f32 %v4044_v32, %v4043_v0 }
 0x5d1   : > { %v3761_v2 = vpop.f32.mrf.mxu3 }
 0x5d2   : > { %v9155_v40 = vadd.f32 %v3874_v34, %v3761_v2  ;;  %v3943_v34 = vsel %vm1924_vm5, %v9148_v31, 0.0  ;;  %v3942_v2 = vadd.f32 %v3941_v27, %v3940_v13 }
 0x5d4   : > { %v3986_v12 = vmul.f32 %v9155_v40, %v9155_v40  ;;  %v3945_v57 = vsel %vm1924_vm5, %v9155_v40, 0.0  ;;  %v3944_v52 = vadd.f32 %v3943_v34, %v3942_v2 }
 0x5d6   : > { %v4046_v36 = vsel %vm1924_vm5, %v3986_v12, 0.0  ;;  %v3946_v30 = vadd.f32 %v3945_v57, %v3944_v52  ;;  %v3887_v57 = vld [vmem:[%s9383_s10] sm:$0xff] }
 0x5d7   : > { %v4047_v17 = vadd.f32 %v4046_v36, %v4045_v47  ;;  %4138 = vmatpush.msrb.mxu0 %v3887_v57  ;;  %4161 = vmatpush.msrb.mxu1 %v3887_v57 }
 0x5d9   : > { %v3764_v10 = vpop.f32.mrf.mxu3 }
 0x5da   : > { %v9162_v43 = vadd.f32 %v3877_v60, %v3764_v10 }
 0x5dc   : > { %v3987_v6 = vmul.f32 %v9162_v43, %v9162_v43  ;;  %v3947_v23 = vsel %vm1924_vm5, %v9162_v43, 0.0 }
 0x5dd   : > { %v3948_v3 = vadd.f32 %v3947_v23, %v3946_v30 }
 0x5de   : > { %v4048_v4 = vsel %vm1924_vm5, %v3987_v6, 0.0 }
 0x5df   : > { %v4049_v7 = vadd.f32 %v4048_v4, %v4047_v17 }
 0x5e1   : > { %v3767_v60 = vpop.f32.mrf.mxu3 }
 0x5e2   : > { %v9178_v26 = vadd.f32 %v3880_v22, %v3767_v60 }
 0x5e4   : > { %v3949_v44 = vsel %vm1924_vm5, %v9178_v26, 0.0  ;;  %v3988_v16 = vmul.f32 %v9178_v26, %v9178_v26 }
 0x5e5   : > { %v3950_v46 = vadd.f32 %v3949_v44, %v3948_v3 }
 0x5e6   : > { %v4050_v19 = vsel %vm1924_vm5, %v3988_v16, 0.0 }
 0x5e7   : > { %v3951_v20 = vrot.slane %v3950_v46, 4  ;;  %v4051_v10 = vadd.f32 %v4050_v19, %v4049_v7 }
 0x5e9   : > { %v3952_v45 = vadd.f32 %v3951_v20, %v3950_v46  ;;  %v4052_v27 = vrot.slane %v4051_v10, 4 }
 0x5eb   : > { %v3953_v33 = vrot.slane %v3952_v45, 2  ;;  %v4053_v37 = vadd.f32 %v4052_v27, %v4051_v10 }
 0x5ed   : > { %v3954_v13 = vadd.f32 %v3953_v33, %v3952_v45  ;;  %v4054_v29 = vrot.slane %v4053_v37, 2  ;;  %v3884_v45 = vld [vmem:[%s9381_s8] sm:$0x1] }
 0x5ef   : > { %v3955_v34 = vrot.slane %v3954_v13, 1  ;;  %v4055_v12 = vadd.f32 %v4054_v29, %v4053_v37 }
 0x5f1   : > { %v3956_v18 = vadd.f32 %v3955_v34, %v3954_v13  ;;  %v4056_v2 = vrot.slane %v4055_v12, 1 }
 0x5f3   : > { %v4057_v32 = vadd.f32 %v4056_v2, %v4055_v12  ;;  %4432 = vmatmul.msk.f32.vlgmr.msra.gmra.mxu0 %vm1924_vm5, %v3956_v18 }
 0x5f5   : > { %4433 = vmatmul.msk.f32.vlgmr.msra.gmra.mxu1 %vm1924_vm5, %v4057_v32 }
 0x670   : > { %v4078_v6 = vpop.f32.mrf.mxu0 }
 0x671   : > { %v4081_v0 = vmul.f32 %v4078_v6, %v7465_v24 }
 0x672   : > { %v4102_v52 = vpop.f32.mrf.mxu1 }
 0x673   : > { %v4106_v22 = vmul.f32 %v4081_v0, %v4081_v0  ;;  %v4105_v36 = vmul.f32 %v4102_v52, %v7465_v24  ;;  %4434 = vmatmul.msk.f32.vlgmr.msrb.gmra.mxu0 %vm2164_vm7, %v4081_v0  ;;  %v3883_v24 = vld [vmem:[%s9380_s7] sm:$0x1] }
 0x675   : > { %v4107_v23 = vsub.f32 %v4105_v36, %v4106_v22 }
 0x677   : > { %v4108_v47 = vmax.f32 %v4107_v23, 0.0 }
 0x679   : > { %v4109_v30 = vadd.f32 1e-05, %v4108_v47 }
 0x67b   : > { %5512 = vrsqrt.f32 %v4109_v30  ;;  %vm4116_vm1 = vweird.f32 %v4109_v30 }
 0x681   : > { %v5513_v60 = vpop.eup %5512 }
 0x682   : > { %v4111_v4 = vmul.f32 %v5513_v60, %v4109_v30  ;;  %vm4117_vm0 = vweird.f32 %v5513_v60 }
 0x683   : > { %vm4118_vm2 = vmor %vm4116_vm1, %vm4117_vm0 }
 0x684   : > { %v4112_v17 = vmul.f32 %v5513_v60, %v4111_v4 }
 0x686   : > { %v4113_v3 = vmul.f32 0.5, %v4112_v17 }
 0x688   : > { %v4114_v44 = vsub.f32 1.5, %v4113_v3 }
 0x68a   : > { %v4115_v16 = vmul.f32 %v5513_v60, %v4114_v44 }
 0x68c   : > { %v4119_v7 = vsel %vm4118_vm2, %v5513_v60, %v4115_v16 }
 0x68d   : > { %4435 = vmatmul.msk.f32.vlgmr.msrb.gmra.mxu1 %vm2164_vm7, %v4119_v7 }
 0x6f0   : > { %v4140_v20 = vpop.f32.mrf.mxu0 }
 0x70a   : > { %v4163_v46 = vpop.f32.mrf.mxu1 }
 0x70b   : > { %v4166_v19 = vmul.f32 %v4163_v46, %v3883_v24 }
 0x70d   : > { %v4167_v10 = vmul.f32 %v4166_v19, %v4140_v20  ;;  %v9200_v33 = vperm.slane %v4166_v19, 0 }
 0x70f   : > { %v4168_v27 = vsub.f32 %v3884_v45, %v4167_v10  ;;  %v4170_v13 = vmul.f32 %v9200_v33, %v8899_v15  ;;  %v4171_v29 = vmul.f32 %v9200_v33, %v8895_v56  ;;  %v4172_v34 = vmul.f32 %v9200_v33, %v8905_v55 }
 0x710   : > { %v4173_v12 = vmul.f32 %v9200_v33, %v8911_v41  ;;  %v4174_v18 = vmul.f32 %v9200_v33, %v8923_v14  ;;  %v4175_v15 = vmul.f32 %v9200_v33, %v8934_v9  ;;  %v4176_v55 = vmul.f32 %v9200_v33, %v8946_v5 }
 0x711   : > { %v9202_v37 = vperm.slane %v4168_v27, 0  ;;  %v4177_v14 = vmul.f32 %v9200_v33, %v8955_v51  ;;  %v4178_v6 = vmul.f32 %v9200_v33, %v8964_v50  ;;  %v4179_v36 = vmul.f32 %v9200_v33, %v8975_v8 }
 0x712   : > { %v4180_v51 = vmul.f32 %v9200_v33, %v8986_v62  ;;  %v4181_v60 = vmul.f32 %v9200_v33, %v8995_v61  ;;  %v4182_v8 = vmul.f32 %v9200_v33, %v9004_v42  ;;  %v4183_v44 = vmul.f32 %v9200_v33, %v9013_v38 }
 0x713   : > { %v4205_v2 = vadd.f32 %v9202_v37, %v4170_v13  ;;  %v4206_v32 = vadd.f32 %v9202_v37, %v4171_v29  ;;  %v4207_v57 = vadd.f32 %v9202_v37, %v4172_v34  ;;  %v4208_v56 = vadd.f32 %v9202_v37, %v4173_v12 }
 0x714   : > { %v4209_v41 = vadd.f32 %v9202_v37, %v4174_v18  ;;  %v4210_v9 = vadd.f32 %v9202_v37, %v4175_v15  ;;  %v4211_v0 = vadd.f32 %v9202_v37, %v4176_v55  ;;  %v4212_v23 = vadd.f32 %v9202_v37, %v4177_v14 }
 0x715   : > { %v4237_v5 = vmax.f32 %v4205_v2, 0.0  ;;  %v4238_v52 = vmax.f32 %v4206_v32, 0.0  ;;  %v4239_v22 = vmax.f32 %v4207_v57, 0.0  ;;  %v4240_v47 = vmax.f32 %v4208_v56, 0.0 }
 0x716   : > { %v4213_v50 = vadd.f32 %v9202_v37, %v4178_v6  ;;  %v4241_v30 = vmax.f32 %v4209_v41, 0.0  ;;  %v4214_v4 = vadd.f32 %v9202_v37, %v4179_v36  ;;  %v4242_v17 = vmax.f32 %v4210_v9, 0.0 }
 0x717   : > { %4269 = vst.msk [vmem:[%s9227_s12] sm:$0xff] %vm1924_vm5, %v4237_v5  ;;  %v4215_v62 = vadd.f32 %v9202_v37, %v4180_v51  ;;  %v4243_v3 = vmax.f32 %v4211_v0, 0.0  ;;  %v4216_v61 = vadd.f32 %v9202_v37, %v4181_v60  ;;  %v4244_v16 = vmax.f32 %v4212_v23, 0.0 }
 0x718   : > { %4270 = vst.msk [vmem:[%s9227_s12 + $0x8] sm:$0xff] %vm1924_vm5, %v4238_v52  ;;  %v4184_v7 = vmul.f32 %v9200_v33, %v9026_v28  ;;  %v4217_v42 = vadd.f32 %v9202_v37, %v4182_v8  ;;  %v4245_v24 = vmax.f32 %v4213_v50, 0.0  ;;  %v4185_v46 = vmul.f32 %v9200_v33, %v9035_v48 }
 0x719   : > { %4271 = vst.msk [vmem:[%s9227_s12 + $0x10] sm:$0xff] %vm1924_vm5, %v4239_v22  ;;  %v4218_v38 = vadd.f32 %v9202_v37, %v4183_v44  ;;  %v4246_v19 = vmax.f32 %v4214_v4, 0.0  ;;  %v4186_v20 = vmul.f32 %v9200_v33, %v9044_v39  ;;  %v4247_v10 = vmax.f32 %v4215_v62, 0.0 }
 0x71a   : > { %4272 = vst.msk [vmem:[%s9227_s12 + $0x18] sm:$0xff] %vm1924_vm5, %v4240_v47  ;;  %v4219_v28 = vadd.f32 %v9202_v37, %v4184_v7  ;;  %v4187_v45 = vmul.f32 %v9200_v33, %v9053_v59  ;;  %v4220_v48 = vadd.f32 %v9202_v37, %v4185_v46  ;;  %v4248_v27 = vmax.f32 %v4216_v61, 0.0 }
 0x71b   : > { %4273 = vst.msk [vmem:[%s9227_s12 + $0x20] sm:$0xff] %vm1924_vm5, %v4241_v30  ;;  %v4188_v13 = vmul.f32 %v9200_v33, %v9062_v58  ;;  %v4221_v39 = vadd.f32 %v9202_v37, %v4186_v20  ;;  %v4249_v29 = vmax.f32 %v4217_v42, 0.0  ;;  %v4189_v34 = vmul.f32 %v9200_v33, %v9073_v63 }
 0x71c   : > { %4274 = vst.msk [vmem:[%s9227_s12 + $0x28] sm:$0xff] %vm1924_vm5, %v4242_v17  ;;  %v4222_v59 = vadd.f32 %v9202_v37, %v4187_v45  ;;  %v4250_v12 = vmax.f32 %v4218_v38, 0.0  ;;  %v4190_v18 = vmul.f32 %v9200_v33, %v8883_v35  ;;  %v4251_v2 = vmax.f32 %v4219_v28, 0.0 }
 0x71d   : > { %4275 = vst.msk [vmem:[%s9227_s12 + $0x30] sm:$0xff] %vm1924_vm5, %v4243_v3  ;;  %v4223_v58 = vadd.f32 %v9202_v37, %v4188_v13  ;;  %v4191_v32 = vmul.f32 %v9200_v33, %v9087_v21  ;;  %v4224_v63 = vadd.f32 %v9202_v37, %v4189_v34  ;;  %v4252_v57 = vmax.f32 %v4220_v48, 0.0 }
 0x71e   : > { %4276 = vst.msk [vmem:[%s9227_s12 + $0x38] sm:$0xff] %vm1924_vm5, %v4244_v16  ;;  %v4192_v15 = vmul.f32 %v9200_v33, %v9096_v1  ;;  %v4225_v35 = vadd.f32 %v9202_v37, %v4190_v18  ;;  %v4253_v56 = vmax.f32 %v4221_v39, 0.0  ;;  %v4193_v55 = vmul.f32 %v9200_v33, %v9105_v25 }
 0x71f   : > { %4277 = vst.msk [vmem:[%s9227_s12 + $0x40] sm:$0xff] %vm1924_vm5, %v4245_v24  ;;  %v4226_v21 = vadd.f32 %v9202_v37, %v4191_v32  ;;  %v4254_v41 = vmax.f32 %v4222_v59, 0.0  ;;  %v4194_v14 = vmul.f32 %v9200_v33, %v9114_v53  ;;  %v4255_v6 = vmax.f32 %v4223_v58, 0.0 }
 0x720   : > { %4278 = vst.msk [vmem:[%s9227_s12 + $0x48] sm:$0xff] %vm1924_vm5, %v4246_v19  ;;  %v4227_v1 = vadd.f32 %v9202_v37, %v4192_v15  ;;  %v4195_v9 = vmul.f32 %v9200_v33, %v9123_v11  ;;  %v4228_v25 = vadd.f32 %v9202_v37, %v4193_v55  ;;  %v4256_v0 = vmax.f32 %v4224_v63, 0.0 }
 0x721   : > { %4279 = vst.msk [vmem:[%s9227_s12 + $0x50] sm:$0xff] %vm1924_vm5, %v4247_v10  ;;  %v4196_v5 = vmul.f32 %v9200_v33, %v9132_v49  ;;  %v4229_v53 = vadd.f32 %v9202_v37, %v4194_v14  ;;  %v4257_v52 = vmax.f32 %v4225_v35, 0.0  ;;  %v4197_v22 = vmul.f32 %v9200_v33, %v9140_v54 }
 0x722   : > { %4280 = vst.msk [vmem:[%s9227_s12 + $0x58] sm:$0xff] %vm1924_vm5, %v4248_v27  ;;  %v4230_v11 = vadd.f32 %v9202_v37, %v4195_v9  ;;  %v4258_v36 = vmax.f32 %v4226_v21, 0.0  ;;  %v4198_v23 = vmul.f32 %v9200_v33, %v9148_v31  ;;  %v4259_v47 = vmax.f32 %v4227_v1, 0.0 }
 0x723   : > { %4281 = vst.msk [vmem:[%s9227_s12 + $0x60] sm:$0xff] %vm1924_vm5, %v4249_v29  ;;  %v4231_v49 = vadd.f32 %v9202_v37, %v4196_v5  ;;  %v4199_v51 = vmul.f32 %v9200_v33, %v9155_v40  ;;  %v4232_v54 = vadd.f32 %v9202_v37, %v4197_v22  ;;  %v4260_v50 = vmax.f32 %v4228_v25, 0.0 }
 0x724   : > { %4282 = vst.msk [vmem:[%s9227_s12 + $0x68] sm:$0xff] %vm1924_vm5, %v4250_v12  ;;  %v4200_v30 = vmul.f32 %v9200_v33, %v9162_v43  ;;  %v4233_v31 = vadd.f32 %v9202_v37, %v4198_v23  ;;  %v4261_v60 = vmax.f32 %v4229_v53, 0.0  ;;  %v4201_v40 = vmul.f32 %v9200_v33, %v9178_v26 }
 0x725   : > { %4283 = vst.msk [vmem:[%s9227_s12 + $0x70] sm:$0xff] %vm1924_vm5, %v4251_v2  ;;  %v4234_v4 = vadd.f32 %v9202_v37, %v4199_v51  ;;  %v4262_v17 = vmax.f32 %v4230_v11, 0.0  ;;  %v4263_v8 = vmax.f32 %v4231_v49, 0.0  ;;  %v4264_v3 = vmax.f32 %v4232_v54, 0.0 }
 0x726   : > { %4284 = vst.msk [vmem:[%s9227_s12 + $0x78] sm:$0xff] %vm1924_vm5, %v4252_v57  ;;  %v4235_v43 = vadd.f32 %v9202_v37, %v4200_v30  ;;  %v4236_v62 = vadd.f32 %v9202_v37, %v4201_v40  ;;  %v4265_v26 = vmax.f32 %v4233_v31, 0.0 }
 0x727   : > { %4285 = vst.msk [vmem:[%s9227_s12 + $0x80] sm:$0xff] %vm1924_vm5, %v4253_v56  ;;  %v4266_v33 = vmax.f32 %v4234_v4, 0.0 }
 0x728   : > { %4286 = vst.msk [vmem:[%s9227_s12 + $0x88] sm:$0xff] %vm1924_vm5, %v4254_v41  ;;  %v4267_v44 = vmax.f32 %v4235_v43, 0.0  ;;  %v4268_v61 = vmax.f32 %v4236_v62, 0.0 }
 0x729   : > { %4287 = vst.msk [vmem:[%s9227_s12 + $0x90] sm:$0xff] %vm1924_vm5, %v4255_v6 }
 0x72a   : > { %4288 = vst.msk [vmem:[%s9227_s12 + $0x98] sm:$0xff] %vm1924_vm5, %v4256_v0 }
 0x72b   : > { %4289 = vst.msk [vmem:[%s9227_s12 + $0xa0] sm:$0xff] %vm1924_vm5, %v4257_v52 }
 0x72c   : > { %4290 = vst.msk [vmem:[%s9227_s12 + $0xa8] sm:$0xff] %vm1924_vm5, %v4258_v36 }
 0x72d   : > { %4291 = vst.msk [vmem:[%s9227_s12 + $0xb0] sm:$0xff] %vm1924_vm5, %v4259_v47 }
 0x72e   : > { %4292 = vst.msk [vmem:[%s9227_s12 + $0xb8] sm:$0xff] %vm1924_vm5, %v4260_v50 }
 0x72f   : > { %4293 = vst.msk [vmem:[%s9227_s12 + $0xc0] sm:$0xff] %vm1924_vm5, %v4261_v60 }
 0x730   : > { %4294 = vst.msk [vmem:[%s9227_s12 + $0xc8] sm:$0xff] %vm1924_vm5, %v4262_v17 }
 0x731   : > { %4295 = vst.msk [vmem:[%s9227_s12 + $0xd0] sm:$0xff] %vm1924_vm5, %v4263_v8 }
 0x732   : > { %4296 = vst.msk [vmem:[%s9227_s12 + $0xd8] sm:$0xff] %vm1924_vm5, %v4264_v3 }
 0x733   : > { %4297 = vst.msk [vmem:[%s9227_s12 + $0xe0] sm:$0xff] %vm1924_vm5, %v4265_v26 }
 0x734   : > { %4298 = vst.msk [vmem:[%s9227_s12 + $0xe8] sm:$0xff] %vm1924_vm5, %v4266_v33 }
 0x735   : > { %4299 = vst.msk [vmem:[%s9227_s12 + $0xf0] sm:$0xff] %vm1924_vm5, %v4267_v44 }
 0x736   : > { %4300 = vst.msk [vmem:[%s9227_s12 + $0xf8] sm:$0xff] %vm1924_vm5, %v4268_v61 }
 0x737 PF: > { %s21_s17 = sadd.s32 1, %s5556_s17  }
 0x738   : > { %p18_p4 = scmp.ge.s32.totalorder %s21_s17, 4  }
 0x73a   :  { %20 = sbr.rel (!%p18_p4) target bundleno = 1 (0x1), region = 96 }

</bundles_post_ra>
